<compile_context>
chip_gen: v7x
topology: tpu7x:2x2x1
jax: 0.10.0
libtpu: 0.0.40
codegen_flags: <defaults>
</compile_context>

<pallas_src>
import math

import jax
import jax.numpy as jnp
from jax.experimental import pallas as pl
from jax.experimental.pallas import tpu as pltpu

SQRT_HALF = 0.7071067811865476
NE_PAD = 16  # ne_label_size (15) padded to a lane-friendlier width


# ----------------------------------------------------------------------------
# in-kernel math helpers
# ----------------------------------------------------------------------------
def _erf(x):
    # Abramowitz & Stegun 7.1.26 polynomial (|err| ~ 1e-7 with exact divide);
    # the divide is replaced by an approx EUP reciprocal (adds ~1e-4 error),
    # which is still closer to torch's exact-erf GELU than the tanh form.
    p = 0.3275911
    a1, a2, a3, a4, a5 = (0.254829592, -0.284496736, 1.421413741,
                          -1.453152027, 1.061405429)
    sign = jnp.where(x >= 0.0, 1.0, -1.0)
    ax = jnp.abs(x)
    t = pl.reciprocal(1.0 + p * ax, approx=True)
    poly = ((((a5 * t + a4) * t + a3) * t + a2) * t + a1) * t
    return sign * (1.0 - poly * jnp.exp(-ax * ax))


def _gelu(x):
    # erf-based GELU, matching torch.nn.functional.gelu default
    return 0.5 * x * (1.0 + _erf(x * SQRT_HALF))


def _layer_norm(x, g, b, eps=1e-5):
    mu = jnp.mean(x, axis=-1, keepdims=True)
    xc = x - mu
    var = jnp.mean(xc * xc, axis=-1, keepdims=True)
    return xc * jax.lax.rsqrt(var + eps) * g + b


def _abT(a, b):
    # a @ b.T without materializing a transpose
    return jax.lax.dot_general(a, b, (((1,), (1,)), ((), ())),
                               preferred_element_type=jnp.float32)


# ----------------------------------------------------------------------------
# single fused forward kernel (one grid step per batch element)
# ----------------------------------------------------------------------------
def _make_kernel(cfg, layout):
    m_layout, v_layout = layout["m"], layout["v"]
    nheads = cfg["private_nheads"]
    enc_nheads = cfg["enc_nheads"]
    nlayers = cfg["private_nlayers"]
    bert = cfg["bert_dim"]
    hid = cfg["private_hid_dim"]
    D = cfg["biaff_linear_dim"]
    L = cfg["qg_tag_size"]

    def kernel(x_ref, w_ref, v_ref, sm_ref, ne_ref):

        # weights are read from the packed slabs at their use sites
        def M(name, r0=0, nr=None):
            off, r, c = m_layout[name]
            nr = r if nr is None else nr
            return w_ref[off + r0: off + r0 + nr, :c]

        def V(name):
            off, c = v_layout[name]
            return v_ref[off:off + 1, :c]             # (1, c) row, broadcasts

        def dot(a, b):
            return jnp.dot(a, b, preferred_element_type=jnp.float32)

        def tf_layer(x, prefix, nh, final_gelu):
            # nn.TransformerEncoderLayer (post-norm, gelu activation)
            s_len, hdim = x.shape
            hd = hdim // nh
            scale = 1.0 / math.sqrt(hd)
            # fused QKV projection: one (S,H) @ (H,3H) matmul
            qkv = dot(x, M(prefix + ".wqkv")) + V(prefix + ".bqkv")   # (S, 3H)
            head_sum = None
            for h in range(nh):
                q = qkv[:, h * hd:(h + 1) * hd] * scale
                k = qkv[:, hdim + h * hd: hdim + (h + 1) * hd]
                v = qkv[:, 2 * hdim + h * hd: 2 * hdim + (h + 1) * hd]
                sc = _abT(q, k)                                       # (S, S)
                sc = sc - jnp.max(sc, axis=-1, keepdims=True)
                e = jnp.exp(sc)
                a = e * pl.reciprocal(jnp.sum(e, axis=-1, keepdims=True),
                                      approx=True)
                ctx = dot(a, v)                                       # (S, hd)
                # output projection fused with the head sum (row block of W_o)
                part = dot(ctx, M(prefix + ".wo", h * hd, hd))        # (S, H)
                head_sum = part if head_sum is None else head_sum + part
            attn = head_sum + V(prefix + ".bo")
            x1 = _layer_norm(x + attn, V(prefix + ".ln1g"), V(prefix + ".ln1b"))
            hmid = _gelu(dot(x1, M(prefix + ".w1")) + V(prefix + ".b1"))
            ffo = dot(hmid, M(prefix + ".w2")) + V(prefix + ".b2")
            x2 = _layer_norm(x1 + ffo, V(prefix + ".ln2g"), V(prefix + ".ln2b"))
            return _gelu(x2) if final_gelu else x2

        # ---- synthetic upstream encoder (Multitask_Encoder stand-in) ----
        x = x_ref[0]                                   # (S, bert_dim)
        enc_out = tf_layer(x, "enc_tf", enc_nheads, final_gelu=False)

        # ---- NE private encoder: factorizer+gelu -> transformer -> gelu ----
        h = _gelu(dot(enc_out, M("ne_fact.w")) + V("ne_fact.b"))
        for i in range(nlayers):
            h = tf_layer(h, "ne_tf.%d" % i, nheads,
                         final_gelu=(i == nlayers - 1))
        ne_private = h

        # ---- NE classifier (label axis padded to NE_PAD, pad bias = -1e9) ----
        ne_logits = dot(ne_private, M("ne_cls.w")) + V("ne_cls.b")   # (S, 16)
        ne_ref[0] = ne_logits

        # ---- Label_Encoder ('test' mode): one_hot(argmax) @ W_emb ----
        mx = jnp.max(ne_logits, axis=-1, keepdims=True)
        col = jax.lax.broadcasted_iota(jnp.int32, ne_logits.shape, 1)
        first_max = jnp.min(jnp.where(ne_logits >= mx, col, NE_PAD),
                            axis=-1, keepdims=True)    # torch.max tie-break
        one_hot = (col == first_max).astype(jnp.float32)
        label_emb = dot(one_hot, M("label_emb"))       # (S, emb)

        # ---- QG/TF private encoder: factorizer over 3 channels (no concat) ----
        qg_rows = m_layout["qg_fact.w"][1]
        q = (dot(enc_out, M("qg_fact.w", 0, bert))
             + dot(ne_private, M("qg_fact.w", bert, hid))
             + dot(label_emb, M("qg_fact.w", bert + hid, qg_rows - bert - hid))
             + V("qg_fact.b"))
        q = _gelu(q)
        for i in range(nlayers):
            q = tf_layer(q, "qg_tf.%d" % i, nheads,
                         final_gelu=(i == nlayers - 1))

        # ---- fc_head / fc_tail (+ gelu) ----
        head = _gelu(dot(q, M("fc_head.w")) + V("fc_head.b"))
        tail = _gelu(dot(q, M("fc_tail.w")) + V("fc_tail.b"))

        # ---- biaffine (ones-column decomposed, labels batched) + softmax ----
        hc = dot(head, M("biaff.core_plus"))           # (S, L*D + L)
        utc = M("biaff.u_tail_corner")                 # (L, D + 1)
        rowv = _abT(utc[:, :D], tail) + utc[:, D:D + 1]   # (L, S)
        scores = []
        for l in range(L):
            s_l = (_abT(hc[:, l * D:(l + 1) * D], tail)        # core term
                   + hc[:, L * D + l: L * D + l + 1]           # head-vec term
                   + rowv[l:l + 1, :])                         # tail-vec+corner
            scores.append(s_l)
        m = scores[0]
        for s_l in scores[1:]:
            m = jnp.maximum(m, s_l)
        exps = [jnp.exp(s_l - m) for s_l in scores]
        den = exps[0]
        for e_l in exps[1:]:
            den = den + e_l
        inv = 1.0 / den                  # exact: keeps label probs sum-to-1
        for l in range(L):
            sm_ref[0, l] = exps[l] * inv

    return kernel


# ----------------------------------------------------------------------------
# wrapper
# ----------------------------------------------------------------------------
def forward(arrays, layout, cfg, input_ids):
    b_sz, s_len = input_ids.shape
    bert = cfg["bert_dim"]
    L = cfg["qg_tag_size"]

    # TODO(synk): the pretrained BERT-based Multitask_Encoder cannot be loaded
    # here; token+position embeddings plus the in-kernel encoder transformer
    # layer act as a deterministic synthetic stand-in.
    emb = (jnp.take(arrays["tok_emb"], input_ids, axis=0)
           + arrays["pos_emb"][None, :s_len, :])

    kernel = _make_kernel(cfg, layout)
    sm_lxy, ne_pad = pl.pallas_call(
        kernel,
        out_shape=(jax.ShapeDtypeStruct((b_sz, L, s_len, s_len), jnp.float32),
                   jax.ShapeDtypeStruct((b_sz, s_len, NE_PAD), jnp.float32)),
        grid=(b_sz,),
        in_specs=[pl.BlockSpec((1, s_len, bert), lambda b: (b, 0, 0)),
                  pl.BlockSpec(arrays["w_slab"].shape, lambda b: (0, 0)),
                  pl.BlockSpec(arrays["v_slab"].shape, lambda b: (0, 0))],
        out_specs=(pl.BlockSpec((1, L, s_len, s_len),
                                lambda b: (b, 0, 0, 0)),
                   pl.BlockSpec((1, s_len, NE_PAD), lambda b: (b, 0, 0))),
        compiler_params=pltpu.CompilerParams(dimension_semantics=("parallel",)),
    )(emb, arrays["w_slab"], arrays["v_slab"])

    sm_biaff_scores = jnp.transpose(sm_lxy, (0, 2, 3, 1))      # (b, x, y, L)
    ne_logits = ne_pad[..., :cfg["ne_label_size"]]
    return sm_biaff_scores, ne_logits


# ----------------------------------------------------------------------------
# Parameter construction + host-side slab packing.
# Dense weights stored as (in, out) so the kernel computes x @ W; QKV fused
# to (H, 3H); biaffine U decomposed and batched over labels host-side.
# ----------------------------------------------------------------------------
CONFIG = dict(
    vocab_size=50,
    max_seq_len=16,
    bert_dim=32,               # hidden size of the (synthetic) upstream encoder
    enc_nheads=4,
    enc_feed_forward_dim=64,
    private_hid_dim=32,
    private_nheads=4,
    private_nlayers=1,
    private_transformer_feed_forward_dim=64,
    ne_label_size=15,
    qg_tag_size=2,
    biaff_linear_dim=32,
    label_emb_dim=16,
    transfer_hidden=True,
    transfer_label=True,
)


def _dense_init(key, din, dout, scale=0.02):
    kw, kb = jax.random.split(key)
    return (scale * jax.random.normal(kw, (din, dout), jnp.float32),
            scale * jax.random.normal(kb, (dout,), jnp.float32))


def _tf_layer_weights(key, hdim, ffdim):
    ks = jax.random.split(key, 6)
    wq, bq = _dense_init(ks[0], hdim, hdim)
    wk, bk = _dense_init(ks[1], hdim, hdim)
    wv, bv = _dense_init(ks[2], hdim, hdim)
    wo, bo = _dense_init(ks[3], hdim, hdim)
    w1, b1 = _dense_init(ks[4], hdim, ffdim)
    w2, b2 = _dense_init(ks[5], ffdim, hdim)
    mats = {"wqkv": jnp.concatenate([wq, wk, wv], axis=1),  # (H, 3H)
            "wo": wo, "w1": w1, "w2": w2}
    vecs = {"bqkv": jnp.concatenate([bq, bk, bv]), "bo": bo, "b1": b1, "b2": b2,
            "ln1g": jnp.ones((hdim,), jnp.float32),
            "ln1b": jnp.zeros((hdim,), jnp.float32),
            "ln2g": jnp.ones((hdim,), jnp.float32),
            "ln2b": jnp.zeros((hdim,), jnp.float32)}
    return mats, vecs


def _pack_matrices(entries):
    """Pack 2-D weights into one (R,128) slab; each entry 8-row aligned."""
    layout, blocks, off = {}, [], 0
    for name, a in entries:
        a = jnp.asarray(a, jnp.float32)
        r, c = a.shape
        rp = ((r + 7) // 8) * 8
        blk = jnp.zeros((rp, 128), jnp.float32).at[:r, :c].set(a)
        layout[name] = (off, r, c)
        blocks.append(blk)
        off += rp
    return jnp.concatenate(blocks, axis=0), layout


def _pack_vectors(entries):
    """Pack 1-D bias/LN vectors into one (R,128) slab, one row per vector."""
    layout, rows = {}, []
    for i, (name, v) in enumerate(entries):
        v = jnp.asarray(v, jnp.float32).reshape(-1)
        layout[name] = (i, int(v.shape[0]))
        rows.append(jnp.zeros((1, 128), jnp.float32).at[0, :v.shape[0]].set(v))
    pad = (-len(rows)) % 8
    if pad:
        rows.append(jnp.zeros((pad, 128), jnp.float32))
    return jnp.concatenate(rows, axis=0), layout


def init_params(key, cfg):
    keys = jax.random.split(key, 12)
    hid = cfg["private_hid_dim"]
    bert = cfg["bert_dim"]
    nl = cfg["ne_label_size"]
    ff = cfg["private_transformer_feed_forward_dim"]
    emb_dim = cfg["label_emb_dim"]
    D = cfg["biaff_linear_dim"]
    L = cfg["qg_tag_size"]
    nlayers = cfg["private_nlayers"]

    m_entries, v_entries = [], []

    def add_tf(prefix, k, hdim, ffdim):
        mats, vecs = _tf_layer_weights(k, hdim, ffdim)
        for n, a in mats.items():
            m_entries.append((prefix + "." + n, a))
        for n, a in vecs.items():
            v_entries.append((prefix + "." + n, a))

    # synthetic upstream encoder layer (Multitask_Encoder stand-in)
    add_tf("enc_tf", keys[2], bert, cfg["enc_feed_forward_dim"])

    w, b = _dense_init(keys[3], bert, hid)
    m_entries.append(("ne_fact.w", w))
    v_entries.append(("ne_fact.b", b))
    for i, k in enumerate(jax.random.split(keys[4], nlayers)):
        add_tf("ne_tf.%d" % i, k, hid, ff)

    w, b = _dense_init(keys[5], hid, nl)
    m_entries.append(("ne_cls.w", jnp.pad(w, ((0, 0), (0, NE_PAD - nl)))))
    v_entries.append(("ne_cls.b",
                      jnp.concatenate([b, jnp.full((NE_PAD - nl,), -1e9,
                                                   jnp.float32)])))

    # Label_Encoder: nn.Linear(ne_label_size, label_emb_dim, bias=False)
    w_le = 0.02 * jax.random.normal(keys[6], (nl, emb_dim), jnp.float32)
    m_entries.append(("label_emb", jnp.pad(w_le, ((0, NE_PAD - nl), (0, 0)))))

    qg_in = bert
    if cfg["transfer_hidden"]:
        qg_in += hid
    if cfg["transfer_label"]:
        qg_in += emb_dim
    w, b = _dense_init(keys[7], qg_in, hid)
    m_entries.append(("qg_fact.w", w))
    v_entries.append(("qg_fact.b", b))
    for i, k in enumerate(jax.random.split(keys[8], nlayers)):
        add_tf("qg_tf.%d" % i, k, hid, ff)

    w, b = _dense_init(keys[9], hid, D)
    m_entries.append(("fc_head.w", w))
    v_entries.append(("fc_head.b", b))
    w, b = _dense_init(keys[10], hid, D)
    m_entries.append(("fc_tail.w", w))
    v_entries.append(("fc_tail.b", b))

    # biaffine U decomposed: core (per-label, concatenated along lanes),
    # head-vector columns appended, tail-vector rows + corner scalar.
    U = jax.random.normal(keys[11], (L, D + 1, D + 1), jnp.float32)
    core_cat = jnp.concatenate([U[l, :D, :D] for l in range(L)], axis=1)
    u_head_cols = jnp.transpose(U[:, :D, D])                  # (D, L)
    core_plus = jnp.concatenate([core_cat, u_head_cols], axis=1)  # (D, L*D+L)
    u_tail_corner = jnp.concatenate([U[:, D, :D], U[:, D, D][:, None]],
                                    axis=1)                   # (L, D+1)
    m_entries.append(("biaff.core_plus", core_plus))
    m_entries.append(("biaff.u_tail_corner", u_tail_corner))

    w_slab, m_layout = _pack_matrices(m_entries)
    v_slab, v_layout = _pack_vectors(v_entries)

    arrays = {
        "tok_emb": 0.02 * jax.random.normal(keys[0], (cfg["vocab_size"], bert),
                                            jnp.float32),
        "pos_emb": 0.02 * jax.random.normal(keys[1], (cfg["max_seq_len"], bert),
                                            jnp.float32),
        "w_slab": w_slab,
        "v_slab": v_slab,
    }
    return arrays, {"m": m_layout, "v": v_layout}


if __name__ == "__main__":
    key = jax.random.PRNGKey(0)
    pkey, dkey = jax.random.split(key)
    arrays, layout = init_params(pkey, CONFIG)

    batch, seq = 2, 16          # seq = max_seq_len: better sublane occupancy
    enc_input_ids = jax.random.randint(dkey, (batch, seq), 0,
                                       CONFIG["vocab_size"], dtype=jnp.int32)

    fwd = jax.jit(lambda arrs, ids: forward(arrs, layout, CONFIG, ids))
    sm_scores, ne_logits = fwd(arrays, enc_input_ids)
    jax.block_until_ready((sm_scores, ne_logits))

    assert sm_scores.shape == (batch, seq, seq, CONFIG["qg_tag_size"])
    assert ne_logits.shape == (batch, seq, CONFIG["ne_label_size"])
    assert bool(jnp.allclose(jnp.sum(sm_scores, axis=-1), 1.0, atol=1e-5))
    assert bool(jnp.all(jnp.isfinite(ne_logits)))
    print("KERNEL_OK")
</pallas_src>

<mosaic_0001>
module attributes {stable_mosaic.version = 11 : i64} {
  func.func @kernel(%arg0: i32, %arg1: memref<1x16x32xf32, #tpu.memory_space<vmem>>, %arg2: memref<744x128xf32, #tpu.memory_space<vmem>>, %arg3: memref<32x128xf32, #tpu.memory_space<vmem>>, %arg4: memref<1x2x16x16xf32, #tpu.memory_space<vmem>>, %arg5: memref<1x16x16xf32, #tpu.memory_space<vmem>>) attributes {dimension_semantics = [#tpu.dimension_semantics<parallel>], iteration_bounds = array<i64: 2>, scalar_prefetch = 0 : i64, scratch_operands = 0 : i64, tpu.core_type = #tpu.core_type<tc>, window_params = [{transform_indices = @transform_0, window_bounds = array<i64: 1, 16, 32>}, {pipeline_mode = #tpu.pipeline_mode<synchronous>, transform_indices = @transform_1, window_bounds = array<i64: 744, 128>}, {pipeline_mode = #tpu.pipeline_mode<synchronous>, transform_indices = @transform_2, window_bounds = array<i64: 32, 128>}, {transform_indices = @transform_3, window_bounds = array<i64: 1, 2, 16, 16>}, {transform_indices = @transform_4, window_bounds = array<i64: 1, 16, 16>}]} {
    %c0 = arith.constant 0 : index
    %c0_0 = arith.constant 0 : index
    %c0_1 = arith.constant 0 : index
    %0 = vector.load %arg1[%c0, %c0_0, %c0_1] : memref<1x16x32xf32, #tpu.memory_space<vmem>>, vector<1x16x32xf32>
    %1 = vector.shape_cast %0 : vector<1x16x32xf32> to vector<16x32xf32>
    %c0_2 = arith.constant 0 : index
    %c0_3 = arith.constant 0 : index
    %2 = vector.load %arg2[%c0_2, %c0_3] : memref<744x128xf32, #tpu.memory_space<vmem>>, vector<32x96xf32>
    %cst = arith.constant dense<0.000000e+00> : vector<16x96xf32>
    %3 = tpu.matmul %1, %2, %cst {dimension_numbers = #tpu.dot_dimension_numbers<[1], [0], [0], [1], [0, 0, 1, 1], [], []>} : vector<16x32xf32>, vector<32x96xf32>, vector<16x96xf32> -> vector<16x96xf32>
    %c0_4 = arith.constant 0 : index
    %c0_5 = arith.constant 0 : index
    %4 = vector.load %arg3[%c0_4, %c0_5] : memref<32x128xf32, #tpu.memory_space<vmem>>, vector<1x96xf32>
    %5 = vector.broadcast %4 : vector<1x96xf32> to vector<16x96xf32>
    %6 = arith.addf %3, %5 : vector<16x96xf32>
    %7 = vector.extract_strided_slice %6 {offsets = [0, 0], sizes = [16, 8], strides = [1, 1]} : vector<16x96xf32> to vector<16x8xf32>
    %cst_6 = arith.constant 0.353553385 : f32
    %8 = vector.broadcast %cst_6 : f32 to vector<16x8xf32>
    %9 = arith.mulf %7, %8 : vector<16x8xf32>
    %10 = vector.extract_strided_slice %6 {offsets = [0, 32], sizes = [16, 8], strides = [1, 1]} : vector<16x96xf32> to vector<16x8xf32>
    %11 = vector.extract_strided_slice %6 {offsets = [0, 64], sizes = [16, 8], strides = [1, 1]} : vector<16x96xf32> to vector<16x8xf32>
    %cst_7 = arith.constant dense<0.000000e+00> : vector<16x16xf32>
    %12 = tpu.matmul %9, %10, %cst_7 {dimension_numbers = #tpu.dot_dimension_numbers<[1], [1], [0], [0], [0, 0, 1, 0], [], []>} : vector<16x8xf32>, vector<16x8xf32>, vector<16x16xf32> -> vector<16x16xf32>
    %cst_8 = arith.constant dense<0xFF800000> : vector<16xf32>
    %13 = vector.multi_reduction <maximumf>, %12, %cst_8 [1] : vector<16x16xf32> to vector<16xf32>
    %14 = vector.shape_cast %13 : vector<16xf32> to vector<16x1xf32>
    %15 = vector.broadcast %14 : vector<16x1xf32> to vector<16x16xf32>
    %16 = arith.subf %12, %15 : vector<16x16xf32>
    %17 = math.exp %16 : vector<16x16xf32>
    %cst_9 = arith.constant dense<0.000000e+00> : vector<16xf32>
    %18 = vector.multi_reduction <add>, %17, %cst_9 [1] : vector<16x16xf32> to vector<16xf32>
    %19 = vector.shape_cast %18 : vector<16xf32> to vector<16x1xf32>
    %20 = tpu.reciprocal %19 {approx = true} : vector<16x1xf32> -> vector<16x1xf32>
    %21 = vector.broadcast %20 : vector<16x1xf32> to vector<16x16xf32>
    %22 = arith.mulf %17, %21 : vector<16x16xf32>
    %cst_10 = arith.constant dense<0.000000e+00> : vector<16x8xf32>
    %23 = tpu.matmul %22, %11, %cst_10 {dimension_numbers = #tpu.dot_dimension_numbers<[1], [0], [0], [1], [0, 0, 1, 1], [], []>} : vector<16x16xf32>, vector<16x8xf32>, vector<16x8xf32> -> vector<16x8xf32>
    %c32 = arith.constant 32 : index
    %c0_11 = arith.constant 0 : index
    %24 = vector.load %arg2[%c32, %c0_11] : memref<744x128xf32, #tpu.memory_space<vmem>>, vector<8x32xf32>
    %cst_12 = arith.constant dense<0.000000e+00> : vector<16x32xf32>
    %25 = tpu.matmul %23, %24, %cst_12 {dimension_numbers = #tpu.dot_dimension_numbers<[1], [0], [0], [1], [0, 0, 1, 1], [], []>} : vector<16x8xf32>, vector<8x32xf32>, vector<16x32xf32> -> vector<16x32xf32>
    %26 = vector.extract_strided_slice %6 {offsets = [0, 8], sizes = [16, 8], strides = [1, 1]} : vector<16x96xf32> to vector<16x8xf32>
    %cst_13 = arith.constant 0.353553385 : f32
    %27 = vector.broadcast %cst_13 : f32 to vector<16x8xf32>
    %28 = arith.mulf %26, %27 : vector<16x8xf32>
    %29 = vector.extract_strided_slice %6 {offsets = [0, 40], sizes = [16, 8], strides = [1, 1]} : vector<16x96xf32> to vector<16x8xf32>
    %30 = vector.extract_strided_slice %6 {offsets = [0, 72], sizes = [16, 8], strides = [1, 1]} : vector<16x96xf32> to vector<16x8xf32>
    %cst_14 = arith.constant dense<0.000000e+00> : vector<16x16xf32>
    %31 = tpu.matmul %28, %29, %cst_14 {dimension_numbers = #tpu.dot_dimension_numbers<[1], [1], [0], [0], [0, 0, 1, 0], [], []>} : vector<16x8xf32>, vector<16x8xf32>, vector<16x16xf32> -> vector<16x16xf32>
    %cst_15 = arith.constant dense<0xFF800000> : vector<16xf32>
    %32 = vector.multi_reduction <maximumf>, %31, %cst_15 [1] : vector<16x16xf32> to vector<16xf32>
    %33 = vector.shape_cast %32 : vector<16xf32> to vector<16x1xf32>
    %34 = vector.broadcast %33 : vector<16x1xf32> to vector<16x16xf32>
    %35 = arith.subf %31, %34 : vector<16x16xf32>
    %36 = math.exp %35 : vector<16x16xf32>
    %cst_16 = arith.constant dense<0.000000e+00> : vector<16xf32>
    %37 = vector.multi_reduction <add>, %36, %cst_16 [1] : vector<16x16xf32> to vector<16xf32>
    %38 = vector.shape_cast %37 : vector<16xf32> to vector<16x1xf32>
    %39 = tpu.reciprocal %38 {approx = true} : vector<16x1xf32> -> vector<16x1xf32>
    %40 = vector.broadcast %39 : vector<16x1xf32> to vector<16x16xf32>
    %41 = arith.mulf %36, %40 : vector<16x16xf32>
    %cst_17 = arith.constant dense<0.000000e+00> : vector<16x8xf32>
    %42 = tpu.matmul %41, %30, %cst_17 {dimension_numbers = #tpu.dot_dimension_numbers<[1], [0], [0], [1], [0, 0, 1, 1], [], []>} : vector<16x16xf32>, vector<16x8xf32>, vector<16x8xf32> -> vector<16x8xf32>
    %c40 = arith.constant 40 : index
    %c0_18 = arith.constant 0 : index
    %43 = vector.load %arg2[%c40, %c0_18] : memref<744x128xf32, #tpu.memory_space<vmem>>, vector<8x32xf32>
    %cst_19 = arith.constant dense<0.000000e+00> : vector<16x32xf32>
    %44 = tpu.matmul %42, %43, %cst_19 {dimension_numbers = #tpu.dot_dimension_numbers<[1], [0], [0], [1], [0, 0, 1, 1], [], []>} : vector<16x8xf32>, vector<8x32xf32>, vector<16x32xf32> -> vector<16x32xf32>
    %45 = arith.addf %25, %44 : vector<16x32xf32>
    %46 = vector.extract_strided_slice %6 {offsets = [0, 16], sizes = [16, 8], strides = [1, 1]} : vector<16x96xf32> to vector<16x8xf32>
    %cst_20 = arith.constant 0.353553385 : f32
    %47 = vector.broadcast %cst_20 : f32 to vector<16x8xf32>
    %48 = arith.mulf %46, %47 : vector<16x8xf32>
    %49 = vector.extract_strided_slice %6 {offsets = [0, 48], sizes = [16, 8], strides = [1, 1]} : vector<16x96xf32> to vector<16x8xf32>
    %50 = vector.extract_strided_slice %6 {offsets = [0, 80], sizes = [16, 8], strides = [1, 1]} : vector<16x96xf32> to vector<16x8xf32>
    %cst_21 = arith.constant dense<0.000000e+00> : vector<16x16xf32>
    %51 = tpu.matmul %48, %49, %cst_21 {dimension_numbers = #tpu.dot_dimension_numbers<[1], [1], [0], [0], [0, 0, 1, 0], [], []>} : vector<16x8xf32>, vector<16x8xf32>, vector<16x16xf32> -> vector<16x16xf32>
    %cst_22 = arith.constant dense<0xFF800000> : vector<16xf32>
    %52 = vector.multi_reduction <maximumf>, %51, %cst_22 [1] : vector<16x16xf32> to vector<16xf32>
    %53 = vector.shape_cast %52 : vector<16xf32> to vector<16x1xf32>
    %54 = vector.broadcast %53 : vector<16x1xf32> to vector<16x16xf32>
    %55 = arith.subf %51, %54 : vector<16x16xf32>
    %56 = math.exp %55 : vector<16x16xf32>
    %cst_23 = arith.constant dense<0.000000e+00> : vector<16xf32>
    %57 = vector.multi_reduction <add>, %56, %cst_23 [1] : vector<16x16xf32> to vector<16xf32>
    %58 = vector.shape_cast %57 : vector<16xf32> to vector<16x1xf32>
    %59 = tpu.reciprocal %58 {approx = true} : vector<16x1xf32> -> vector<16x1xf32>
    %60 = vector.broadcast %59 : vector<16x1xf32> to vector<16x16xf32>
    %61 = arith.mulf %56, %60 : vector<16x16xf32>
    %cst_24 = arith.constant dense<0.000000e+00> : vector<16x8xf32>
    %62 = tpu.matmul %61, %50, %cst_24 {dimension_numbers = #tpu.dot_dimension_numbers<[1], [0], [0], [1], [0, 0, 1, 1], [], []>} : vector<16x16xf32>, vector<16x8xf32>, vector<16x8xf32> -> vector<16x8xf32>
    %c48 = arith.constant 48 : index
    %c0_25 = arith.constant 0 : index
    %63 = vector.load %arg2[%c48, %c0_25] : memref<744x128xf32, #tpu.memory_space<vmem>>, vector<8x32xf32>
    %cst_26 = arith.constant dense<0.000000e+00> : vector<16x32xf32>
    %64 = tpu.matmul %62, %63, %cst_26 {dimension_numbers = #tpu.dot_dimension_numbers<[1], [0], [0], [1], [0, 0, 1, 1], [], []>} : vector<16x8xf32>, vector<8x32xf32>, vector<16x32xf32> -> vector<16x32xf32>
    %65 = arith.addf %45, %64 : vector<16x32xf32>
    %66 = vector.extract_strided_slice %6 {offsets = [0, 24], sizes = [16, 8], strides = [1, 1]} : vector<16x96xf32> to vector<16x8xf32>
    %cst_27 = arith.constant 0.353553385 : f32
    %67 = vector.broadcast %cst_27 : f32 to vector<16x8xf32>
    %68 = arith.mulf %66, %67 : vector<16x8xf32>
    %69 = vector.extract_strided_slice %6 {offsets = [0, 56], sizes = [16, 8], strides = [1, 1]} : vector<16x96xf32> to vector<16x8xf32>
    %70 = vector.extract_strided_slice %6 {offsets = [0, 88], sizes = [16, 8], strides = [1, 1]} : vector<16x96xf32> to vector<16x8xf32>
    %cst_28 = arith.constant dense<0.000000e+00> : vector<16x16xf32>
    %71 = tpu.matmul %68, %69, %cst_28 {dimension_numbers = #tpu.dot_dimension_numbers<[1], [1], [0], [0], [0, 0, 1, 0], [], []>} : vector<16x8xf32>, vector<16x8xf32>, vector<16x16xf32> -> vector<16x16xf32>
    %cst_29 = arith.constant dense<0xFF800000> : vector<16xf32>
    %72 = vector.multi_reduction <maximumf>, %71, %cst_29 [1] : vector<16x16xf32> to vector<16xf32>
    %73 = vector.shape_cast %72 : vector<16xf32> to vector<16x1xf32>
    %74 = vector.broadcast %73 : vector<16x1xf32> to vector<16x16xf32>
    %75 = arith.subf %71, %74 : vector<16x16xf32>
    %76 = math.exp %75 : vector<16x16xf32>
    %cst_30 = arith.constant dense<0.000000e+00> : vector<16xf32>
    %77 = vector.multi_reduction <add>, %76, %cst_30 [1] : vector<16x16xf32> to vector<16xf32>
    %78 = vector.shape_cast %77 : vector<16xf32> to vector<16x1xf32>
    %79 = tpu.reciprocal %78 {approx = true} : vector<16x1xf32> -> vector<16x1xf32>
    %80 = vector.broadcast %79 : vector<16x1xf32> to vector<16x16xf32>
    %81 = arith.mulf %76, %80 : vector<16x16xf32>
    %cst_31 = arith.constant dense<0.000000e+00> : vector<16x8xf32>
    %82 = tpu.matmul %81, %70, %cst_31 {dimension_numbers = #tpu.dot_dimension_numbers<[1], [0], [0], [1], [0, 0, 1, 1], [], []>} : vector<16x16xf32>, vector<16x8xf32>, vector<16x8xf32> -> vector<16x8xf32>
    %c56 = arith.constant 56 : index
    %c0_32 = arith.constant 0 : index
    %83 = vector.load %arg2[%c56, %c0_32] : memref<744x128xf32, #tpu.memory_space<vmem>>, vector<8x32xf32>
    %cst_33 = arith.constant dense<0.000000e+00> : vector<16x32xf32>
    %84 = tpu.matmul %82, %83, %cst_33 {dimension_numbers = #tpu.dot_dimension_numbers<[1], [0], [0], [1], [0, 0, 1, 1], [], []>} : vector<16x8xf32>, vector<8x32xf32>, vector<16x32xf32> -> vector<16x32xf32>
    %85 = arith.addf %65, %84 : vector<16x32xf32>
    %c1 = arith.constant 1 : index
    %c0_34 = arith.constant 0 : index
    %86 = vector.load %arg3[%c1, %c0_34] : memref<32x128xf32, #tpu.memory_space<vmem>>, vector<1x32xf32>
    %87 = vector.broadcast %86 : vector<1x32xf32> to vector<16x32xf32>
    %88 = arith.addf %85, %87 : vector<16x32xf32>
    %89 = arith.addf %1, %88 : vector<16x32xf32>
    %c4 = arith.constant 4 : index
    %c0_35 = arith.constant 0 : index
    %90 = vector.load %arg3[%c4, %c0_35] : memref<32x128xf32, #tpu.memory_space<vmem>>, vector<1x32xf32>
    %c5 = arith.constant 5 : index
    %c0_36 = arith.constant 0 : index
    %91 = vector.load %arg3[%c5, %c0_36] : memref<32x128xf32, #tpu.memory_space<vmem>>, vector<1x32xf32>
    %cst_37 = arith.constant dense<0.000000e+00> : vector<16xf32>
    %92 = vector.multi_reduction <add>, %89, %cst_37 [1] : vector<16x32xf32> to vector<16xf32>
    %93 = vector.shape_cast %92 : vector<16xf32> to vector<16x1xf32>
    %cst_38 = arith.constant 3.200000e+01 : f32
    %94 = vector.broadcast %cst_38 : f32 to vector<16x1xf32>
    %95 = arith.divf %93, %94 : vector<16x1xf32>
    %96 = vector.broadcast %95 : vector<16x1xf32> to vector<16x32xf32>
    %97 = arith.subf %89, %96 : vector<16x32xf32>
    %98 = arith.mulf %97, %97 : vector<16x32xf32>
    %cst_39 = arith.constant dense<0.000000e+00> : vector<16xf32>
    %99 = vector.multi_reduction <add>, %98, %cst_39 [1] : vector<16x32xf32> to vector<16xf32>
    %100 = vector.shape_cast %99 : vector<16xf32> to vector<16x1xf32>
    %cst_40 = arith.constant 3.200000e+01 : f32
    %101 = vector.broadcast %cst_40 : f32 to vector<16x1xf32>
    %102 = arith.divf %100, %101 : vector<16x1xf32>
    %cst_41 = arith.constant 9.99999974E-6 : f32
    %103 = vector.broadcast %cst_41 : f32 to vector<16x1xf32>
    %104 = arith.addf %102, %103 : vector<16x1xf32>
    %105 = math.rsqrt %104 : vector<16x1xf32>
    %106 = vector.broadcast %105 : vector<16x1xf32> to vector<16x32xf32>
    %107 = arith.mulf %97, %106 : vector<16x32xf32>
    %108 = vector.broadcast %90 : vector<1x32xf32> to vector<16x32xf32>
    %109 = arith.mulf %107, %108 : vector<16x32xf32>
    %110 = vector.broadcast %91 : vector<1x32xf32> to vector<16x32xf32>
    %111 = arith.addf %109, %110 : vector<16x32xf32>
    %c64 = arith.constant 64 : index
    %c0_42 = arith.constant 0 : index
    %112 = vector.load %arg2[%c64, %c0_42] : memref<744x128xf32, #tpu.memory_space<vmem>>, vector<32x64xf32>
    %cst_43 = arith.constant dense<0.000000e+00> : vector<16x64xf32>
    %113 = tpu.matmul %111, %112, %cst_43 {dimension_numbers = #tpu.dot_dimension_numbers<[1], [0], [0], [1], [0, 0, 1, 1], [], []>} : vector<16x32xf32>, vector<32x64xf32>, vector<16x64xf32> -> vector<16x64xf32>
    %c2 = arith.constant 2 : index
    %c0_44 = arith.constant 0 : index
    %114 = vector.load %arg3[%c2, %c0_44] : memref<32x128xf32, #tpu.memory_space<vmem>>, vector<1x64xf32>
    %115 = vector.broadcast %114 : vector<1x64xf32> to vector<16x64xf32>
    %116 = arith.addf %113, %115 : vector<16x64xf32>
    %cst_45 = arith.constant 5.000000e-01 : f32
    %117 = vector.broadcast %cst_45 : f32 to vector<16x64xf32>
    %118 = arith.mulf %117, %116 : vector<16x64xf32>
    %cst_46 = arith.constant 0.707106769 : f32
    %119 = vector.broadcast %cst_46 : f32 to vector<16x64xf32>
    %120 = arith.mulf %116, %119 : vector<16x64xf32>
    %cst_47 = arith.constant 0.000000e+00 : f32
    %121 = vector.broadcast %cst_47 : f32 to vector<16x64xf32>
    %122 = arith.cmpf oge, %120, %121 : vector<16x64xf32>
    %cst_48 = arith.constant 1.000000e+00 : f32
    %cst_49 = arith.constant -1.000000e+00 : f32
    %123 = vector.broadcast %cst_48 : f32 to vector<16x64xf32>
    %124 = vector.broadcast %cst_49 : f32 to vector<16x64xf32>
    %125 = arith.select %122, %123, %124 : vector<16x64xi1>, vector<16x64xf32>
    %126 = math.absf %120 : vector<16x64xf32>
    %cst_50 = arith.constant 0.327591091 : f32
    %127 = vector.broadcast %cst_50 : f32 to vector<16x64xf32>
    %128 = arith.mulf %127, %126 : vector<16x64xf32>
    %cst_51 = arith.constant 1.000000e+00 : f32
    %129 = vector.broadcast %cst_51 : f32 to vector<16x64xf32>
    %130 = arith.addf %129, %128 : vector<16x64xf32>
    %131 = tpu.reciprocal %130 {approx = true} : vector<16x64xf32> -> vector<16x64xf32>
    %cst_52 = arith.constant 1.06140542 : f32
    %132 = vector.broadcast %cst_52 : f32 to vector<16x64xf32>
    %133 = arith.mulf %132, %131 : vector<16x64xf32>
    %cst_53 = arith.constant -1.45315206 : f32
    %134 = vector.broadcast %cst_53 : f32 to vector<16x64xf32>
    %135 = arith.addf %133, %134 : vector<16x64xf32>
    %136 = arith.mulf %135, %131 : vector<16x64xf32>
    %cst_54 = arith.constant 1.42141378 : f32
    %137 = vector.broadcast %cst_54 : f32 to vector<16x64xf32>
    %138 = arith.addf %136, %137 : vector<16x64xf32>
    %139 = arith.mulf %138, %131 : vector<16x64xf32>
    %cst_55 = arith.constant -0.284496725 : f32
    %140 = vector.broadcast %cst_55 : f32 to vector<16x64xf32>
    %141 = arith.addf %139, %140 : vector<16x64xf32>
    %142 = arith.mulf %141, %131 : vector<16x64xf32>
    %cst_56 = arith.constant 0.254829586 : f32
    %143 = vector.broadcast %cst_56 : f32 to vector<16x64xf32>
    %144 = arith.addf %142, %143 : vector<16x64xf32>
    %145 = arith.mulf %144, %131 : vector<16x64xf32>
    %cst_57 = arith.constant 0.000000e+00 : f32
    %146 = vector.broadcast %cst_57 : f32 to vector<16x64xf32>
    %147 = arith.subf %146, %126 : vector<16x64xf32>
    %148 = arith.mulf %147, %126 : vector<16x64xf32>
    %149 = math.exp %148 : vector<16x64xf32>
    %150 = arith.mulf %145, %149 : vector<16x64xf32>
    %cst_58 = arith.constant 1.000000e+00 : f32
    %151 = vector.broadcast %cst_58 : f32 to vector<16x64xf32>
    %152 = arith.subf %151, %150 : vector<16x64xf32>
    %153 = arith.mulf %125, %152 : vector<16x64xf32>
    %cst_59 = arith.constant 1.000000e+00 : f32
    %154 = vector.broadcast %cst_59 : f32 to vector<16x64xf32>
    %155 = arith.addf %154, %153 : vector<16x64xf32>
    %156 = arith.mulf %118, %155 : vector<16x64xf32>
    %c96 = arith.constant 96 : index
    %c0_60 = arith.constant 0 : index
    %157 = vector.load %arg2[%c96, %c0_60] : memref<744x128xf32, #tpu.memory_space<vmem>>, vector<64x32xf32>
    %cst_61 = arith.constant dense<0.000000e+00> : vector<16x32xf32>
    %158 = tpu.matmul %156, %157, %cst_61 {dimension_numbers = #tpu.dot_dimension_numbers<[1], [0], [0], [1], [0, 0, 1, 1], [], []>} : vector<16x64xf32>, vector<64x32xf32>, vector<16x32xf32> -> vector<16x32xf32>
    %c3 = arith.constant 3 : index
    %c0_62 = arith.constant 0 : index
    %159 = vector.load %arg3[%c3, %c0_62] : memref<32x128xf32, #tpu.memory_space<vmem>>, vector<1x32xf32>
    %160 = vector.broadcast %159 : vector<1x32xf32> to vector<16x32xf32>
    %161 = arith.addf %158, %160 : vector<16x32xf32>
    %162 = arith.addf %111, %161 : vector<16x32xf32>
    %c6 = arith.constant 6 : index
    %c0_63 = arith.constant 0 : index
    %163 = vector.load %arg3[%c6, %c0_63] : memref<32x128xf32, #tpu.memory_space<vmem>>, vector<1x32xf32>
    %c7 = arith.constant 7 : index
    %c0_64 = arith.constant 0 : index
    %164 = vector.load %arg3[%c7, %c0_64] : memref<32x128xf32, #tpu.memory_space<vmem>>, vector<1x32xf32>
    %cst_65 = arith.constant dense<0.000000e+00> : vector<16xf32>
    %165 = vector.multi_reduction <add>, %162, %cst_65 [1] : vector<16x32xf32> to vector<16xf32>
    %166 = vector.shape_cast %165 : vector<16xf32> to vector<16x1xf32>
    %cst_66 = arith.constant 3.200000e+01 : f32
    %167 = vector.broadcast %cst_66 : f32 to vector<16x1xf32>
    %168 = arith.divf %166, %167 : vector<16x1xf32>
    %169 = vector.broadcast %168 : vector<16x1xf32> to vector<16x32xf32>
    %170 = arith.subf %162, %169 : vector<16x32xf32>
    %171 = arith.mulf %170, %170 : vector<16x32xf32>
    %cst_67 = arith.constant dense<0.000000e+00> : vector<16xf32>
    %172 = vector.multi_reduction <add>, %171, %cst_67 [1] : vector<16x32xf32> to vector<16xf32>
    %173 = vector.shape_cast %172 : vector<16xf32> to vector<16x1xf32>
    %cst_68 = arith.constant 3.200000e+01 : f32
    %174 = vector.broadcast %cst_68 : f32 to vector<16x1xf32>
    %175 = arith.divf %173, %174 : vector<16x1xf32>
    %cst_69 = arith.constant 9.99999974E-6 : f32
    %176 = vector.broadcast %cst_69 : f32 to vector<16x1xf32>
    %177 = arith.addf %175, %176 : vector<16x1xf32>
    %178 = math.rsqrt %177 : vector<16x1xf32>
    %179 = vector.broadcast %178 : vector<16x1xf32> to vector<16x32xf32>
    %180 = arith.mulf %170, %179 : vector<16x32xf32>
    %181 = vector.broadcast %163 : vector<1x32xf32> to vector<16x32xf32>
    %182 = arith.mulf %180, %181 : vector<16x32xf32>
    %183 = vector.broadcast %164 : vector<1x32xf32> to vector<16x32xf32>
    %184 = arith.addf %182, %183 : vector<16x32xf32>
    %c160 = arith.constant 160 : index
    %c0_70 = arith.constant 0 : index
    %185 = vector.load %arg2[%c160, %c0_70] : memref<744x128xf32, #tpu.memory_space<vmem>>, vector<32x32xf32>
    %cst_71 = arith.constant dense<0.000000e+00> : vector<16x32xf32>
    %186 = tpu.matmul %184, %185, %cst_71 {dimension_numbers = #tpu.dot_dimension_numbers<[1], [0], [0], [1], [0, 0, 1, 1], [], []>} : vector<16x32xf32>, vector<32x32xf32>, vector<16x32xf32> -> vector<16x32xf32>
    %c8 = arith.constant 8 : index
    %c0_72 = arith.constant 0 : index
    %187 = vector.load %arg3[%c8, %c0_72] : memref<32x128xf32, #tpu.memory_space<vmem>>, vector<1x32xf32>
    %188 = vector.broadcast %187 : vector<1x32xf32> to vector<16x32xf32>
    %189 = arith.addf %186, %188 : vector<16x32xf32>
    %cst_73 = arith.constant 5.000000e-01 : f32
    %190 = vector.broadcast %cst_73 : f32 to vector<16x32xf32>
    %191 = arith.mulf %190, %189 : vector<16x32xf32>
    %cst_74 = arith.constant 0.707106769 : f32
    %192 = vector.broadcast %cst_74 : f32 to vector<16x32xf32>
    %193 = arith.mulf %189, %192 : vector<16x32xf32>
    %cst_75 = arith.constant 0.000000e+00 : f32
    %194 = vector.broadcast %cst_75 : f32 to vector<16x32xf32>
    %195 = arith.cmpf oge, %193, %194 : vector<16x32xf32>
    %cst_76 = arith.constant 1.000000e+00 : f32
    %cst_77 = arith.constant -1.000000e+00 : f32
    %196 = vector.broadcast %cst_76 : f32 to vector<16x32xf32>
    %197 = vector.broadcast %cst_77 : f32 to vector<16x32xf32>
    %198 = arith.select %195, %196, %197 : vector<16x32xi1>, vector<16x32xf32>
    %199 = math.absf %193 : vector<16x32xf32>
    %cst_78 = arith.constant 0.327591091 : f32
    %200 = vector.broadcast %cst_78 : f32 to vector<16x32xf32>
    %201 = arith.mulf %200, %199 : vector<16x32xf32>
    %cst_79 = arith.constant 1.000000e+00 : f32
    %202 = vector.broadcast %cst_79 : f32 to vector<16x32xf32>
    %203 = arith.addf %202, %201 : vector<16x32xf32>
    %204 = tpu.reciprocal %203 {approx = true} : vector<16x32xf32> -> vector<16x32xf32>
    %cst_80 = arith.constant 1.06140542 : f32
    %205 = vector.broadcast %cst_80 : f32 to vector<16x32xf32>
    %206 = arith.mulf %205, %204 : vector<16x32xf32>
    %cst_81 = arith.constant -1.45315206 : f32
    %207 = vector.broadcast %cst_81 : f32 to vector<16x32xf32>
    %208 = arith.addf %206, %207 : vector<16x32xf32>
    %209 = arith.mulf %208, %204 : vector<16x32xf32>
    %cst_82 = arith.constant 1.42141378 : f32
    %210 = vector.broadcast %cst_82 : f32 to vector<16x32xf32>
    %211 = arith.addf %209, %210 : vector<16x32xf32>
    %212 = arith.mulf %211, %204 : vector<16x32xf32>
    %cst_83 = arith.constant -0.284496725 : f32
    %213 = vector.broadcast %cst_83 : f32 to vector<16x32xf32>
    %214 = arith.addf %212, %213 : vector<16x32xf32>
    %215 = arith.mulf %214, %204 : vector<16x32xf32>
    %cst_84 = arith.constant 0.254829586 : f32
    %216 = vector.broadcast %cst_84 : f32 to vector<16x32xf32>
    %217 = arith.addf %215, %216 : vector<16x32xf32>
    %218 = arith.mulf %217, %204 : vector<16x32xf32>
    %cst_85 = arith.constant 0.000000e+00 : f32
    %219 = vector.broadcast %cst_85 : f32 to vector<16x32xf32>
    %220 = arith.subf %219, %199 : vector<16x32xf32>
    %221 = arith.mulf %220, %199 : vector<16x32xf32>
    %222 = math.exp %221 : vector<16x32xf32>
    %223 = arith.mulf %218, %222 : vector<16x32xf32>
    %cst_86 = arith.constant 1.000000e+00 : f32
    %224 = vector.broadcast %cst_86 : f32 to vector<16x32xf32>
    %225 = arith.subf %224, %223 : vector<16x32xf32>
    %226 = arith.mulf %198, %225 : vector<16x32xf32>
    %cst_87 = arith.constant 1.000000e+00 : f32
    %227 = vector.broadcast %cst_87 : f32 to vector<16x32xf32>
    %228 = arith.addf %227, %226 : vector<16x32xf32>
    %229 = arith.mulf %191, %228 : vector<16x32xf32>
    %c192 = arith.constant 192 : index
    %c0_88 = arith.constant 0 : index
    %230 = vector.load %arg2[%c192, %c0_88] : memref<744x128xf32, #tpu.memory_space<vmem>>, vector<32x96xf32>
    %cst_89 = arith.constant dense<0.000000e+00> : vector<16x96xf32>
    %231 = tpu.matmul %229, %230, %cst_89 {dimension_numbers = #tpu.dot_dimension_numbers<[1], [0], [0], [1], [0, 0, 1, 1], [], []>} : vector<16x32xf32>, vector<32x96xf32>, vector<16x96xf32> -> vector<16x96xf32>
    %c9 = arith.constant 9 : index
    %c0_90 = arith.constant 0 : index
    %232 = vector.load %arg3[%c9, %c0_90] : memref<32x128xf32, #tpu.memory_space<vmem>>, vector<1x96xf32>
    %233 = vector.broadcast %232 : vector<1x96xf32> to vector<16x96xf32>
    %234 = arith.addf %231, %233 : vector<16x96xf32>
    %235 = vector.extract_strided_slice %234 {offsets = [0, 0], sizes = [16, 8], strides = [1, 1]} : vector<16x96xf32> to vector<16x8xf32>
    %cst_91 = arith.constant 0.353553385 : f32
    %236 = vector.broadcast %cst_91 : f32 to vector<16x8xf32>
    %237 = arith.mulf %235, %236 : vector<16x8xf32>
    %238 = vector.extract_strided_slice %234 {offsets = [0, 32], sizes = [16, 8], strides = [1, 1]} : vector<16x96xf32> to vector<16x8xf32>
    %239 = vector.extract_strided_slice %234 {offsets = [0, 64], sizes = [16, 8], strides = [1, 1]} : vector<16x96xf32> to vector<16x8xf32>
    %cst_92 = arith.constant dense<0.000000e+00> : vector<16x16xf32>
    %240 = tpu.matmul %237, %238, %cst_92 {dimension_numbers = #tpu.dot_dimension_numbers<[1], [1], [0], [0], [0, 0, 1, 0], [], []>} : vector<16x8xf32>, vector<16x8xf32>, vector<16x16xf32> -> vector<16x16xf32>
    %cst_93 = arith.constant dense<0xFF800000> : vector<16xf32>
    %241 = vector.multi_reduction <maximumf>, %240, %cst_93 [1] : vector<16x16xf32> to vector<16xf32>
    %242 = vector.shape_cast %241 : vector<16xf32> to vector<16x1xf32>
    %243 = vector.broadcast %242 : vector<16x1xf32> to vector<16x16xf32>
    %244 = arith.subf %240, %243 : vector<16x16xf32>
    %245 = math.exp %244 : vector<16x16xf32>
    %cst_94 = arith.constant dense<0.000000e+00> : vector<16xf32>
    %246 = vector.multi_reduction <add>, %245, %cst_94 [1] : vector<16x16xf32> to vector<16xf32>
    %247 = vector.shape_cast %246 : vector<16xf32> to vector<16x1xf32>
    %248 = tpu.reciprocal %247 {approx = true} : vector<16x1xf32> -> vector<16x1xf32>
    %249 = vector.broadcast %248 : vector<16x1xf32> to vector<16x16xf32>
    %250 = arith.mulf %245, %249 : vector<16x16xf32>
    %cst_95 = arith.constant dense<0.000000e+00> : vector<16x8xf32>
    %251 = tpu.matmul %250, %239, %cst_95 {dimension_numbers = #tpu.dot_dimension_numbers<[1], [0], [0], [1], [0, 0, 1, 1], [], []>} : vector<16x16xf32>, vector<16x8xf32>, vector<16x8xf32> -> vector<16x8xf32>
    %c224 = arith.constant 224 : index
    %c0_96 = arith.constant 0 : index
    %252 = vector.load %arg2[%c224, %c0_96] : memref<744x128xf32, #tpu.memory_space<vmem>>, vector<8x32xf32>
    %cst_97 = arith.constant dense<0.000000e+00> : vector<16x32xf32>
    %253 = tpu.matmul %251, %252, %cst_97 {dimension_numbers = #tpu.dot_dimension_numbers<[1], [0], [0], [1], [0, 0, 1, 1], [], []>} : vector<16x8xf32>, vector<8x32xf32>, vector<16x32xf32> -> vector<16x32xf32>
    %254 = vector.extract_strided_slice %234 {offsets = [0, 8], sizes = [16, 8], strides = [1, 1]} : vector<16x96xf32> to vector<16x8xf32>
    %cst_98 = arith.constant 0.353553385 : f32
    %255 = vector.broadcast %cst_98 : f32 to vector<16x8xf32>
    %256 = arith.mulf %254, %255 : vector<16x8xf32>
    %257 = vector.extract_strided_slice %234 {offsets = [0, 40], sizes = [16, 8], strides = [1, 1]} : vector<16x96xf32> to vector<16x8xf32>
    %258 = vector.extract_strided_slice %234 {offsets = [0, 72], sizes = [16, 8], strides = [1, 1]} : vector<16x96xf32> to vector<16x8xf32>
    %cst_99 = arith.constant dense<0.000000e+00> : vector<16x16xf32>
    %259 = tpu.matmul %256, %257, %cst_99 {dimension_numbers = #tpu.dot_dimension_numbers<[1], [1], [0], [0], [0, 0, 1, 0], [], []>} : vector<16x8xf32>, vector<16x8xf32>, vector<16x16xf32> -> vector<16x16xf32>
    %cst_100 = arith.constant dense<0xFF800000> : vector<16xf32>
    %260 = vector.multi_reduction <maximumf>, %259, %cst_100 [1] : vector<16x16xf32> to vector<16xf32>
    %261 = vector.shape_cast %260 : vector<16xf32> to vector<16x1xf32>
    %262 = vector.broadcast %261 : vector<16x1xf32> to vector<16x16xf32>
    %263 = arith.subf %259, %262 : vector<16x16xf32>
    %264 = math.exp %263 : vector<16x16xf32>
    %cst_101 = arith.constant dense<0.000000e+00> : vector<16xf32>
    %265 = vector.multi_reduction <add>, %264, %cst_101 [1] : vector<16x16xf32> to vector<16xf32>
    %266 = vector.shape_cast %265 : vector<16xf32> to vector<16x1xf32>
    %267 = tpu.reciprocal %266 {approx = true} : vector<16x1xf32> -> vector<16x1xf32>
    %268 = vector.broadcast %267 : vector<16x1xf32> to vector<16x16xf32>
    %269 = arith.mulf %264, %268 : vector<16x16xf32>
    %cst_102 = arith.constant dense<0.000000e+00> : vector<16x8xf32>
    %270 = tpu.matmul %269, %258, %cst_102 {dimension_numbers = #tpu.dot_dimension_numbers<[1], [0], [0], [1], [0, 0, 1, 1], [], []>} : vector<16x16xf32>, vector<16x8xf32>, vector<16x8xf32> -> vector<16x8xf32>
    %c232 = arith.constant 232 : index
    %c0_103 = arith.constant 0 : index
    %271 = vector.load %arg2[%c232, %c0_103] : memref<744x128xf32, #tpu.memory_space<vmem>>, vector<8x32xf32>
    %cst_104 = arith.constant dense<0.000000e+00> : vector<16x32xf32>
    %272 = tpu.matmul %270, %271, %cst_104 {dimension_numbers = #tpu.dot_dimension_numbers<[1], [0], [0], [1], [0, 0, 1, 1], [], []>} : vector<16x8xf32>, vector<8x32xf32>, vector<16x32xf32> -> vector<16x32xf32>
    %273 = arith.addf %253, %272 : vector<16x32xf32>
    %274 = vector.extract_strided_slice %234 {offsets = [0, 16], sizes = [16, 8], strides = [1, 1]} : vector<16x96xf32> to vector<16x8xf32>
    %cst_105 = arith.constant 0.353553385 : f32
    %275 = vector.broadcast %cst_105 : f32 to vector<16x8xf32>
    %276 = arith.mulf %274, %275 : vector<16x8xf32>
    %277 = vector.extract_strided_slice %234 {offsets = [0, 48], sizes = [16, 8], strides = [1, 1]} : vector<16x96xf32> to vector<16x8xf32>
    %278 = vector.extract_strided_slice %234 {offsets = [0, 80], sizes = [16, 8], strides = [1, 1]} : vector<16x96xf32> to vector<16x8xf32>
    %cst_106 = arith.constant dense<0.000000e+00> : vector<16x16xf32>
    %279 = tpu.matmul %276, %277, %cst_106 {dimension_numbers = #tpu.dot_dimension_numbers<[1], [1], [0], [0], [0, 0, 1, 0], [], []>} : vector<16x8xf32>, vector<16x8xf32>, vector<16x16xf32> -> vector<16x16xf32>
    %cst_107 = arith.constant dense<0xFF800000> : vector<16xf32>
    %280 = vector.multi_reduction <maximumf>, %279, %cst_107 [1] : vector<16x16xf32> to vector<16xf32>
    %281 = vector.shape_cast %280 : vector<16xf32> to vector<16x1xf32>
    %282 = vector.broadcast %281 : vector<16x1xf32> to vector<16x16xf32>
    %283 = arith.subf %279, %282 : vector<16x16xf32>
    %284 = math.exp %283 : vector<16x16xf32>
    %cst_108 = arith.constant dense<0.000000e+00> : vector<16xf32>
    %285 = vector.multi_reduction <add>, %284, %cst_108 [1] : vector<16x16xf32> to vector<16xf32>
    %286 = vector.shape_cast %285 : vector<16xf32> to vector<16x1xf32>
    %287 = tpu.reciprocal %286 {approx = true} : vector<16x1xf32> -> vector<16x1xf32>
    %288 = vector.broadcast %287 : vector<16x1xf32> to vector<16x16xf32>
    %289 = arith.mulf %284, %288 : vector<16x16xf32>
    %cst_109 = arith.constant dense<0.000000e+00> : vector<16x8xf32>
    %290 = tpu.matmul %289, %278, %cst_109 {dimension_numbers = #tpu.dot_dimension_numbers<[1], [0], [0], [1], [0, 0, 1, 1], [], []>} : vector<16x16xf32>, vector<16x8xf32>, vector<16x8xf32> -> vector<16x8xf32>
    %c240 = arith.constant 240 : index
    %c0_110 = arith.constant 0 : index
    %291 = vector.load %arg2[%c240, %c0_110] : memref<744x128xf32, #tpu.memory_space<vmem>>, vector<8x32xf32>
    %cst_111 = arith.constant dense<0.000000e+00> : vector<16x32xf32>
    %292 = tpu.matmul %290, %291, %cst_111 {dimension_numbers = #tpu.dot_dimension_numbers<[1], [0], [0], [1], [0, 0, 1, 1], [], []>} : vector<16x8xf32>, vector<8x32xf32>, vector<16x32xf32> -> vector<16x32xf32>
    %293 = arith.addf %273, %292 : vector<16x32xf32>
    %294 = vector.extract_strided_slice %234 {offsets = [0, 24], sizes = [16, 8], strides = [1, 1]} : vector<16x96xf32> to vector<16x8xf32>
    %cst_112 = arith.constant 0.353553385 : f32
    %295 = vector.broadcast %cst_112 : f32 to vector<16x8xf32>
    %296 = arith.mulf %294, %295 : vector<16x8xf32>
    %297 = vector.extract_strided_slice %234 {offsets = [0, 56], sizes = [16, 8], strides = [1, 1]} : vector<16x96xf32> to vector<16x8xf32>
    %298 = vector.extract_strided_slice %234 {offsets = [0, 88], sizes = [16, 8], strides = [1, 1]} : vector<16x96xf32> to vector<16x8xf32>
    %cst_113 = arith.constant dense<0.000000e+00> : vector<16x16xf32>
    %299 = tpu.matmul %296, %297, %cst_113 {dimension_numbers = #tpu.dot_dimension_numbers<[1], [1], [0], [0], [0, 0, 1, 0], [], []>} : vector<16x8xf32>, vector<16x8xf32>, vector<16x16xf32> -> vector<16x16xf32>
    %cst_114 = arith.constant dense<0xFF800000> : vector<16xf32>
    %300 = vector.multi_reduction <maximumf>, %299, %cst_114 [1] : vector<16x16xf32> to vector<16xf32>
    %301 = vector.shape_cast %300 : vector<16xf32> to vector<16x1xf32>
    %302 = vector.broadcast %301 : vector<16x1xf32> to vector<16x16xf32>
    %303 = arith.subf %299, %302 : vector<16x16xf32>
    %304 = math.exp %303 : vector<16x16xf32>
    %cst_115 = arith.constant dense<0.000000e+00> : vector<16xf32>
    %305 = vector.multi_reduction <add>, %304, %cst_115 [1] : vector<16x16xf32> to vector<16xf32>
    %306 = vector.shape_cast %305 : vector<16xf32> to vector<16x1xf32>
    %307 = tpu.reciprocal %306 {approx = true} : vector<16x1xf32> -> vector<16x1xf32>
    %308 = vector.broadcast %307 : vector<16x1xf32> to vector<16x16xf32>
    %309 = arith.mulf %304, %308 : vector<16x16xf32>
    %cst_116 = arith.constant dense<0.000000e+00> : vector<16x8xf32>
    %310 = tpu.matmul %309, %298, %cst_116 {dimension_numbers = #tpu.dot_dimension_numbers<[1], [0], [0], [1], [0, 0, 1, 1], [], []>} : vector<16x16xf32>, vector<16x8xf32>, vector<16x8xf32> -> vector<16x8xf32>
    %c248 = arith.constant 248 : index
    %c0_117 = arith.constant 0 : index
    %311 = vector.load %arg2[%c248, %c0_117] : memref<744x128xf32, #tpu.memory_space<vmem>>, vector<8x32xf32>
    %cst_118 = arith.constant dense<0.000000e+00> : vector<16x32xf32>
    %312 = tpu.matmul %310, %311, %cst_118 {dimension_numbers = #tpu.dot_dimension_numbers<[1], [0], [0], [1], [0, 0, 1, 1], [], []>} : vector<16x8xf32>, vector<8x32xf32>, vector<16x32xf32> -> vector<16x32xf32>
    %313 = arith.addf %293, %312 : vector<16x32xf32>
    %c10 = arith.constant 10 : index
    %c0_119 = arith.constant 0 : index
    %314 = vector.load %arg3[%c10, %c0_119] : memref<32x128xf32, #tpu.memory_space<vmem>>, vector<1x32xf32>
    %315 = vector.broadcast %314 : vector<1x32xf32> to vector<16x32xf32>
    %316 = arith.addf %313, %315 : vector<16x32xf32>
    %317 = arith.addf %229, %316 : vector<16x32xf32>
    %c13 = arith.constant 13 : index
    %c0_120 = arith.constant 0 : index
    %318 = vector.load %arg3[%c13, %c0_120] : memref<32x128xf32, #tpu.memory_space<vmem>>, vector<1x32xf32>
    %c14 = arith.constant 14 : index
    %c0_121 = arith.constant 0 : index
    %319 = vector.load %arg3[%c14, %c0_121] : memref<32x128xf32, #tpu.memory_space<vmem>>, vector<1x32xf32>
    %cst_122 = arith.constant dense<0.000000e+00> : vector<16xf32>
    %320 = vector.multi_reduction <add>, %317, %cst_122 [1] : vector<16x32xf32> to vector<16xf32>
    %321 = vector.shape_cast %320 : vector<16xf32> to vector<16x1xf32>
    %cst_123 = arith.constant 3.200000e+01 : f32
    %322 = vector.broadcast %cst_123 : f32 to vector<16x1xf32>
    %323 = arith.divf %321, %322 : vector<16x1xf32>
    %324 = vector.broadcast %323 : vector<16x1xf32> to vector<16x32xf32>
    %325 = arith.subf %317, %324 : vector<16x32xf32>
    %326 = arith.mulf %325, %325 : vector<16x32xf32>
    %cst_124 = arith.constant dense<0.000000e+00> : vector<16xf32>
    %327 = vector.multi_reduction <add>, %326, %cst_124 [1] : vector<16x32xf32> to vector<16xf32>
    %328 = vector.shape_cast %327 : vector<16xf32> to vector<16x1xf32>
    %cst_125 = arith.constant 3.200000e+01 : f32
    %329 = vector.broadcast %cst_125 : f32 to vector<16x1xf32>
    %330 = arith.divf %328, %329 : vector<16x1xf32>
    %cst_126 = arith.constant 9.99999974E-6 : f32
    %331 = vector.broadcast %cst_126 : f32 to vector<16x1xf32>
    %332 = arith.addf %330, %331 : vector<16x1xf32>
    %333 = math.rsqrt %332 : vector<16x1xf32>
    %334 = vector.broadcast %333 : vector<16x1xf32> to vector<16x32xf32>
    %335 = arith.mulf %325, %334 : vector<16x32xf32>
    %336 = vector.broadcast %318 : vector<1x32xf32> to vector<16x32xf32>
    %337 = arith.mulf %335, %336 : vector<16x32xf32>
    %338 = vector.broadcast %319 : vector<1x32xf32> to vector<16x32xf32>
    %339 = arith.addf %337, %338 : vector<16x32xf32>
    %c256 = arith.constant 256 : index
    %c0_127 = arith.constant 0 : index
    %340 = vector.load %arg2[%c256, %c0_127] : memref<744x128xf32, #tpu.memory_space<vmem>>, vector<32x64xf32>
    %cst_128 = arith.constant dense<0.000000e+00> : vector<16x64xf32>
    %341 = tpu.matmul %339, %340, %cst_128 {dimension_numbers = #tpu.dot_dimension_numbers<[1], [0], [0], [1], [0, 0, 1, 1], [], []>} : vector<16x32xf32>, vector<32x64xf32>, vector<16x64xf32> -> vector<16x64xf32>
    %c11 = arith.constant 11 : index
    %c0_129 = arith.constant 0 : index
    %342 = vector.load %arg3[%c11, %c0_129] : memref<32x128xf32, #tpu.memory_space<vmem>>, vector<1x64xf32>
    %343 = vector.broadcast %342 : vector<1x64xf32> to vector<16x64xf32>
    %344 = arith.addf %341, %343 : vector<16x64xf32>
    %cst_130 = arith.constant 5.000000e-01 : f32
    %345 = vector.broadcast %cst_130 : f32 to vector<16x64xf32>
    %346 = arith.mulf %345, %344 : vector<16x64xf32>
    %cst_131 = arith.constant 0.707106769 : f32
    %347 = vector.broadcast %cst_131 : f32 to vector<16x64xf32>
    %348 = arith.mulf %344, %347 : vector<16x64xf32>
    %cst_132 = arith.constant 0.000000e+00 : f32
    %349 = vector.broadcast %cst_132 : f32 to vector<16x64xf32>
    %350 = arith.cmpf oge, %348, %349 : vector<16x64xf32>
    %cst_133 = arith.constant 1.000000e+00 : f32
    %cst_134 = arith.constant -1.000000e+00 : f32
    %351 = vector.broadcast %cst_133 : f32 to vector<16x64xf32>
    %352 = vector.broadcast %cst_134 : f32 to vector<16x64xf32>
    %353 = arith.select %350, %351, %352 : vector<16x64xi1>, vector<16x64xf32>
    %354 = math.absf %348 : vector<16x64xf32>
    %cst_135 = arith.constant 0.327591091 : f32
    %355 = vector.broadcast %cst_135 : f32 to vector<16x64xf32>
    %356 = arith.mulf %355, %354 : vector<16x64xf32>
    %cst_136 = arith.constant 1.000000e+00 : f32
    %357 = vector.broadcast %cst_136 : f32 to vector<16x64xf32>
    %358 = arith.addf %357, %356 : vector<16x64xf32>
    %359 = tpu.reciprocal %358 {approx = true} : vector<16x64xf32> -> vector<16x64xf32>
    %cst_137 = arith.constant 1.06140542 : f32
    %360 = vector.broadcast %cst_137 : f32 to vector<16x64xf32>
    %361 = arith.mulf %360, %359 : vector<16x64xf32>
    %cst_138 = arith.constant -1.45315206 : f32
    %362 = vector.broadcast %cst_138 : f32 to vector<16x64xf32>
    %363 = arith.addf %361, %362 : vector<16x64xf32>
    %364 = arith.mulf %363, %359 : vector<16x64xf32>
    %cst_139 = arith.constant 1.42141378 : f32
    %365 = vector.broadcast %cst_139 : f32 to vector<16x64xf32>
    %366 = arith.addf %364, %365 : vector<16x64xf32>
    %367 = arith.mulf %366, %359 : vector<16x64xf32>
    %cst_140 = arith.constant -0.284496725 : f32
    %368 = vector.broadcast %cst_140 : f32 to vector<16x64xf32>
    %369 = arith.addf %367, %368 : vector<16x64xf32>
    %370 = arith.mulf %369, %359 : vector<16x64xf32>
    %cst_141 = arith.constant 0.254829586 : f32
    %371 = vector.broadcast %cst_141 : f32 to vector<16x64xf32>
    %372 = arith.addf %370, %371 : vector<16x64xf32>
    %373 = arith.mulf %372, %359 : vector<16x64xf32>
    %cst_142 = arith.constant 0.000000e+00 : f32
    %374 = vector.broadcast %cst_142 : f32 to vector<16x64xf32>
    %375 = arith.subf %374, %354 : vector<16x64xf32>
    %376 = arith.mulf %375, %354 : vector<16x64xf32>
    %377 = math.exp %376 : vector<16x64xf32>
    %378 = arith.mulf %373, %377 : vector<16x64xf32>
    %cst_143 = arith.constant 1.000000e+00 : f32
    %379 = vector.broadcast %cst_143 : f32 to vector<16x64xf32>
    %380 = arith.subf %379, %378 : vector<16x64xf32>
    %381 = arith.mulf %353, %380 : vector<16x64xf32>
    %cst_144 = arith.constant 1.000000e+00 : f32
    %382 = vector.broadcast %cst_144 : f32 to vector<16x64xf32>
    %383 = arith.addf %382, %381 : vector<16x64xf32>
    %384 = arith.mulf %346, %383 : vector<16x64xf32>
    %c288 = arith.constant 288 : index
    %c0_145 = arith.constant 0 : index
    %385 = vector.load %arg2[%c288, %c0_145] : memref<744x128xf32, #tpu.memory_space<vmem>>, vector<64x32xf32>
    %cst_146 = arith.constant dense<0.000000e+00> : vector<16x32xf32>
    %386 = tpu.matmul %384, %385, %cst_146 {dimension_numbers = #tpu.dot_dimension_numbers<[1], [0], [0], [1], [0, 0, 1, 1], [], []>} : vector<16x64xf32>, vector<64x32xf32>, vector<16x32xf32> -> vector<16x32xf32>
    %c12 = arith.constant 12 : index
    %c0_147 = arith.constant 0 : index
    %387 = vector.load %arg3[%c12, %c0_147] : memref<32x128xf32, #tpu.memory_space<vmem>>, vector<1x32xf32>
    %388 = vector.broadcast %387 : vector<1x32xf32> to vector<16x32xf32>
    %389 = arith.addf %386, %388 : vector<16x32xf32>
    %390 = arith.addf %339, %389 : vector<16x32xf32>
    %c15 = arith.constant 15 : index
    %c0_148 = arith.constant 0 : index
    %391 = vector.load %arg3[%c15, %c0_148] : memref<32x128xf32, #tpu.memory_space<vmem>>, vector<1x32xf32>
    %c16 = arith.constant 16 : index
    %c0_149 = arith.constant 0 : index
    %392 = vector.load %arg3[%c16, %c0_149] : memref<32x128xf32, #tpu.memory_space<vmem>>, vector<1x32xf32>
    %cst_150 = arith.constant dense<0.000000e+00> : vector<16xf32>
    %393 = vector.multi_reduction <add>, %390, %cst_150 [1] : vector<16x32xf32> to vector<16xf32>
    %394 = vector.shape_cast %393 : vector<16xf32> to vector<16x1xf32>
    %cst_151 = arith.constant 3.200000e+01 : f32
    %395 = vector.broadcast %cst_151 : f32 to vector<16x1xf32>
    %396 = arith.divf %394, %395 : vector<16x1xf32>
    %397 = vector.broadcast %396 : vector<16x1xf32> to vector<16x32xf32>
    %398 = arith.subf %390, %397 : vector<16x32xf32>
    %399 = arith.mulf %398, %398 : vector<16x32xf32>
    %cst_152 = arith.constant dense<0.000000e+00> : vector<16xf32>
    %400 = vector.multi_reduction <add>, %399, %cst_152 [1] : vector<16x32xf32> to vector<16xf32>
    %401 = vector.shape_cast %400 : vector<16xf32> to vector<16x1xf32>
    %cst_153 = arith.constant 3.200000e+01 : f32
    %402 = vector.broadcast %cst_153 : f32 to vector<16x1xf32>
    %403 = arith.divf %401, %402 : vector<16x1xf32>
    %cst_154 = arith.constant 9.99999974E-6 : f32
    %404 = vector.broadcast %cst_154 : f32 to vector<16x1xf32>
    %405 = arith.addf %403, %404 : vector<16x1xf32>
    %406 = math.rsqrt %405 : vector<16x1xf32>
    %407 = vector.broadcast %406 : vector<16x1xf32> to vector<16x32xf32>
    %408 = arith.mulf %398, %407 : vector<16x32xf32>
    %409 = vector.broadcast %391 : vector<1x32xf32> to vector<16x32xf32>
    %410 = arith.mulf %408, %409 : vector<16x32xf32>
    %411 = vector.broadcast %392 : vector<1x32xf32> to vector<16x32xf32>
    %412 = arith.addf %410, %411 : vector<16x32xf32>
    %cst_155 = arith.constant 5.000000e-01 : f32
    %413 = vector.broadcast %cst_155 : f32 to vector<16x32xf32>
    %414 = arith.mulf %413, %412 : vector<16x32xf32>
    %cst_156 = arith.constant 0.707106769 : f32
    %415 = vector.broadcast %cst_156 : f32 to vector<16x32xf32>
    %416 = arith.mulf %412, %415 : vector<16x32xf32>
    %cst_157 = arith.constant 0.000000e+00 : f32
    %417 = vector.broadcast %cst_157 : f32 to vector<16x32xf32>
    %418 = arith.cmpf oge, %416, %417 : vector<16x32xf32>
    %cst_158 = arith.constant 1.000000e+00 : f32
    %cst_159 = arith.constant -1.000000e+00 : f32
    %419 = vector.broadcast %cst_158 : f32 to vector<16x32xf32>
    %420 = vector.broadcast %cst_159 : f32 to vector<16x32xf32>
    %421 = arith.select %418, %419, %420 : vector<16x32xi1>, vector<16x32xf32>
    %422 = math.absf %416 : vector<16x32xf32>
    %cst_160 = arith.constant 0.327591091 : f32
    %423 = vector.broadcast %cst_160 : f32 to vector<16x32xf32>
    %424 = arith.mulf %423, %422 : vector<16x32xf32>
    %cst_161 = arith.constant 1.000000e+00 : f32
    %425 = vector.broadcast %cst_161 : f32 to vector<16x32xf32>
    %426 = arith.addf %425, %424 : vector<16x32xf32>
    %427 = tpu.reciprocal %426 {approx = true} : vector<16x32xf32> -> vector<16x32xf32>
    %cst_162 = arith.constant 1.06140542 : f32
    %428 = vector.broadcast %cst_162 : f32 to vector<16x32xf32>
    %429 = arith.mulf %428, %427 : vector<16x32xf32>
    %cst_163 = arith.constant -1.45315206 : f32
    %430 = vector.broadcast %cst_163 : f32 to vector<16x32xf32>
    %431 = arith.addf %429, %430 : vector<16x32xf32>
    %432 = arith.mulf %431, %427 : vector<16x32xf32>
    %cst_164 = arith.constant 1.42141378 : f32
    %433 = vector.broadcast %cst_164 : f32 to vector<16x32xf32>
    %434 = arith.addf %432, %433 : vector<16x32xf32>
    %435 = arith.mulf %434, %427 : vector<16x32xf32>
    %cst_165 = arith.constant -0.284496725 : f32
    %436 = vector.broadcast %cst_165 : f32 to vector<16x32xf32>
    %437 = arith.addf %435, %436 : vector<16x32xf32>
    %438 = arith.mulf %437, %427 : vector<16x32xf32>
    %cst_166 = arith.constant 0.254829586 : f32
    %439 = vector.broadcast %cst_166 : f32 to vector<16x32xf32>
    %440 = arith.addf %438, %439 : vector<16x32xf32>
    %441 = arith.mulf %440, %427 : vector<16x32xf32>
    %cst_167 = arith.constant 0.000000e+00 : f32
    %442 = vector.broadcast %cst_167 : f32 to vector<16x32xf32>
    %443 = arith.subf %442, %422 : vector<16x32xf32>
    %444 = arith.mulf %443, %422 : vector<16x32xf32>
    %445 = math.exp %444 : vector<16x32xf32>
    %446 = arith.mulf %441, %445 : vector<16x32xf32>
    %cst_168 = arith.constant 1.000000e+00 : f32
    %447 = vector.broadcast %cst_168 : f32 to vector<16x32xf32>
    %448 = arith.subf %447, %446 : vector<16x32xf32>
    %449 = arith.mulf %421, %448 : vector<16x32xf32>
    %cst_169 = arith.constant 1.000000e+00 : f32
    %450 = vector.broadcast %cst_169 : f32 to vector<16x32xf32>
    %451 = arith.addf %450, %449 : vector<16x32xf32>
    %452 = arith.mulf %414, %451 : vector<16x32xf32>
    %c352 = arith.constant 352 : index
    %c0_170 = arith.constant 0 : index
    %453 = vector.load %arg2[%c352, %c0_170] : memref<744x128xf32, #tpu.memory_space<vmem>>, vector<32x16xf32>
    %cst_171 = arith.constant dense<0.000000e+00> : vector<16x16xf32>
    %454 = tpu.matmul %452, %453, %cst_171 {dimension_numbers = #tpu.dot_dimension_numbers<[1], [0], [0], [1], [0, 0, 1, 1], [], []>} : vector<16x32xf32>, vector<32x16xf32>, vector<16x16xf32> -> vector<16x16xf32>
    %c17 = arith.constant 17 : index
    %c0_172 = arith.constant 0 : index
    %455 = vector.load %arg3[%c17, %c0_172] : memref<32x128xf32, #tpu.memory_space<vmem>>, vector<1x16xf32>
    %456 = vector.broadcast %455 : vector<1x16xf32> to vector<16x16xf32>
    %457 = arith.addf %454, %456 : vector<16x16xf32>
    %c0_173 = arith.constant 0 : index
    %c0_174 = arith.constant 0 : index
    %c0_175 = arith.constant 0 : index
    %458 = vector.load %arg5[%c0_173, %c0_174, %c0_175] : memref<1x16x16xf32, #tpu.memory_space<vmem>>, vector<1x16x16xf32>
    %459 = vector.shape_cast %458 : vector<1x16x16xf32> to vector<16x16xf32>
    %460 = vector.shape_cast %457 : vector<16x16xf32> to vector<1x16x16xf32>
    tpu.vector_store %arg5[%c0_173, %c0_174, %c0_175], %460 {strides = array<i32>} : memref<1x16x16xf32, #tpu.memory_space<vmem>>, vector<1x16x16xf32>,
    %cst_176 = arith.constant dense<0xFF800000> : vector<16xf32>
    %461 = vector.multi_reduction <maximumf>, %457, %cst_176 [1] : vector<16x16xf32> to vector<16xf32>
    %462 = vector.shape_cast %461 : vector<16xf32> to vector<16x1xf32>
    %463 = tpu.iota {dimensions = array<i32: 1>} : vector<16x16xi32>
    %464 = vector.broadcast %462 : vector<16x1xf32> to vector<16x16xf32>
    %465 = arith.cmpf oge, %457, %464 : vector<16x16xf32>
    %c16_i32 = arith.constant 16 : i32
    %466 = vector.broadcast %c16_i32 : i32 to vector<16x16xi32>
    %467 = arith.select %465, %463, %466 : vector<16x16xi1>, vector<16x16xi32>
    %cst_177 = arith.constant dense<2147483647> : vector<16xi32>
    %468 = vector.multi_reduction <minsi>, %467, %cst_177 [1] : vector<16x16xi32> to vector<16xi32>
    %469 = vector.shape_cast %468 : vector<16xi32> to vector<16x1xi32>
    %470 = vector.broadcast %469 : vector<16x1xi32> to vector<16x16xi32>
    %471 = arith.cmpi eq, %463, %470 : vector<16x16xi32>
    %472 = arith.extui %471 : vector<16x16xi1> to vector<16x16xi32>
    %473 = arith.sitofp %472 : vector<16x16xi32> to vector<16x16xf32>
    %c384 = arith.constant 384 : index
    %c0_178 = arith.constant 0 : index
    %474 = vector.load %arg2[%c384, %c0_178] : memref<744x128xf32, #tpu.memory_space<vmem>>, vector<16x16xf32>
    %cst_179 = arith.constant dense<0.000000e+00> : vector<16x16xf32>
    %475 = tpu.matmul %473, %474, %cst_179 {dimension_numbers = #tpu.dot_dimension_numbers<[1], [0], [0], [1], [0, 0, 1, 1], [], []>} : vector<16x16xf32>, vector<16x16xf32>, vector<16x16xf32> -> vector<16x16xf32>
    %c400 = arith.constant 400 : index
    %c0_180 = arith.constant 0 : index
    %476 = vector.load %arg2[%c400, %c0_180] : memref<744x128xf32, #tpu.memory_space<vmem>>, vector<32x32xf32>
    %cst_181 = arith.constant dense<0.000000e+00> : vector<16x32xf32>
    %477 = tpu.matmul %184, %476, %cst_181 {dimension_numbers = #tpu.dot_dimension_numbers<[1], [0], [0], [1], [0, 0, 1, 1], [], []>} : vector<16x32xf32>, vector<32x32xf32>, vector<16x32xf32> -> vector<16x32xf32>
    %c432 = arith.constant 432 : index
    %c0_182 = arith.constant 0 : index
    %478 = vector.load %arg2[%c432, %c0_182] : memref<744x128xf32, #tpu.memory_space<vmem>>, vector<32x32xf32>
    %cst_183 = arith.constant dense<0.000000e+00> : vector<16x32xf32>
    %479 = tpu.matmul %452, %478, %cst_183 {dimension_numbers = #tpu.dot_dimension_numbers<[1], [0], [0], [1], [0, 0, 1, 1], [], []>} : vector<16x32xf32>, vector<32x32xf32>, vector<16x32xf32> -> vector<16x32xf32>
    %480 = arith.addf %477, %479 : vector<16x32xf32>
    %c464 = arith.constant 464 : index
    %c0_184 = arith.constant 0 : index
    %481 = vector.load %arg2[%c464, %c0_184] : memref<744x128xf32, #tpu.memory_space<vmem>>, vector<16x32xf32>
    %cst_185 = arith.constant dense<0.000000e+00> : vector<16x32xf32>
    %482 = tpu.matmul %475, %481, %cst_185 {dimension_numbers = #tpu.dot_dimension_numbers<[1], [0], [0], [1], [0, 0, 1, 1], [], []>} : vector<16x16xf32>, vector<16x32xf32>, vector<16x32xf32> -> vector<16x32xf32>
    %483 = arith.addf %480, %482 : vector<16x32xf32>
    %c18 = arith.constant 18 : index
    %c0_186 = arith.constant 0 : index
    %484 = vector.load %arg3[%c18, %c0_186] : memref<32x128xf32, #tpu.memory_space<vmem>>, vector<1x32xf32>
    %485 = vector.broadcast %484 : vector<1x32xf32> to vector<16x32xf32>
    %486 = arith.addf %483, %485 : vector<16x32xf32>
    %cst_187 = arith.constant 5.000000e-01 : f32
    %487 = vector.broadcast %cst_187 : f32 to vector<16x32xf32>
    %488 = arith.mulf %487, %486 : vector<16x32xf32>
    %cst_188 = arith.constant 0.707106769 : f32
    %489 = vector.broadcast %cst_188 : f32 to vector<16x32xf32>
    %490 = arith.mulf %486, %489 : vector<16x32xf32>
    %cst_189 = arith.constant 0.000000e+00 : f32
    %491 = vector.broadcast %cst_189 : f32 to vector<16x32xf32>
    %492 = arith.cmpf oge, %490, %491 : vector<16x32xf32>
    %cst_190 = arith.constant 1.000000e+00 : f32
    %cst_191 = arith.constant -1.000000e+00 : f32
    %493 = vector.broadcast %cst_190 : f32 to vector<16x32xf32>
    %494 = vector.broadcast %cst_191 : f32 to vector<16x32xf32>
    %495 = arith.select %492, %493, %494 : vector<16x32xi1>, vector<16x32xf32>
    %496 = math.absf %490 : vector<16x32xf32>
    %cst_192 = arith.constant 0.327591091 : f32
    %497 = vector.broadcast %cst_192 : f32 to vector<16x32xf32>
    %498 = arith.mulf %497, %496 : vector<16x32xf32>
    %cst_193 = arith.constant 1.000000e+00 : f32
    %499 = vector.broadcast %cst_193 : f32 to vector<16x32xf32>
    %500 = arith.addf %499, %498 : vector<16x32xf32>
    %501 = tpu.reciprocal %500 {approx = true} : vector<16x32xf32> -> vector<16x32xf32>
    %cst_194 = arith.constant 1.06140542 : f32
    %502 = vector.broadcast %cst_194 : f32 to vector<16x32xf32>
    %503 = arith.mulf %502, %501 : vector<16x32xf32>
    %cst_195 = arith.constant -1.45315206 : f32
    %504 = vector.broadcast %cst_195 : f32 to vector<16x32xf32>
    %505 = arith.addf %503, %504 : vector<16x32xf32>
    %506 = arith.mulf %505, %501 : vector<16x32xf32>
    %cst_196 = arith.constant 1.42141378 : f32
    %507 = vector.broadcast %cst_196 : f32 to vector<16x32xf32>
    %508 = arith.addf %506, %507 : vector<16x32xf32>
    %509 = arith.mulf %508, %501 : vector<16x32xf32>
    %cst_197 = arith.constant -0.284496725 : f32
    %510 = vector.broadcast %cst_197 : f32 to vector<16x32xf32>
    %511 = arith.addf %509, %510 : vector<16x32xf32>
    %512 = arith.mulf %511, %501 : vector<16x32xf32>
    %cst_198 = arith.constant 0.254829586 : f32
    %513 = vector.broadcast %cst_198 : f32 to vector<16x32xf32>
    %514 = arith.addf %512, %513 : vector<16x32xf32>
    %515 = arith.mulf %514, %501 : vector<16x32xf32>
    %cst_199 = arith.constant 0.000000e+00 : f32
    %516 = vector.broadcast %cst_199 : f32 to vector<16x32xf32>
    %517 = arith.subf %516, %496 : vector<16x32xf32>
    %518 = arith.mulf %517, %496 : vector<16x32xf32>
    %519 = math.exp %518 : vector<16x32xf32>
    %520 = arith.mulf %515, %519 : vector<16x32xf32>
    %cst_200 = arith.constant 1.000000e+00 : f32
    %521 = vector.broadcast %cst_200 : f32 to vector<16x32xf32>
    %522 = arith.subf %521, %520 : vector<16x32xf32>
    %523 = arith.mulf %495, %522 : vector<16x32xf32>
    %cst_201 = arith.constant 1.000000e+00 : f32
    %524 = vector.broadcast %cst_201 : f32 to vector<16x32xf32>
    %525 = arith.addf %524, %523 : vector<16x32xf32>
    %526 = arith.mulf %488, %525 : vector<16x32xf32>
    %c480 = arith.constant 480 : index
    %c0_202 = arith.constant 0 : index
    %527 = vector.load %arg2[%c480, %c0_202] : memref<744x128xf32, #tpu.memory_space<vmem>>, vector<32x96xf32>
    %cst_203 = arith.constant dense<0.000000e+00> : vector<16x96xf32>
    %528 = tpu.matmul %526, %527, %cst_203 {dimension_numbers = #tpu.dot_dimension_numbers<[1], [0], [0], [1], [0, 0, 1, 1], [], []>} : vector<16x32xf32>, vector<32x96xf32>, vector<16x96xf32> -> vector<16x96xf32>
    %c19 = arith.constant 19 : index
    %c0_204 = arith.constant 0 : index
    %529 = vector.load %arg3[%c19, %c0_204] : memref<32x128xf32, #tpu.memory_space<vmem>>, vector<1x96xf32>
    %530 = vector.broadcast %529 : vector<1x96xf32> to vector<16x96xf32>
    %531 = arith.addf %528, %530 : vector<16x96xf32>
    %532 = vector.extract_strided_slice %531 {offsets = [0, 0], sizes = [16, 8], strides = [1, 1]} : vector<16x96xf32> to vector<16x8xf32>
    %cst_205 = arith.constant 0.353553385 : f32
    %533 = vector.broadcast %cst_205 : f32 to vector<16x8xf32>
    %534 = arith.mulf %532, %533 : vector<16x8xf32>
    %535 = vector.extract_strided_slice %531 {offsets = [0, 32], sizes = [16, 8], strides = [1, 1]} : vector<16x96xf32> to vector<16x8xf32>
    %536 = vector.extract_strided_slice %531 {offsets = [0, 64], sizes = [16, 8], strides = [1, 1]} : vector<16x96xf32> to vector<16x8xf32>
    %cst_206 = arith.constant dense<0.000000e+00> : vector<16x16xf32>
    %537 = tpu.matmul %534, %535, %cst_206 {dimension_numbers = #tpu.dot_dimension_numbers<[1], [1], [0], [0], [0, 0, 1, 0], [], []>} : vector<16x8xf32>, vector<16x8xf32>, vector<16x16xf32> -> vector<16x16xf32>
    %cst_207 = arith.constant dense<0xFF800000> : vector<16xf32>
    %538 = vector.multi_reduction <maximumf>, %537, %cst_207 [1] : vector<16x16xf32> to vector<16xf32>
    %539 = vector.shape_cast %538 : vector<16xf32> to vector<16x1xf32>
    %540 = vector.broadcast %539 : vector<16x1xf32> to vector<16x16xf32>
    %541 = arith.subf %537, %540 : vector<16x16xf32>
    %542 = math.exp %541 : vector<16x16xf32>
    %cst_208 = arith.constant dense<0.000000e+00> : vector<16xf32>
    %543 = vector.multi_reduction <add>, %542, %cst_208 [1] : vector<16x16xf32> to vector<16xf32>
    %544 = vector.shape_cast %543 : vector<16xf32> to vector<16x1xf32>
    %545 = tpu.reciprocal %544 {approx = true} : vector<16x1xf32> -> vector<16x1xf32>
    %546 = vector.broadcast %545 : vector<16x1xf32> to vector<16x16xf32>
    %547 = arith.mulf %542, %546 : vector<16x16xf32>
    %cst_209 = arith.constant dense<0.000000e+00> : vector<16x8xf32>
    %548 = tpu.matmul %547, %536, %cst_209 {dimension_numbers = #tpu.dot_dimension_numbers<[1], [0], [0], [1], [0, 0, 1, 1], [], []>} : vector<16x16xf32>, vector<16x8xf32>, vector<16x8xf32> -> vector<16x8xf32>
    %c512 = arith.constant 512 : index
    %c0_210 = arith.constant 0 : index
    %549 = vector.load %arg2[%c512, %c0_210] : memref<744x128xf32, #tpu.memory_space<vmem>>, vector<8x32xf32>
    %cst_211 = arith.constant dense<0.000000e+00> : vector<16x32xf32>
    %550 = tpu.matmul %548, %549, %cst_211 {dimension_numbers = #tpu.dot_dimension_numbers<[1], [0], [0], [1], [0, 0, 1, 1], [], []>} : vector<16x8xf32>, vector<8x32xf32>, vector<16x32xf32> -> vector<16x32xf32>
    %551 = vector.extract_strided_slice %531 {offsets = [0, 8], sizes = [16, 8], strides = [1, 1]} : vector<16x96xf32> to vector<16x8xf32>
    %cst_212 = arith.constant 0.353553385 : f32
    %552 = vector.broadcast %cst_212 : f32 to vector<16x8xf32>
    %553 = arith.mulf %551, %552 : vector<16x8xf32>
    %554 = vector.extract_strided_slice %531 {offsets = [0, 40], sizes = [16, 8], strides = [1, 1]} : vector<16x96xf32> to vector<16x8xf32>
    %555 = vector.extract_strided_slice %531 {offsets = [0, 72], sizes = [16, 8], strides = [1, 1]} : vector<16x96xf32> to vector<16x8xf32>
    %cst_213 = arith.constant dense<0.000000e+00> : vector<16x16xf32>
    %556 = tpu.matmul %553, %554, %cst_213 {dimension_numbers = #tpu.dot_dimension_numbers<[1], [1], [0], [0], [0, 0, 1, 0], [], []>} : vector<16x8xf32>, vector<16x8xf32>, vector<16x16xf32> -> vector<16x16xf32>
    %cst_214 = arith.constant dense<0xFF800000> : vector<16xf32>
    %557 = vector.multi_reduction <maximumf>, %556, %cst_214 [1] : vector<16x16xf32> to vector<16xf32>
    %558 = vector.shape_cast %557 : vector<16xf32> to vector<16x1xf32>
    %559 = vector.broadcast %558 : vector<16x1xf32> to vector<16x16xf32>
    %560 = arith.subf %556, %559 : vector<16x16xf32>
    %561 = math.exp %560 : vector<16x16xf32>
    %cst_215 = arith.constant dense<0.000000e+00> : vector<16xf32>
    %562 = vector.multi_reduction <add>, %561, %cst_215 [1] : vector<16x16xf32> to vector<16xf32>
    %563 = vector.shape_cast %562 : vector<16xf32> to vector<16x1xf32>
    %564 = tpu.reciprocal %563 {approx = true} : vector<16x1xf32> -> vector<16x1xf32>
    %565 = vector.broadcast %564 : vector<16x1xf32> to vector<16x16xf32>
    %566 = arith.mulf %561, %565 : vector<16x16xf32>
    %cst_216 = arith.constant dense<0.000000e+00> : vector<16x8xf32>
    %567 = tpu.matmul %566, %555, %cst_216 {dimension_numbers = #tpu.dot_dimension_numbers<[1], [0], [0], [1], [0, 0, 1, 1], [], []>} : vector<16x16xf32>, vector<16x8xf32>, vector<16x8xf32> -> vector<16x8xf32>
    %c520 = arith.constant 520 : index
    %c0_217 = arith.constant 0 : index
    %568 = vector.load %arg2[%c520, %c0_217] : memref<744x128xf32, #tpu.memory_space<vmem>>, vector<8x32xf32>
    %cst_218 = arith.constant dense<0.000000e+00> : vector<16x32xf32>
    %569 = tpu.matmul %567, %568, %cst_218 {dimension_numbers = #tpu.dot_dimension_numbers<[1], [0], [0], [1], [0, 0, 1, 1], [], []>} : vector<16x8xf32>, vector<8x32xf32>, vector<16x32xf32> -> vector<16x32xf32>
    %570 = arith.addf %550, %569 : vector<16x32xf32>
    %571 = vector.extract_strided_slice %531 {offsets = [0, 16], sizes = [16, 8], strides = [1, 1]} : vector<16x96xf32> to vector<16x8xf32>
    %cst_219 = arith.constant 0.353553385 : f32
    %572 = vector.broadcast %cst_219 : f32 to vector<16x8xf32>
    %573 = arith.mulf %571, %572 : vector<16x8xf32>
    %574 = vector.extract_strided_slice %531 {offsets = [0, 48], sizes = [16, 8], strides = [1, 1]} : vector<16x96xf32> to vector<16x8xf32>
    %575 = vector.extract_strided_slice %531 {offsets = [0, 80], sizes = [16, 8], strides = [1, 1]} : vector<16x96xf32> to vector<16x8xf32>
    %cst_220 = arith.constant dense<0.000000e+00> : vector<16x16xf32>
    %576 = tpu.matmul %573, %574, %cst_220 {dimension_numbers = #tpu.dot_dimension_numbers<[1], [1], [0], [0], [0, 0, 1, 0], [], []>} : vector<16x8xf32>, vector<16x8xf32>, vector<16x16xf32> -> vector<16x16xf32>
    %cst_221 = arith.constant dense<0xFF800000> : vector<16xf32>
    %577 = vector.multi_reduction <maximumf>, %576, %cst_221 [1] : vector<16x16xf32> to vector<16xf32>
    %578 = vector.shape_cast %577 : vector<16xf32> to vector<16x1xf32>
    %579 = vector.broadcast %578 : vector<16x1xf32> to vector<16x16xf32>
    %580 = arith.subf %576, %579 : vector<16x16xf32>
    %581 = math.exp %580 : vector<16x16xf32>
    %cst_222 = arith.constant dense<0.000000e+00> : vector<16xf32>
    %582 = vector.multi_reduction <add>, %581, %cst_222 [1] : vector<16x16xf32> to vector<16xf32>
    %583 = vector.shape_cast %582 : vector<16xf32> to vector<16x1xf32>
    %584 = tpu.reciprocal %583 {approx = true} : vector<16x1xf32> -> vector<16x1xf32>
    %585 = vector.broadcast %584 : vector<16x1xf32> to vector<16x16xf32>
    %586 = arith.mulf %581, %585 : vector<16x16xf32>
    %cst_223 = arith.constant dense<0.000000e+00> : vector<16x8xf32>
    %587 = tpu.matmul %586, %575, %cst_223 {dimension_numbers = #tpu.dot_dimension_numbers<[1], [0], [0], [1], [0, 0, 1, 1], [], []>} : vector<16x16xf32>, vector<16x8xf32>, vector<16x8xf32> -> vector<16x8xf32>
    %c528 = arith.constant 528 : index
    %c0_224 = arith.constant 0 : index
    %588 = vector.load %arg2[%c528, %c0_224] : memref<744x128xf32, #tpu.memory_space<vmem>>, vector<8x32xf32>
    %cst_225 = arith.constant dense<0.000000e+00> : vector<16x32xf32>
    %589 = tpu.matmul %587, %588, %cst_225 {dimension_numbers = #tpu.dot_dimension_numbers<[1], [0], [0], [1], [0, 0, 1, 1], [], []>} : vector<16x8xf32>, vector<8x32xf32>, vector<16x32xf32> -> vector<16x32xf32>
    %590 = arith.addf %570, %589 : vector<16x32xf32>
    %591 = vector.extract_strided_slice %531 {offsets = [0, 24], sizes = [16, 8], strides = [1, 1]} : vector<16x96xf32> to vector<16x8xf32>
    %cst_226 = arith.constant 0.353553385 : f32
    %592 = vector.broadcast %cst_226 : f32 to vector<16x8xf32>
    %593 = arith.mulf %591, %592 : vector<16x8xf32>
    %594 = vector.extract_strided_slice %531 {offsets = [0, 56], sizes = [16, 8], strides = [1, 1]} : vector<16x96xf32> to vector<16x8xf32>
    %595 = vector.extract_strided_slice %531 {offsets = [0, 88], sizes = [16, 8], strides = [1, 1]} : vector<16x96xf32> to vector<16x8xf32>
    %cst_227 = arith.constant dense<0.000000e+00> : vector<16x16xf32>
    %596 = tpu.matmul %593, %594, %cst_227 {dimension_numbers = #tpu.dot_dimension_numbers<[1], [1], [0], [0], [0, 0, 1, 0], [], []>} : vector<16x8xf32>, vector<16x8xf32>, vector<16x16xf32> -> vector<16x16xf32>
    %cst_228 = arith.constant dense<0xFF800000> : vector<16xf32>
    %597 = vector.multi_reduction <maximumf>, %596, %cst_228 [1] : vector<16x16xf32> to vector<16xf32>
    %598 = vector.shape_cast %597 : vector<16xf32> to vector<16x1xf32>
    %599 = vector.broadcast %598 : vector<16x1xf32> to vector<16x16xf32>
    %600 = arith.subf %596, %599 : vector<16x16xf32>
    %601 = math.exp %600 : vector<16x16xf32>
    %cst_229 = arith.constant dense<0.000000e+00> : vector<16xf32>
    %602 = vector.multi_reduction <add>, %601, %cst_229 [1] : vector<16x16xf32> to vector<16xf32>
    %603 = vector.shape_cast %602 : vector<16xf32> to vector<16x1xf32>
    %604 = tpu.reciprocal %603 {approx = true} : vector<16x1xf32> -> vector<16x1xf32>
    %605 = vector.broadcast %604 : vector<16x1xf32> to vector<16x16xf32>
    %606 = arith.mulf %601, %605 : vector<16x16xf32>
    %cst_230 = arith.constant dense<0.000000e+00> : vector<16x8xf32>
    %607 = tpu.matmul %606, %595, %cst_230 {dimension_numbers = #tpu.dot_dimension_numbers<[1], [0], [0], [1], [0, 0, 1, 1], [], []>} : vector<16x16xf32>, vector<16x8xf32>, vector<16x8xf32> -> vector<16x8xf32>
    %c536 = arith.constant 536 : index
    %c0_231 = arith.constant 0 : index
    %608 = vector.load %arg2[%c536, %c0_231] : memref<744x128xf32, #tpu.memory_space<vmem>>, vector<8x32xf32>
    %cst_232 = arith.constant dense<0.000000e+00> : vector<16x32xf32>
    %609 = tpu.matmul %607, %608, %cst_232 {dimension_numbers = #tpu.dot_dimension_numbers<[1], [0], [0], [1], [0, 0, 1, 1], [], []>} : vector<16x8xf32>, vector<8x32xf32>, vector<16x32xf32> -> vector<16x32xf32>
    %610 = arith.addf %590, %609 : vector<16x32xf32>
    %c20 = arith.constant 20 : index
    %c0_233 = arith.constant 0 : index
    %611 = vector.load %arg3[%c20, %c0_233] : memref<32x128xf32, #tpu.memory_space<vmem>>, vector<1x32xf32>
    %612 = vector.broadcast %611 : vector<1x32xf32> to vector<16x32xf32>
    %613 = arith.addf %610, %612 : vector<16x32xf32>
    %614 = arith.addf %526, %613 : vector<16x32xf32>
    %c23 = arith.constant 23 : index
    %c0_234 = arith.constant 0 : index
    %615 = vector.load %arg3[%c23, %c0_234] : memref<32x128xf32, #tpu.memory_space<vmem>>, vector<1x32xf32>
    %c24 = arith.constant 24 : index
    %c0_235 = arith.constant 0 : index
    %616 = vector.load %arg3[%c24, %c0_235] : memref<32x128xf32, #tpu.memory_space<vmem>>, vector<1x32xf32>
    %cst_236 = arith.constant dense<0.000000e+00> : vector<16xf32>
    %617 = vector.multi_reduction <add>, %614, %cst_236 [1] : vector<16x32xf32> to vector<16xf32>
    %618 = vector.shape_cast %617 : vector<16xf32> to vector<16x1xf32>
    %cst_237 = arith.constant 3.200000e+01 : f32
    %619 = vector.broadcast %cst_237 : f32 to vector<16x1xf32>
    %620 = arith.divf %618, %619 : vector<16x1xf32>
    %621 = vector.broadcast %620 : vector<16x1xf32> to vector<16x32xf32>
    %622 = arith.subf %614, %621 : vector<16x32xf32>
    %623 = arith.mulf %622, %622 : vector<16x32xf32>
    %cst_238 = arith.constant dense<0.000000e+00> : vector<16xf32>
    %624 = vector.multi_reduction <add>, %623, %cst_238 [1] : vector<16x32xf32> to vector<16xf32>
    %625 = vector.shape_cast %624 : vector<16xf32> to vector<16x1xf32>
    %cst_239 = arith.constant 3.200000e+01 : f32
    %626 = vector.broadcast %cst_239 : f32 to vector<16x1xf32>
    %627 = arith.divf %625, %626 : vector<16x1xf32>
    %cst_240 = arith.constant 9.99999974E-6 : f32
    %628 = vector.broadcast %cst_240 : f32 to vector<16x1xf32>
    %629 = arith.addf %627, %628 : vector<16x1xf32>
    %630 = math.rsqrt %629 : vector<16x1xf32>
    %631 = vector.broadcast %630 : vector<16x1xf32> to vector<16x32xf32>
    %632 = arith.mulf %622, %631 : vector<16x32xf32>
    %633 = vector.broadcast %615 : vector<1x32xf32> to vector<16x32xf32>
    %634 = arith.mulf %632, %633 : vector<16x32xf32>
    %635 = vector.broadcast %616 : vector<1x32xf32> to vector<16x32xf32>
    %636 = arith.addf %634, %635 : vector<16x32xf32>
    %c544 = arith.constant 544 : index
    %c0_241 = arith.constant 0 : index
    %637 = vector.load %arg2[%c544, %c0_241] : memref<744x128xf32, #tpu.memory_space<vmem>>, vector<32x64xf32>
    %cst_242 = arith.constant dense<0.000000e+00> : vector<16x64xf32>
    %638 = tpu.matmul %636, %637, %cst_242 {dimension_numbers = #tpu.dot_dimension_numbers<[1], [0], [0], [1], [0, 0, 1, 1], [], []>} : vector<16x32xf32>, vector<32x64xf32>, vector<16x64xf32> -> vector<16x64xf32>
    %c21 = arith.constant 21 : index
    %c0_243 = arith.constant 0 : index
    %639 = vector.load %arg3[%c21, %c0_243] : memref<32x128xf32, #tpu.memory_space<vmem>>, vector<1x64xf32>
    %640 = vector.broadcast %639 : vector<1x64xf32> to vector<16x64xf32>
    %641 = arith.addf %638, %640 : vector<16x64xf32>
    %cst_244 = arith.constant 5.000000e-01 : f32
    %642 = vector.broadcast %cst_244 : f32 to vector<16x64xf32>
    %643 = arith.mulf %642, %641 : vector<16x64xf32>
    %cst_245 = arith.constant 0.707106769 : f32
    %644 = vector.broadcast %cst_245 : f32 to vector<16x64xf32>
    %645 = arith.mulf %641, %644 : vector<16x64xf32>
    %cst_246 = arith.constant 0.000000e+00 : f32
    %646 = vector.broadcast %cst_246 : f32 to vector<16x64xf32>
    %647 = arith.cmpf oge, %645, %646 : vector<16x64xf32>
    %cst_247 = arith.constant 1.000000e+00 : f32
    %cst_248 = arith.constant -1.000000e+00 : f32
    %648 = vector.broadcast %cst_247 : f32 to vector<16x64xf32>
    %649 = vector.broadcast %cst_248 : f32 to vector<16x64xf32>
    %650 = arith.select %647, %648, %649 : vector<16x64xi1>, vector<16x64xf32>
    %651 = math.absf %645 : vector<16x64xf32>
    %cst_249 = arith.constant 0.327591091 : f32
    %652 = vector.broadcast %cst_249 : f32 to vector<16x64xf32>
    %653 = arith.mulf %652, %651 : vector<16x64xf32>
    %cst_250 = arith.constant 1.000000e+00 : f32
    %654 = vector.broadcast %cst_250 : f32 to vector<16x64xf32>
    %655 = arith.addf %654, %653 : vector<16x64xf32>
    %656 = tpu.reciprocal %655 {approx = true} : vector<16x64xf32> -> vector<16x64xf32>
    %cst_251 = arith.constant 1.06140542 : f32
    %657 = vector.broadcast %cst_251 : f32 to vector<16x64xf32>
    %658 = arith.mulf %657, %656 : vector<16x64xf32>
    %cst_252 = arith.constant -1.45315206 : f32
    %659 = vector.broadcast %cst_252 : f32 to vector<16x64xf32>
    %660 = arith.addf %658, %659 : vector<16x64xf32>
    %661 = arith.mulf %660, %656 : vector<16x64xf32>
    %cst_253 = arith.constant 1.42141378 : f32
    %662 = vector.broadcast %cst_253 : f32 to vector<16x64xf32>
    %663 = arith.addf %661, %662 : vector<16x64xf32>
    %664 = arith.mulf %663, %656 : vector<16x64xf32>
    %cst_254 = arith.constant -0.284496725 : f32
    %665 = vector.broadcast %cst_254 : f32 to vector<16x64xf32>
    %666 = arith.addf %664, %665 : vector<16x64xf32>
    %667 = arith.mulf %666, %656 : vector<16x64xf32>
    %cst_255 = arith.constant 0.254829586 : f32
    %668 = vector.broadcast %cst_255 : f32 to vector<16x64xf32>
    %669 = arith.addf %667, %668 : vector<16x64xf32>
    %670 = arith.mulf %669, %656 : vector<16x64xf32>
    %cst_256 = arith.constant 0.000000e+00 : f32
    %671 = vector.broadcast %cst_256 : f32 to vector<16x64xf32>
    %672 = arith.subf %671, %651 : vector<16x64xf32>
    %673 = arith.mulf %672, %651 : vector<16x64xf32>
    %674 = math.exp %673 : vector<16x64xf32>
    %675 = arith.mulf %670, %674 : vector<16x64xf32>
    %cst_257 = arith.constant 1.000000e+00 : f32
    %676 = vector.broadcast %cst_257 : f32 to vector<16x64xf32>
    %677 = arith.subf %676, %675 : vector<16x64xf32>
    %678 = arith.mulf %650, %677 : vector<16x64xf32>
    %cst_258 = arith.constant 1.000000e+00 : f32
    %679 = vector.broadcast %cst_258 : f32 to vector<16x64xf32>
    %680 = arith.addf %679, %678 : vector<16x64xf32>
    %681 = arith.mulf %643, %680 : vector<16x64xf32>
    %c576 = arith.constant 576 : index
    %c0_259 = arith.constant 0 : index
    %682 = vector.load %arg2[%c576, %c0_259] : memref<744x128xf32, #tpu.memory_space<vmem>>, vector<64x32xf32>
    %cst_260 = arith.constant dense<0.000000e+00> : vector<16x32xf32>
    %683 = tpu.matmul %681, %682, %cst_260 {dimension_numbers = #tpu.dot_dimension_numbers<[1], [0], [0], [1], [0, 0, 1, 1], [], []>} : vector<16x64xf32>, vector<64x32xf32>, vector<16x32xf32> -> vector<16x32xf32>
    %c22 = arith.constant 22 : index
    %c0_261 = arith.constant 0 : index
    %684 = vector.load %arg3[%c22, %c0_261] : memref<32x128xf32, #tpu.memory_space<vmem>>, vector<1x32xf32>
    %685 = vector.broadcast %684 : vector<1x32xf32> to vector<16x32xf32>
    %686 = arith.addf %683, %685 : vector<16x32xf32>
    %687 = arith.addf %636, %686 : vector<16x32xf32>
    %c25 = arith.constant 25 : index
    %c0_262 = arith.constant 0 : index
    %688 = vector.load %arg3[%c25, %c0_262] : memref<32x128xf32, #tpu.memory_space<vmem>>, vector<1x32xf32>
    %c26 = arith.constant 26 : index
    %c0_263 = arith.constant 0 : index
    %689 = vector.load %arg3[%c26, %c0_263] : memref<32x128xf32, #tpu.memory_space<vmem>>, vector<1x32xf32>
    %cst_264 = arith.constant dense<0.000000e+00> : vector<16xf32>
    %690 = vector.multi_reduction <add>, %687, %cst_264 [1] : vector<16x32xf32> to vector<16xf32>
    %691 = vector.shape_cast %690 : vector<16xf32> to vector<16x1xf32>
    %cst_265 = arith.constant 3.200000e+01 : f32
    %692 = vector.broadcast %cst_265 : f32 to vector<16x1xf32>
    %693 = arith.divf %691, %692 : vector<16x1xf32>
    %694 = vector.broadcast %693 : vector<16x1xf32> to vector<16x32xf32>
    %695 = arith.subf %687, %694 : vector<16x32xf32>
    %696 = arith.mulf %695, %695 : vector<16x32xf32>
    %cst_266 = arith.constant dense<0.000000e+00> : vector<16xf32>
    %697 = vector.multi_reduction <add>, %696, %cst_266 [1] : vector<16x32xf32> to vector<16xf32>
    %698 = vector.shape_cast %697 : vector<16xf32> to vector<16x1xf32>
    %cst_267 = arith.constant 3.200000e+01 : f32
    %699 = vector.broadcast %cst_267 : f32 to vector<16x1xf32>
    %700 = arith.divf %698, %699 : vector<16x1xf32>
    %cst_268 = arith.constant 9.99999974E-6 : f32
    %701 = vector.broadcast %cst_268 : f32 to vector<16x1xf32>
    %702 = arith.addf %700, %701 : vector<16x1xf32>
    %703 = math.rsqrt %702 : vector<16x1xf32>
    %704 = vector.broadcast %703 : vector<16x1xf32> to vector<16x32xf32>
    %705 = arith.mulf %695, %704 : vector<16x32xf32>
    %706 = vector.broadcast %688 : vector<1x32xf32> to vector<16x32xf32>
    %707 = arith.mulf %705, %706 : vector<16x32xf32>
    %708 = vector.broadcast %689 : vector<1x32xf32> to vector<16x32xf32>
    %709 = arith.addf %707, %708 : vector<16x32xf32>
    %cst_269 = arith.constant 5.000000e-01 : f32
    %710 = vector.broadcast %cst_269 : f32 to vector<16x32xf32>
    %711 = arith.mulf %710, %709 : vector<16x32xf32>
    %cst_270 = arith.constant 0.707106769 : f32
    %712 = vector.broadcast %cst_270 : f32 to vector<16x32xf32>
    %713 = arith.mulf %709, %712 : vector<16x32xf32>
    %cst_271 = arith.constant 0.000000e+00 : f32
    %714 = vector.broadcast %cst_271 : f32 to vector<16x32xf32>
    %715 = arith.cmpf oge, %713, %714 : vector<16x32xf32>
    %cst_272 = arith.constant 1.000000e+00 : f32
    %cst_273 = arith.constant -1.000000e+00 : f32
    %716 = vector.broadcast %cst_272 : f32 to vector<16x32xf32>
    %717 = vector.broadcast %cst_273 : f32 to vector<16x32xf32>
    %718 = arith.select %715, %716, %717 : vector<16x32xi1>, vector<16x32xf32>
    %719 = math.absf %713 : vector<16x32xf32>
    %cst_274 = arith.constant 0.327591091 : f32
    %720 = vector.broadcast %cst_274 : f32 to vector<16x32xf32>
    %721 = arith.mulf %720, %719 : vector<16x32xf32>
    %cst_275 = arith.constant 1.000000e+00 : f32
    %722 = vector.broadcast %cst_275 : f32 to vector<16x32xf32>
    %723 = arith.addf %722, %721 : vector<16x32xf32>
    %724 = tpu.reciprocal %723 {approx = true} : vector<16x32xf32> -> vector<16x32xf32>
    %cst_276 = arith.constant 1.06140542 : f32
    %725 = vector.broadcast %cst_276 : f32 to vector<16x32xf32>
    %726 = arith.mulf %725, %724 : vector<16x32xf32>
    %cst_277 = arith.constant -1.45315206 : f32
    %727 = vector.broadcast %cst_277 : f32 to vector<16x32xf32>
    %728 = arith.addf %726, %727 : vector<16x32xf32>
    %729 = arith.mulf %728, %724 : vector<16x32xf32>
    %cst_278 = arith.constant 1.42141378 : f32
    %730 = vector.broadcast %cst_278 : f32 to vector<16x32xf32>
    %731 = arith.addf %729, %730 : vector<16x32xf32>
    %732 = arith.mulf %731, %724 : vector<16x32xf32>
    %cst_279 = arith.constant -0.284496725 : f32
    %733 = vector.broadcast %cst_279 : f32 to vector<16x32xf32>
    %734 = arith.addf %732, %733 : vector<16x32xf32>
    %735 = arith.mulf %734, %724 : vector<16x32xf32>
    %cst_280 = arith.constant 0.254829586 : f32
    %736 = vector.broadcast %cst_280 : f32 to vector<16x32xf32>
    %737 = arith.addf %735, %736 : vector<16x32xf32>
    %738 = arith.mulf %737, %724 : vector<16x32xf32>
    %cst_281 = arith.constant 0.000000e+00 : f32
    %739 = vector.broadcast %cst_281 : f32 to vector<16x32xf32>
    %740 = arith.subf %739, %719 : vector<16x32xf32>
    %741 = arith.mulf %740, %719 : vector<16x32xf32>
    %742 = math.exp %741 : vector<16x32xf32>
    %743 = arith.mulf %738, %742 : vector<16x32xf32>
    %cst_282 = arith.constant 1.000000e+00 : f32
    %744 = vector.broadcast %cst_282 : f32 to vector<16x32xf32>
    %745 = arith.subf %744, %743 : vector<16x32xf32>
    %746 = arith.mulf %718, %745 : vector<16x32xf32>
    %cst_283 = arith.constant 1.000000e+00 : f32
    %747 = vector.broadcast %cst_283 : f32 to vector<16x32xf32>
    %748 = arith.addf %747, %746 : vector<16x32xf32>
    %749 = arith.mulf %711, %748 : vector<16x32xf32>
    %c640 = arith.constant 640 : index
    %c0_284 = arith.constant 0 : index
    %750 = vector.load %arg2[%c640, %c0_284] : memref<744x128xf32, #tpu.memory_space<vmem>>, vector<32x32xf32>
    %cst_285 = arith.constant dense<0.000000e+00> : vector<16x32xf32>
    %751 = tpu.matmul %749, %750, %cst_285 {dimension_numbers = #tpu.dot_dimension_numbers<[1], [0], [0], [1], [0, 0, 1, 1], [], []>} : vector<16x32xf32>, vector<32x32xf32>, vector<16x32xf32> -> vector<16x32xf32>
    %c27 = arith.constant 27 : index
    %c0_286 = arith.constant 0 : index
    %752 = vector.load %arg3[%c27, %c0_286] : memref<32x128xf32, #tpu.memory_space<vmem>>, vector<1x32xf32>
    %753 = vector.broadcast %752 : vector<1x32xf32> to vector<16x32xf32>
    %754 = arith.addf %751, %753 : vector<16x32xf32>
    %cst_287 = arith.constant 5.000000e-01 : f32
    %755 = vector.broadcast %cst_287 : f32 to vector<16x32xf32>
    %756 = arith.mulf %755, %754 : vector<16x32xf32>
    %cst_288 = arith.constant 0.707106769 : f32
    %757 = vector.broadcast %cst_288 : f32 to vector<16x32xf32>
    %758 = arith.mulf %754, %757 : vector<16x32xf32>
    %cst_289 = arith.constant 0.000000e+00 : f32
    %759 = vector.broadcast %cst_289 : f32 to vector<16x32xf32>
    %760 = arith.cmpf oge, %758, %759 : vector<16x32xf32>
    %cst_290 = arith.constant 1.000000e+00 : f32
    %cst_291 = arith.constant -1.000000e+00 : f32
    %761 = vector.broadcast %cst_290 : f32 to vector<16x32xf32>
    %762 = vector.broadcast %cst_291 : f32 to vector<16x32xf32>
    %763 = arith.select %760, %761, %762 : vector<16x32xi1>, vector<16x32xf32>
    %764 = math.absf %758 : vector<16x32xf32>
    %cst_292 = arith.constant 0.327591091 : f32
    %765 = vector.broadcast %cst_292 : f32 to vector<16x32xf32>
    %766 = arith.mulf %765, %764 : vector<16x32xf32>
    %cst_293 = arith.constant 1.000000e+00 : f32
    %767 = vector.broadcast %cst_293 : f32 to vector<16x32xf32>
    %768 = arith.addf %767, %766 : vector<16x32xf32>
    %769 = tpu.reciprocal %768 {approx = true} : vector<16x32xf32> -> vector<16x32xf32>
    %cst_294 = arith.constant 1.06140542 : f32
    %770 = vector.broadcast %cst_294 : f32 to vector<16x32xf32>
    %771 = arith.mulf %770, %769 : vector<16x32xf32>
    %cst_295 = arith.constant -1.45315206 : f32
    %772 = vector.broadcast %cst_295 : f32 to vector<16x32xf32>
    %773 = arith.addf %771, %772 : vector<16x32xf32>
    %774 = arith.mulf %773, %769 : vector<16x32xf32>
    %cst_296 = arith.constant 1.42141378 : f32
    %775 = vector.broadcast %cst_296 : f32 to vector<16x32xf32>
    %776 = arith.addf %774, %775 : vector<16x32xf32>
    %777 = arith.mulf %776, %769 : vector<16x32xf32>
    %cst_297 = arith.constant -0.284496725 : f32
    %778 = vector.broadcast %cst_297 : f32 to vector<16x32xf32>
    %779 = arith.addf %777, %778 : vector<16x32xf32>
    %780 = arith.mulf %779, %769 : vector<16x32xf32>
    %cst_298 = arith.constant 0.254829586 : f32
    %781 = vector.broadcast %cst_298 : f32 to vector<16x32xf32>
    %782 = arith.addf %780, %781 : vector<16x32xf32>
    %783 = arith.mulf %782, %769 : vector<16x32xf32>
    %cst_299 = arith.constant 0.000000e+00 : f32
    %784 = vector.broadcast %cst_299 : f32 to vector<16x32xf32>
    %785 = arith.subf %784, %764 : vector<16x32xf32>
    %786 = arith.mulf %785, %764 : vector<16x32xf32>
    %787 = math.exp %786 : vector<16x32xf32>
    %788 = arith.mulf %783, %787 : vector<16x32xf32>
    %cst_300 = arith.constant 1.000000e+00 : f32
    %789 = vector.broadcast %cst_300 : f32 to vector<16x32xf32>
    %790 = arith.subf %789, %788 : vector<16x32xf32>
    %791 = arith.mulf %763, %790 : vector<16x32xf32>
    %cst_301 = arith.constant 1.000000e+00 : f32
    %792 = vector.broadcast %cst_301 : f32 to vector<16x32xf32>
    %793 = arith.addf %792, %791 : vector<16x32xf32>
    %794 = arith.mulf %756, %793 : vector<16x32xf32>
    %c672 = arith.constant 672 : index
    %c0_302 = arith.constant 0 : index
    %795 = vector.load %arg2[%c672, %c0_302] : memref<744x128xf32, #tpu.memory_space<vmem>>, vector<32x32xf32>
    %cst_303 = arith.constant dense<0.000000e+00> : vector<16x32xf32>
    %796 = tpu.matmul %749, %795, %cst_303 {dimension_numbers = #tpu.dot_dimension_numbers<[1], [0], [0], [1], [0, 0, 1, 1], [], []>} : vector<16x32xf32>, vector<32x32xf32>, vector<16x32xf32> -> vector<16x32xf32>
    %c28 = arith.constant 28 : index
    %c0_304 = arith.constant 0 : index
    %797 = vector.load %arg3[%c28, %c0_304] : memref<32x128xf32, #tpu.memory_space<vmem>>, vector<1x32xf32>
    %798 = vector.broadcast %797 : vector<1x32xf32> to vector<16x32xf32>
    %799 = arith.addf %796, %798 : vector<16x32xf32>
    %cst_305 = arith.constant 5.000000e-01 : f32
    %800 = vector.broadcast %cst_305 : f32 to vector<16x32xf32>
    %801 = arith.mulf %800, %799 : vector<16x32xf32>
    %cst_306 = arith.constant 0.707106769 : f32
    %802 = vector.broadcast %cst_306 : f32 to vector<16x32xf32>
    %803 = arith.mulf %799, %802 : vector<16x32xf32>
    %cst_307 = arith.constant 0.000000e+00 : f32
    %804 = vector.broadcast %cst_307 : f32 to vector<16x32xf32>
    %805 = arith.cmpf oge, %803, %804 : vector<16x32xf32>
    %cst_308 = arith.constant 1.000000e+00 : f32
    %cst_309 = arith.constant -1.000000e+00 : f32
    %806 = vector.broadcast %cst_308 : f32 to vector<16x32xf32>
    %807 = vector.broadcast %cst_309 : f32 to vector<16x32xf32>
    %808 = arith.select %805, %806, %807 : vector<16x32xi1>, vector<16x32xf32>
    %809 = math.absf %803 : vector<16x32xf32>
    %cst_310 = arith.constant 0.327591091 : f32
    %810 = vector.broadcast %cst_310 : f32 to vector<16x32xf32>
    %811 = arith.mulf %810, %809 : vector<16x32xf32>
    %cst_311 = arith.constant 1.000000e+00 : f32
    %812 = vector.broadcast %cst_311 : f32 to vector<16x32xf32>
    %813 = arith.addf %812, %811 : vector<16x32xf32>
    %814 = tpu.reciprocal %813 {approx = true} : vector<16x32xf32> -> vector<16x32xf32>
    %cst_312 = arith.constant 1.06140542 : f32
    %815 = vector.broadcast %cst_312 : f32 to vector<16x32xf32>
    %816 = arith.mulf %815, %814 : vector<16x32xf32>
    %cst_313 = arith.constant -1.45315206 : f32
    %817 = vector.broadcast %cst_313 : f32 to vector<16x32xf32>
    %818 = arith.addf %816, %817 : vector<16x32xf32>
    %819 = arith.mulf %818, %814 : vector<16x32xf32>
    %cst_314 = arith.constant 1.42141378 : f32
    %820 = vector.broadcast %cst_314 : f32 to vector<16x32xf32>
    %821 = arith.addf %819, %820 : vector<16x32xf32>
    %822 = arith.mulf %821, %814 : vector<16x32xf32>
    %cst_315 = arith.constant -0.284496725 : f32
    %823 = vector.broadcast %cst_315 : f32 to vector<16x32xf32>
    %824 = arith.addf %822, %823 : vector<16x32xf32>
    %825 = arith.mulf %824, %814 : vector<16x32xf32>
    %cst_316 = arith.constant 0.254829586 : f32
    %826 = vector.broadcast %cst_316 : f32 to vector<16x32xf32>
    %827 = arith.addf %825, %826 : vector<16x32xf32>
    %828 = arith.mulf %827, %814 : vector<16x32xf32>
    %cst_317 = arith.constant 0.000000e+00 : f32
    %829 = vector.broadcast %cst_317 : f32 to vector<16x32xf32>
    %830 = arith.subf %829, %809 : vector<16x32xf32>
    %831 = arith.mulf %830, %809 : vector<16x32xf32>
    %832 = math.exp %831 : vector<16x32xf32>
    %833 = arith.mulf %828, %832 : vector<16x32xf32>
    %cst_318 = arith.constant 1.000000e+00 : f32
    %834 = vector.broadcast %cst_318 : f32 to vector<16x32xf32>
    %835 = arith.subf %834, %833 : vector<16x32xf32>
    %836 = arith.mulf %808, %835 : vector<16x32xf32>
    %cst_319 = arith.constant 1.000000e+00 : f32
    %837 = vector.broadcast %cst_319 : f32 to vector<16x32xf32>
    %838 = arith.addf %837, %836 : vector<16x32xf32>
    %839 = arith.mulf %801, %838 : vector<16x32xf32>
    %c704 = arith.constant 704 : index
    %c0_320 = arith.constant 0 : index
    %840 = vector.load %arg2[%c704, %c0_320] : memref<744x128xf32, #tpu.memory_space<vmem>>, vector<32x66xf32>
    %cst_321 = arith.constant dense<0.000000e+00> : vector<16x66xf32>
    %841 = tpu.matmul %794, %840, %cst_321 {dimension_numbers = #tpu.dot_dimension_numbers<[1], [0], [0], [1], [0, 0, 1, 1], [], []>} : vector<16x32xf32>, vector<32x66xf32>, vector<16x66xf32> -> vector<16x66xf32>
    %c736 = arith.constant 736 : index
    %c0_322 = arith.constant 0 : index
    %842 = vector.load %arg2[%c736, %c0_322] : memref<744x128xf32, #tpu.memory_space<vmem>>, vector<2x33xf32>
    %843 = vector.extract_strided_slice %842 {offsets = [0, 0], sizes = [2, 32], strides = [1, 1]} : vector<2x33xf32> to vector<2x32xf32>
    %cst_323 = arith.constant dense<0.000000e+00> : vector<2x16xf32>
    %844 = tpu.matmul %843, %839, %cst_323 {dimension_numbers = #tpu.dot_dimension_numbers<[1], [1], [0], [0], [0, 0, 1, 0], [], []>} : vector<2x32xf32>, vector<16x32xf32>, vector<2x16xf32> -> vector<2x16xf32>
    %845 = vector.extract_strided_slice %842 {offsets = [0, 32], sizes = [2, 1], strides = [1, 1]} : vector<2x33xf32> to vector<2x1xf32>
    %846 = vector.broadcast %845 : vector<2x1xf32> to vector<2x16xf32>
    %847 = arith.addf %844, %846 : vector<2x16xf32>
    %848 = vector.extract_strided_slice %841 {offsets = [0, 0], sizes = [16, 32], strides = [1, 1]} : vector<16x66xf32> to vector<16x32xf32>
    %cst_324 = arith.constant dense<0.000000e+00> : vector<16x16xf32>
    %849 = tpu.matmul %848, %839, %cst_324 {dimension_numbers = #tpu.dot_dimension_numbers<[1], [1], [0], [0], [0, 0, 1, 0], [], []>} : vector<16x32xf32>, vector<16x32xf32>, vector<16x16xf32> -> vector<16x16xf32>
    %850 = vector.extract_strided_slice %841 {offsets = [0, 64], sizes = [16, 1], strides = [1, 1]} : vector<16x66xf32> to vector<16x1xf32>
    %851 = vector.broadcast %850 : vector<16x1xf32> to vector<16x16xf32>
    %852 = arith.addf %849, %851 : vector<16x16xf32>
    %853 = vector.extract_strided_slice %847 {offsets = [0, 0], sizes = [1, 16], strides = [1, 1]} : vector<2x16xf32> to vector<1x16xf32>
    %854 = vector.broadcast %853 : vector<1x16xf32> to vector<16x16xf32>
    %855 = arith.addf %852, %854 : vector<16x16xf32>
    %856 = vector.extract_strided_slice %841 {offsets = [0, 32], sizes = [16, 32], strides = [1, 1]} : vector<16x66xf32> to vector<16x32xf32>
    %cst_325 = arith.constant dense<0.000000e+00> : vector<16x16xf32>
    %857 = tpu.matmul %856, %839, %cst_325 {dimension_numbers = #tpu.dot_dimension_numbers<[1], [1], [0], [0], [0, 0, 1, 0], [], []>} : vector<16x32xf32>, vector<16x32xf32>, vector<16x16xf32> -> vector<16x16xf32>
    %858 = vector.extract_strided_slice %841 {offsets = [0, 65], sizes = [16, 1], strides = [1, 1]} : vector<16x66xf32> to vector<16x1xf32>
    %859 = vector.broadcast %858 : vector<16x1xf32> to vector<16x16xf32>
    %860 = arith.addf %857, %859 : vector<16x16xf32>
    %861 = vector.extract_strided_slice %847 {offsets = [1, 0], sizes = [1, 16], strides = [1, 1]} : vector<2x16xf32> to vector<1x16xf32>
    %862 = vector.broadcast %861 : vector<1x16xf32> to vector<16x16xf32>
    %863 = arith.addf %860, %862 : vector<16x16xf32>
    %864 = arith.maximumf %855, %863 : vector<16x16xf32>
    %865 = arith.subf %855, %864 : vector<16x16xf32>
    %866 = math.exp %865 : vector<16x16xf32>
    %867 = arith.subf %863, %864 : vector<16x16xf32>
    %868 = math.exp %867 : vector<16x16xf32>
    %869 = arith.addf %866, %868 : vector<16x16xf32>
    %cst_326 = arith.constant 1.000000e+00 : f32
    %870 = vector.broadcast %cst_326 : f32 to vector<16x16xf32>
    %871 = arith.divf %870, %869 : vector<16x16xf32>
    %872 = arith.mulf %866, %871 : vector<16x16xf32>
    %c0_327 = arith.constant 0 : index
    %c0_328 = arith.constant 0 : index
    %c0_329 = arith.constant 0 : index
    %c0_330 = arith.constant 0 : index
    %873 = vector.load %arg4[%c0_327, %c0_328, %c0_329, %c0_330] : memref<1x2x16x16xf32, #tpu.memory_space<vmem>>, vector<1x1x16x16xf32>
    %874 = vector.shape_cast %873 : vector<1x1x16x16xf32> to vector<16x16xf32>
    %875 = vector.shape_cast %872 : vector<16x16xf32> to vector<1x1x16x16xf32>
    tpu.vector_store %arg4[%c0_327, %c0_328, %c0_329, %c0_330], %875 {strides = array<i32>} : memref<1x2x16x16xf32, #tpu.memory_space<vmem>>, vector<1x1x16x16xf32>,
    %876 = arith.mulf %868, %871 : vector<16x16xf32>
    %c0_331 = arith.constant 0 : index
    %c1_332 = arith.constant 1 : index
    %c0_333 = arith.constant 0 : index
    %c0_334 = arith.constant 0 : index
    %877 = vector.load %arg4[%c0_331, %c1_332, %c0_333, %c0_334] : memref<1x2x16x16xf32, #tpu.memory_space<vmem>>, vector<1x1x16x16xf32>
    %878 = vector.shape_cast %877 : vector<1x1x16x16xf32> to vector<16x16xf32>
    %879 = vector.shape_cast %876 : vector<16x16xf32> to vector<1x1x16x16xf32>
    tpu.vector_store %arg4[%c0_331, %c1_332, %c0_333, %c0_334], %879 {strides = array<i32>} : memref<1x2x16x16xf32, #tpu.memory_space<vmem>>, vector<1x1x16x16xf32>,
    return
  }
  func.func @transform_0(%arg0: i32) -> (i32, i32, i32) {
    %c0_i32 = arith.constant 0 : i32
    %c0_i32_0 = arith.constant 0 : i32
    %c0_i32_1 = arith.constant 0 : i32
    return %arg0, %c0_i32, %c0_i32_0 : i32, i32, i32
  }
  func.func @transform_1(%arg0: i32) -> (i32, i32) {
    %c0_i32 = arith.constant 0 : i32
    %c0_i32_0 = arith.constant 0 : i32
    %c0_i32_1 = arith.constant 0 : i32
    return %c0_i32, %c0_i32_0 : i32, i32
  }
  func.func @transform_2(%arg0: i32) -> (i32, i32) {
    %c0_i32 = arith.constant 0 : i32
    %c0_i32_0 = arith.constant 0 : i32
    %c0_i32_1 = arith.constant 0 : i32
    return %c0_i32, %c0_i32_0 : i32, i32
  }
  func.func @transform_3(%arg0: i32) -> (i32, i32, i32, i32) {
    %c0_i32 = arith.constant 0 : i32
    %c0_i32_0 = arith.constant 0 : i32
    %c0_i32_1 = arith.constant 0 : i32
    %c0_i32_2 = arith.constant 0 : i32
    return %arg0, %c0_i32, %c0_i32_0, %c0_i32_1 : i32, i32, i32, i32
  }
  func.func @transform_4(%arg0: i32) -> (i32, i32, i32) {
    %c0_i32 = arith.constant 0 : i32
    %c0_i32_0 = arith.constant 0 : i32
    %c0_i32_1 = arith.constant 0 : i32
    return %arg0, %c0_i32, %c0_i32_0 : i32, i32, i32
  }
}

</mosaic_0001>

<bundles_post_ra>
// kernel: _lambda_.1
= control target key start
LH: loop header
LB: loop body
LE: loop exit
PB: predicated region body
PF: predicated region fallthrough
CT: control target
= control target key end

     0   :  { %10 = vsyncpa [#allocation3], 0  ;;  %s8113_s15 = smov 0   ;;  %s8777_s0 = inlined_call_operand.vmem [shape: f32[2,16,32], index: 0, kind: input, shape index: {}]   ;;  %s8778_s1 = inlined_call_operand.hbm [shape: f32[744,128], index: 1, kind: input, shape index: {}]   ;;  %s8779_s2 = inlined_call_operand.vmem [shape: f32[32,128], index: 2, kind: input, shape index: {}]   ;;  %s8780_s3 = inlined_call_operand.vmem [shape: f32[2,2,16,16], index: 3, kind: output, shape index: {0}]   ;;  %s8781_s4 = inlined_call_operand.vmem [shape: f32[2,16,16], index: 4, kind: output, shape index: {1}]  }
   0x1 LB: > { %s8119_s16 = sadd.s32 4294967295, %s8065_s15   ;;  %p6427_p0 = scmp.ge.s32.totalorder %s8065_s15, 1  ;;  %s8065_s15 = sphi %s8113_s15, %s16_s15  }
   0x2   : > { %p141_p1 = scmp.lt.s32.totalorder %s8065_s15, 3  ;;  %s8067_s17 = smov [#allocation2]  }
   0x3   : > { %s153_s18 = sshll.u32 %s8067_s17, 4  ;;  %p8782_p3 = scmp.eq.s32.totalorder %s8119_s16, 0  ;;  %s154_s18 = int_to_ptr.vmem [resolvable:$true] %s153_s18 }
   0x4   : > { %p8123_p2 = pnand %p6427_p0, %p141_p1  ;;  %s8027_s23 = scalar_lea.hbm %s8778_s1, 11904 }
   0x5   : > { %p8028_p6 = scmp.ne.s32.totalorder %s8778_s1, %s8027_s23  ;;  %p8034_p10 = scmp.lt.u32.totalorder %s8027_s23, %s8778_s1 }
   0x6   : > { %s8784_s19 = scalar_select %p8123_p2, 1, 0 }
   0x7   : > { %p7663_p4 = pneg %p8123_p2 }
   0x9   : > { %p8132_p5 = pnand %p8782_p3, %p7663_p4 }
   0xb   : > { %p8029_p7 = pneg %p8132_p5 }
   0xd   : > { %p8030_p8 = pnand %p8029_p7, %p8028_p6 }
   0xf   : > { %p8031_p9 = pneg %p8030_p8 }
  0x11   : > { %p8036_p11 = pnand %p8034_p10, %p8031_p9 }
  0x13   : > { %8039 = shalt.err (!%p8036_p11)
}
  0x14   : > { %s8040_s28 = scalar_lea.vmem %s154_s18, 11904  ;;  %p8048_p1 = scmp.lt.s32.totalorder %s154_s18, %s154_s18 }
  0x15   : > { %p8041_p12 = scmp.ne.s32.totalorder %s154_s18, %s8040_s28  ;;  %p8049_p4 = scmp.lt.s32.totalorder %s8040_s28, %s8040_s28 }
  0x17   : > { %p8043_p13 = pnand %p8041_p12, %p8029_p7  ;;  %p8050_p3 = por %p8049_p4, %p8048_p1 }
  0x19   : > { %p8044_p0 = pneg %p8043_p13 }
  0x1b   : > { %p8051_p2 = pnand %p8050_p3, %p8044_p0 }
  0x1d   : > { %8054 = shalt.err (!%p8051_p2)
}
  0x1e   : > { %s8068_s29 = smov 128   ;;  %s8069_s30 = smov 8  }
  0x1f   : > { %7666 = dma.hbm_to_vmem [thread:$0]  (!%p8132_p5), %s8778_s1, 11904, %s154_s18, [#allocation3], %s8068_s29, %s8068_s29, %s8069_s30  }
  0x20   : > { %p8786_p6 = scmp.ne.s32.totalorder %s8784_s19, 0 }
  0x21   : > { %p8787_p8 = scmp.eq.s32.totalorder (!%p8786_p6), %s8119_s16, 0 }
  0x22   : > { %180 = sbr.rel (%p8786_p6) target bundleno = 11806 (0x2e1e), region = 32 }
  0x29   : > { %8060 = dma.done.wait (%p8787_p8), [#allocation3], 11904   ;;  %p8788_p7 = pmov %p8787_p8 }
  0x2a   : > { %p211_p2 = scmp.lt.s32.totalorder %s8119_s16, 1  ;;  %vm237_vm0 = vcmask 261120   ;;  %v228_v0 = vld [vmem:[#allocation2] sm:$0xff]  ;;  %v229_v1 = vld [vmem:[#allocation2 + $0x8] sm:$0xff]  ;;  %v230_v2 = vld [vmem:[#allocation2 + $0x10] sm:$0xff]  ;;  %vm327_vm1 = vcmask 64512  }
  0x2b   : > { %8062 = vsyncadd (%p8788_p7), [#allocation3], 4294955392  ;;  %v7341_v3 = vpack.c.bf16 %v229_v1, %v228_v0  ;;  %v231_v4 = vld [vmem:[#allocation2 + $0x18] sm:$0xff]  ;;  %v6438_v8 = vld [vmem:[%s8779_s2] ss:$0 sm:$0xff]  ;;  %s8070_s13 = smov 96  }
  0x2c   : > { %s8792_s16 = smov (!%p211_p2, %s8119_s16), 1  ;;  %v7345_v6 = vpack.c.bf16 %v231_v4, %v230_v2  ;;  %s8071_s14 = smov 120   ;;  %vm8203_vm2 = vmpackc.low %vm327_vm1, %vm327_vm1  ;;  %vm413_vm3 = vcmask 130048   ;;  %vm1660_vm6 = vcmask 523264  }
  0x2d   : > { %s6616_s7 = sshll.u32 %s8792_s16, 4  ;;  %7342 = vmatprep.subr.bf16.mxu0 %v7341_v3  ;;  %s8072_s17 = smov 88  }
  0x2e   : > { %s215_s10 = scalar_lea.vmem %s8777_s0, %s6616_s7  ;;  %7344 = vmatpush3.bf16.msra.mxu0 %v7341_v3  ;;  %s8073_s18 = smov 80  }
  0x2f   : > { %v8168_v5 = vld [vmem:[%s215_s10] sm:$0xff]  ;;  %7346 = vmatprep.subr.bf16.mxu0 %v7345_v6  ;;  %v8172_v7 = vld [vmem:[%s215_s10 + $0x8] sm:$0xff]  ;;  %s8074_s19 = smov 112   ;;  %s8075_s20 = smov 56  }
  0x30   : > { %6886 = vmatprep.mubr.msk.f32.mxu0 %vm237_vm0, %v8168_v5  ;;  %s8076_s21 = smov 72   ;;  %s8077_s22 = smov 64  }
  0x31   : > { %s8078_s23 = smov 104   ;;  %s8079_s24 = smov 48  }
  0x32   : > { %7348 = vmatpush3.bf16.msra.mxu0 %v7345_v6  ;;  %s8080_s25 = smov 40   ;;  %s225_s26 = scalar_lea.vmem %s8781_s4, %s6616_s7 }
  0x35   : > { %6887 = vmatmul.mubr.msk.f32.vlgmr.msra.gmra.mrb[0].mxu0 %vm237_vm0, %v8172_v7 }
 0x108   : > { %v6888_v9 = vpop.f32.mrb[0].mxu0 }
 0x109   : > { %v316_v10 = vadd.f32 %v6888_v9, %v6438_v8  ;;  %v310_v11 = vpop.f32.mrb[1].mxu0 }
 0x10a   : > { %v311_v12 = vadd.f32 %v6438_v8, %v310_v11 }
 0x10b   : > { %v8189_v15 = vmul.f32 0.35355338, %v316_v10 }
 0x10c   : > { %v8179_v13 = vpack.i.bf16 %v316_v10, %v311_v12  ;;  %v8181_v14 = vmul.f32 0.35355338, %v311_v12 }
 0x10e   : > { %7699 = vrot.lane.b32.xlu0 %v8179_v13, %s8070_s13  ;;  %524 = vrot.lane.b32.xlu1 %v8181_v14, %s8071_s14 }
 0x10f   : > { %6893 = vmatprep.mubr.msk.f32.mxu1 %vm327_vm1, %v8181_v14 }
 0x112   : > { %7704 = vrot.lane.b32.xlu0 %v8179_v13, %s8072_s17  ;;  %526 = vrot.lane.b32.xlu1 %v8189_v15, %s8071_s14 }
 0x116   : > { %7709 = vrot.lane.b32.xlu0 %v8179_v13, %s8073_s18  ;;  %887 = vrot.lane.b32.xlu1 %v8181_v14, %s8074_s19 }
 0x11a   : > { %889 = vrot.lane.b32.xlu0 %v8189_v15, %s8074_s19 }
 0x180   : > { %v7700_v16 = vpop.permute.xlu0 %7699  ;;  %v525_v26 = vpop.permute.xlu1 %524 }
 0x181   : > { %v7702_v17 = vunpack.i.h.bf16 %v7700_v16  ;;  %v7701_v18 = vunpack.i.l.bf16 %v7700_v16 }
 0x183   : > { %v7349_v20 = vpack.c.bf16 %v7702_v17, %v7701_v18 }
 0x184   : > { %v7705_v21 = vpop.permute.xlu0 %7704  ;;  %v527_v30 = vpop.permute.xlu1 %526 }
 0x185   : > { %v7707_v22 = vunpack.i.h.bf16 %v7705_v21  ;;  %v7706_v23 = vunpack.i.l.bf16 %v7705_v21  ;;  %7351 = vmatprep.subr.msk.bf16.mxu1 %vm8203_vm2, %v7349_v20 }
 0x186   : > { %7354 = vmatpush3.bf16.xpose.msk.msra.mxu1 %vm8203_vm2, %v7349_v20 }
 0x187   : > { %v7359_v24 = vpack.c.bf16 %v7707_v22, %v7706_v23 }
 0x188   : > { %v7710_v25 = vpop.permute.xlu0 %7709  ;;  %v888_v31 = vpop.permute.xlu1 %887 }
 0x189   : > { %v7712_v27 = vunpack.i.h.bf16 %v7710_v25  ;;  %v7711_v28 = vunpack.i.l.bf16 %v7710_v25  ;;  %7361 = vmatprep.subr.msk.bf16.mxu1 %vm8203_vm2, %v7359_v24 }
 0x18b   : > { %v7369_v29 = vpack.c.bf16 %v7712_v27, %v7711_v28 }
 0x18c   : > { %v890_v32 = vpop.permute.xlu0 %889 }
 0x18d   : > { %6894 = vmatmul.mubr.msk.f32.vlgmr.msra.gmra.mrb[0].mxu1 %vm327_vm1, %v8189_v15 }
 0x18e   : > { %7364 = vmatpush3.bf16.xpose.msk.msra.mxu1 %vm8203_vm2, %v7359_v24  ;;  %6907 = vmatprep.mubr.msk.f32.mxu1 %vm327_vm1, %v525_v26 }
 0x18f   : > { %7371 = vmatprep.subr.msk.bf16.mxu1 %vm8203_vm2, %v7369_v29 }
 0x195   : > { %6908 = vmatmul.mubr.msk.f32.vlgmr.msra.gmra.mrb[2].mxu1 %vm327_vm1, %v527_v30 }
 0x196   : > { %7374 = vmatpush3.bf16.xpose.msk.msra.mxu1 %vm8203_vm2, %v7369_v29  ;;  %6931 = vmatprep.mubr.msk.f32.mxu1 %vm327_vm1, %v888_v31 }
 0x19d   : > { %6932 = vmatmul.mubr.msk.f32.vlgmr.msra.gmra.mrb[4].mxu1 %vm327_vm1, %v890_v32 }
 0x260   : > { %v6895_v33 = vpop.f32.mrb[0].mxu1 }
 0x261   : > { %v404_v34 = vpop.f32.mrb[1].mxu1  ;;  %v417_v35 = vsel %vm413_vm3, %v6895_v33, -inf }
 0x262   : > { %418 = vmax.xlane.f32.xlu0 %v417_v35  ;;  %v414_v36 = vsel %vm413_vm3, %v404_v34, -inf }
 0x263   : > { %415 = vmax.xlane.f32.xlu1 %v414_v36 }
 0x268   : > { %v6909_v37 = vpop.f32.mrb[2].mxu1 }
 0x269   : > { %v606_v38 = vpop.f32.mrb[3].mxu1  ;;  %v618_v39 = vsel %vm413_vm3, %v6909_v37, -inf }
 0x26a   : > { %619 = vmax.xlane.f32.xlu1 %v618_v39  ;;  %v615_v40 = vsel %vm413_vm3, %v606_v38, -inf }
 0x26b   : > { %616 = vmax.xlane.f32.xlu0 %v615_v40  ;;  %v724_v40 = vld [vmem:[#allocation2 + $0x28] sm:$0xff] }
 0x270   : > { %v8229_v41 = vpop.f32.mrb[4].mxu1 }
 0x271   : > { %v8231_v42 = vpop.f32.mrb[5].mxu1  ;;  %v981_v0 = vsel %vm413_vm3, %v8229_v41, -inf }
 0x272   : > { %v978_v63 = vsel %vm413_vm3, %v8231_v42, -inf }
 0x2ef   : > { %v419_v43 = vpop.xlane.xlu0 %418 }
 0x2f0   : > { %v421_v44 = vsub.f32 %v6895_v33, %v419_v43  ;;  %v416_v45 = vpop.xlane.xlu1 %415  ;;  %v523_v43 = vld [vmem:[#allocation2 + $0x20] sm:$0xff] }
 0x2f1   : > { %v420_v46 = vsub.f32 %v404_v34, %v416_v45 }
 0x2f2   : > { %v424_v47 = vmul.f32 1.442695, %v421_v44 }
 0x2f3   : > { %v422_v48 = vmul.f32 1.442695, %v420_v46 }
 0x2f4   : > { %7823 = vpow2.f32 %v424_v47 }
 0x2f5   : > { %7825 = vpow2.f32 %v422_v48 }
 0x2f7   : > { %v620_v49 = vpop.xlane.xlu1 %619 }
 0x2f8   : > { %v622_v50 = vsub.f32 %v6909_v37, %v620_v49  ;;  %v617_v51 = vpop.xlane.xlu0 %616 }
 0x2f9   : > { %v621_v52 = vsub.f32 %v606_v38, %v617_v51 }
 0x2fa   : > { %v625_v53 = vmul.f32 1.442695, %v622_v50 }
 0x2fb   : > { %v623_v54 = vmul.f32 1.442695, %v621_v52 }
 0x2fc   : > { %7827 = vpow2.f32 %v625_v53 }
 0x2fd   : > { %7829 = vpow2.f32 %v623_v54 }
 0x2fe   : > { %v7824_v55 = vpop.eup %7823 }
 0x2ff   : > { %v7826_v56 = vpop.eup %7825  ;;  %v429_v57 = vsel %vm413_vm3, %v7824_v55, 0.0 }
 0x300   : > { %430 = vadd.xlane.f32.xlu1 %v429_v57  ;;  %v426_v58 = vsel %vm413_vm3, %v7826_v56, 0.0 }
 0x301   : > { %427 = vadd.xlane.f32.xlu0 %v426_v58 }
 0x306   : > { %v7828_v59 = vpop.eup %7827 }
 0x307   : > { %v7830_v60 = vpop.eup %7829  ;;  %v630_v61 = vsel %vm413_vm3, %v7828_v59, 0.0 }
 0x308   : > { %631 = vadd.xlane.f32.xlu1 %v630_v61  ;;  %v627_v62 = vsel %vm413_vm3, %v7830_v60, 0.0 }
 0x309   : > { %628 = vadd.xlane.f32.xlu0 %v627_v62 }
 0x319   : > { %7719 = vrot.lane.b32.xlu1 %v8179_v13, %s8075_s20 }
 0x31d   : > { %7724 = vrot.lane.b32.xlu1 %v8179_v13, %s8076_s21 }
 0x31f   : > { %7714 = vrot.lane.b32.xlu0 %v8179_v13, %s8077_s22 }
 0x321   : > { %1173 = vrot.lane.b32.xlu1 %v8189_v15, %s8078_s23 }
 0x323   : > { %1171 = vrot.lane.b32.xlu0 %v8181_v14, %s8078_s23 }
 0x342   : > { %979 = vmax.xlane.f32.xlu0 %v978_v63 }
 0x345   : > { %982 = vmax.xlane.f32.xlu1 %v981_v0 }
 0x356   : > { %7729 = vrot.lane.b32.xlu1 %v8179_v13, %s8079_s24 }
 0x35a   : > { %7734 = vrot.lane.b32.xlu1 %v8179_v13, %s8080_s25 }
 0x38d   : > { %v431_v2 = vpop.xlane.xlu1 %430 }
 0x38e   : > { %v428_v1 = vpop.xlane.xlu0 %427 }
 0x38f   : > { %7831 = vrcp.f32 %v428_v1 }
 0x390   : > { %7833 = vrcp.f32 %v431_v2 }
 0x395   : > { %v632_v3 = vpop.xlane.xlu1 %631 }
 0x396   : > { %v629_v4 = vpop.xlane.xlu0 %628 }
 0x397   : > { %7835 = vrcp.f32 %v629_v4 }
 0x398   : > { %7837 = vrcp.f32 %v632_v3 }
 0x399   : > { %v7832_v6 = vpop.eup %7831  ;;  %v7720_v8 = vpop.permute.xlu1 %7719 }
 0x39a   : > { %v7715_v9 = vpop.permute.xlu0 %7714  ;;  %v434_v10 = vmul.f32 %v7832_v6, %v7826_v56  ;;  %v7722_v11 = vunpack.i.h.bf16 %v7720_v8  ;;  %v7721_v12 = vunpack.i.l.bf16 %v7720_v8  ;;  %v7834_v17 = vpop.eup %7833 }
 0x39b   : > { %v7717_v14 = vunpack.i.h.bf16 %v7715_v9  ;;  %v7716_v15 = vunpack.i.l.bf16 %v7715_v9  ;;  %v435_v25 = vmul.f32 %v7834_v17, %v7824_v55 }
 0x39c   : > { %6900 = vmatprep.mubr.msk.f32.mxu0 %vm413_vm3, %v434_v10  ;;  %v7365_v22 = vpack.c.bf16 %v7722_v11, %v7721_v12 }
 0x39d   : > { %v7725_v16 = vpop.permute.xlu1 %7724  ;;  %v7355_v13 = vpack.c.bf16 %v7717_v14, %v7716_v15 }
 0x39e   : > { %v7727_v18 = vunpack.i.h.bf16 %v7725_v16  ;;  %v7726_v20 = vunpack.i.l.bf16 %v7725_v16  ;;  %v1172_v21 = vpop.permute.xlu0 %1171  ;;  %v1371_v16 = vld [vmem:[#allocation2 + $0x38] sm:$0xff] }
 0x39f   : > { %7356 = vmatprep.subr.bf16.mxu0 %v7355_v13  ;;  %6950 = vmatprep.mubr.msk.f32.mxu1 %vm327_vm1, %v1172_v21 }
 0x3a0   : > { %v7379_v23 = vpack.c.bf16 %v7727_v18, %v7726_v20  ;;  %7358 = vmatpush3.bf16.msra.mxu0 %v7355_v13 }
 0x3a1   : > { %v7836_v24 = vpop.eup %7835  ;;  %7366 = vmatprep.subr.bf16.mxu0 %v7365_v22  ;;  %v1174_v29 = vpop.permute.xlu1 %1173 }
 0x3a2   : > { %v7838_v26 = vpop.eup %7837  ;;  %7381 = vmatprep.subr.msk.bf16.mxu1 %vm8203_vm2, %v7379_v23  ;;  %v635_v27 = vmul.f32 %v7836_v24, %v7830_v60  ;;  %v1087_v60 = vld [vmem:[#allocation2 + $0x30] sm:$0xff] }
 0x3a3   : > { %6901 = vmatmul.mubr.msk.f32.vlgmr.msra.gmra.mrb[2].mxu0 %vm413_vm3, %v435_v25  ;;  %7384 = vmatpush3.bf16.xpose.msk.msra.mxu1 %vm8203_vm2, %v7379_v23  ;;  %v636_v28 = vmul.f32 %v7838_v26, %v7828_v59  ;;  %v6473_v25 = vld [vmem:[%s8779_s2 + $0x1] ss:$0 sm:$0xff] }
 0x3a4   : > { %7368 = vmatpush3.bf16.msra.mxu0 %v7365_v22  ;;  %6914 = vmatprep.mubr.msk.f32.mxu0 %vm413_vm3, %v635_v27 }
 0x3a5   : > { %6917 = vmatprep.subr.mxu0 %v724_v40 }
 0x3a7   : > { %6915 = vmatmul.mubr.msk.f32.vlgmr.msra.gmra.mrb[4].mxu0 %vm413_vm3, %v636_v28 }
 0x3a8   : > { %6918 = vmatpush3.msra.mxu0 %v724_v40 }
 0x3a9   : > { %6922 = vmatprep.subr.mxu0 %v523_v43 }
 0x3aa   : > { %6951 = vmatmul.mubr.msk.f32.vlgmr.msra.gmra.mrb[6].mxu1 %vm327_vm1, %v1174_v29 }
 0x3cf   : > { %v980_v30 = vpop.xlane.xlu0 %979 }
 0x3d0   : > { %v984_v31 = vsub.f32 %v8231_v42, %v980_v30 }
 0x3d2   : > { %v986_v32 = vmul.f32 1.442695, %v984_v31  ;;  %v983_v33 = vpop.xlane.xlu1 %982 }
 0x3d3   : > { %v985_v34 = vsub.f32 %v8229_v41, %v983_v33 }
 0x3d4   : > { %7839 = vpow2.f32 %v986_v32 }
 0x3d5   : > { %v988_v35 = vmul.f32 1.442695, %v985_v34 }
 0x3d6   : > { %v7730_v44 = vpop.permute.xlu1 %7729 }
 0x3d7   : > { %7841 = vpow2.f32 %v988_v35  ;;  %v7732_v47 = vunpack.i.h.bf16 %v7730_v44  ;;  %v7731_v48 = vunpack.i.l.bf16 %v7730_v44  ;;  %v1506_v44 = vld [vmem:[#allocation2 + $0x48] sm:$0xff] }
 0x3d9   : > { %v7375_v51 = vpack.c.bf16 %v7732_v47, %v7731_v48 }
 0x3da   : > { %v7735_v56 = vpop.permute.xlu1 %7734 }
 0x3db   : > { %v7737_v61 = vunpack.i.h.bf16 %v7735_v56  ;;  %v7736_v62 = vunpack.i.l.bf16 %v7735_v56 }
 0x3dd   : > { %v7385_v0 = vpack.c.bf16 %v7737_v61, %v7736_v62 }
 0x3de   : > { %v7840_v36 = vpop.eup %7839 }
 0x3df   : > { %v990_v37 = vsel %vm413_vm3, %v7840_v36, 0.0 }
 0x3e0   : > { %991 = vadd.xlane.f32.xlu0 %v990_v37 }
 0x3e1   : > { %v7842_v38 = vpop.eup %7841 }
 0x3e2   : > { %v993_v39 = vsel %vm413_vm3, %v7842_v38, 0.0 }
 0x3e4   : > { %994 = vadd.xlane.f32.xlu0 %v993_v39 }
 0x46d   : > { %v992_v42 = vpop.xlane.xlu0 %991 }
 0x46e   : > { %7843 = vrcp.f32 %v992_v42 }
 0x471   : > { %v995_v41 = vpop.xlane.xlu0 %994 }
 0x472   : > { %7845 = vrcp.f32 %v995_v41 }
 0x476   : > { %v6902_v45 = vpop.f32.mrb[2].mxu0 }
 0x477   : > { %v514_v46 = vpop.f32.mrb[3].mxu0 }
 0x478   : > { %v7844_v55 = vpop.eup %7843 }
 0x479   : > { %v998_v59 = vmul.f32 %v7844_v55, %v7840_v36  ;;  %v6474_v55 = vld [vmem:[%s8779_s2 + $0x4] ss:$0 sm:$0xff] }
 0x47a   : > { %v6916_v49 = vpop.f32.mrb[4].mxu0 }
 0x47b   : > { %v715_v50 = vpop.f32.mrb[5].mxu0 }
 0x47c   : > { %6919 = vmatprep.mubr.msk.f32.mxu0 %vm327_vm1, %v715_v50  ;;  %v7846_v58 = vpop.eup %7845 }
 0x47d   : > { %6920 = vmatmul.mubr.msk.f32.vlgmr.msra.gmra.mrb[6].mxu0 %vm327_vm1, %v6916_v49  ;;  %v6952_v52 = vpop.f32.mrb[6].mxu1  ;;  %v999_v63 = vmul.f32 %v7846_v58, %v7842_v38 }
 0x47e   : > { %6923 = vmatpush3.msra.mxu0 %v523_v43  ;;  %6924 = vmatprep.mubr.msk.f32.mxu0 %vm327_vm1, %v514_v46  ;;  %v1253_v53 = vpop.f32.mrb[7].mxu1  ;;  %v1265_v57 = vsel %vm413_vm3, %v6952_v52, -inf  ;;  %v1508_v46 = vld [vmem:[#allocation2 + $0x58] sm:$0xff] }
 0x47f   : > { %7376 = vmatprep.subr.bf16.mxu0 %v7375_v51  ;;  %v1262_v54 = vsel %vm413_vm3, %v1253_v53, -inf }
 0x480   : > { %1263 = vmax.xlane.f32.xlu0 %v1262_v54 }
 0x484   : > { %1266 = vmax.xlane.f32.xlu0 %v1265_v57  ;;  %v6475_v57 = vld [vmem:[%s8779_s2 + $0x5] ss:$0 sm:$0xff] }
 0x485   : > { %6925 = vmatmul.mubr.msk.f32.vlgmr.msra.gmra.mrb[6].mxu0 %vm327_vm1, %v6902_v45  ;;  %v1507_v45 = vld [vmem:[#allocation2 + $0x50] sm:$0xff] }
 0x486   : > { %7378 = vmatpush3.bf16.msra.mxu0 %v7375_v51  ;;  %6938 = vmatprep.mubr.msk.f32.mxu0 %vm413_vm3, %v998_v59  ;;  %v7393_v47 = vpack.c.bf16 %v1508_v46, %v1507_v45 }
 0x487   : > { %6941 = vmatprep.subr.mxu0 %v1087_v60 }
 0x489   : > { %6939 = vmatmul.mubr.msk.f32.vlgmr.msra.gmra.mrb[8].mxu0 %vm413_vm3, %v999_v63 }
 0x48a   : > { %6942 = vmatpush3.msra.mxu0 %v1087_v60 }
 0x48b   : > { %7386 = vmatprep.subr.bf16.mxu0 %v7385_v0 }
 0x50d   : > { %v1264_v1 = vpop.xlane.xlu0 %1263 }
 0x50e   : > { %v1268_v2 = vsub.f32 %v1253_v53, %v1264_v1  ;;  %v1648_v1 = vld [vmem:[#allocation2 + $0x68] sm:$0xff] }
 0x510   : > { %v1270_v3 = vmul.f32 1.442695, %v1268_v2 }
 0x511   : > { %v1267_v4 = vpop.xlane.xlu0 %1266 }
 0x512   : > { %7847 = vpow2.f32 %v1270_v3  ;;  %v1269_v6 = vsub.f32 %v6952_v52, %v1267_v4  ;;  %v1649_v3 = vld [vmem:[#allocation2 + $0x70] sm:$0xff]  ;;  %v1650_v4 = vld [vmem:[#allocation2 + $0x78] sm:$0xff] }
 0x514   : > { %v1272_v8 = vmul.f32 1.442695, %v1269_v6  ;;  %v7401_v6 = vpack.c.bf16 %v1650_v4, %v1649_v3 }
 0x516   : > { %7849 = vpow2.f32 %v1272_v8  ;;  %v1651_v8 = vld [vmem:[#allocation2 + $0x80] sm:$0xff] }
 0x51c   : > { %v7848_v9 = vpop.eup %7847 }
 0x51d   : > { %v1274_v10 = vsel %vm413_vm3, %v7848_v9, 0.0 }
 0x51e   : > { %1275 = vadd.xlane.f32.xlu0 %v1274_v10 }
 0x520   : > { %v7850_v11 = vpop.eup %7849 }
 0x521   : > { %v1277_v12 = vsel %vm413_vm3, %v7850_v11, 0.0 }
 0x522   : > { %1278 = vadd.xlane.f32.xlu0 %v1277_v12  ;;  %v1654_v12 = vld [vmem:[#allocation2 + $0x98] sm:$0xff] }
 0x55c   : > { %v6940_v14 = vpop.f32.mrb[8].mxu0 }
 0x55d   : > { %v1078_v15 = vpop.f32.mrb[9].mxu0 }
 0x55e   : > { %6943 = vmatprep.mubr.msk.f32.mxu0 %vm327_vm1, %v1078_v15  ;;  %v6476_v15 = vld [vmem:[%s8779_s2 + $0x2] ss:$0 sm:$0xff] }
 0x55f   : > { %6944 = vmatmul.mubr.msk.f32.vlgmr.msra.gmra.mrb[6].mxu0 %vm327_vm1, %v6940_v14 }
 0x560   : > { %7388 = vmatpush3.bf16.msra.mxu0 %v7385_v0  ;;  %v1647_v0 = vld [vmem:[#allocation2 + $0x60] sm:$0xff] }
 0x561   : > { %6960 = vmatprep.subr.mxu0 %v1371_v16  ;;  %v7397_v2 = vpack.c.bf16 %v1648_v1, %v1647_v0 }
 0x5ab   : > { %v1276_v13 = vpop.xlane.xlu0 %1275 }
 0x5ac   : > { %7851 = vrcp.f32 %v1276_v13 }
 0x5af   : > { %v1279_v17 = vpop.xlane.xlu0 %1278 }
 0x5b0   : > { %7853 = vrcp.f32 %v1279_v17 }
 0x5b6   : > { %v7852_v18 = vpop.eup %7851 }
 0x5b7   : > { %v1282_v20 = vmul.f32 %v7852_v18, %v7848_v9  ;;  %v1652_v9 = vld [vmem:[#allocation2 + $0x88] sm:$0xff] }
 0x5b8   : > { %v7405_v10 = vpack.c.bf16 %v1652_v9, %v1651_v8  ;;  %v6479_v9 = vld [vmem:[%s8779_s2 + $0x3] ss:$0 sm:$0xff] }
 0x5b9   : > { %6957 = vmatprep.mubr.msk.f32.mxu0 %vm413_vm3, %v1282_v20 }
 0x5ba   : > { %v7854_v21 = vpop.eup %7853 }
 0x5bb   : > { %v1283_v22 = vmul.f32 %v7854_v21, %v7850_v11  ;;  %v1653_v11 = vld [vmem:[#allocation2 + $0x90] sm:$0xff] }
 0x5bc   : > { %v7409_v14 = vpack.c.bf16 %v1654_v12, %v1653_v11 }
 0x5bd   : > { %6958 = vmatmul.mubr.msk.f32.vlgmr.msra.gmra.mrb[10].mxu0 %vm413_vm3, %v1283_v22 }
 0x5be   : > { %6961 = vmatpush3.msra.mxu0 %v1371_v16 }
 0x5bf   : > { %7398 = vmatprep.subr.bf16.mxu0 %v7397_v2 }
 0x690   : > { %v6959_v23 = vpop.f32.mrb[10].mxu0 }
 0x691   : > { %v1362_v24 = vpop.f32.mrb[11].mxu0 }
 0x692   : > { %6962 = vmatprep.mubr.msk.f32.mxu0 %vm327_vm1, %v1362_v24 }
 0x693   : > { %6963 = vmatmul.mubr.msk.f32.vlgmr.msra.gmra.mrb[6].mxu0 %vm327_vm1, %v6959_v23 }
 0x694   : > { %7400 = vmatpush3.bf16.msra.mxu0 %v7397_v2 }
 0x695   : > { %7402 = vmatprep.subr.bf16.mxu0 %v7401_v6 }
 0x698   : > { %7404 = vmatpush3.bf16.msra.mxu0 %v7401_v6 }
 0x699   : > { %7406 = vmatprep.subr.bf16.mxu0 %v7405_v10 }
 0x69c   : > { %7408 = vmatpush3.bf16.msra.mxu0 %v7405_v10 }
 0x69d   : > { %7410 = vmatprep.subr.bf16.mxu0 %v7409_v14 }
 0x6a0   : > { %7412 = vmatpush3.bf16.msra.mxu0 %v7409_v14 }
 0x766   : > { %v6964_v26 = vpop.f32.mrb[6].mxu0 }
 0x767   : > { %v1461_v27 = vadd.f32 %v6964_v26, %v6473_v25  ;;  %v1444_v28 = vpop.f32.mrb[7].mxu0 }
 0x768   : > { %v1460_v29 = vadd.f32 %v6473_v25, %v1444_v28 }
 0x769   : > { %v1463_v30 = vadd.f32 %v1461_v27, %v8172_v7 }
 0x76a   : > { %v1462_v31 = vadd.f32 %v1460_v29, %v8168_v5  ;;  %v1505_v5 = vld [vmem:[#allocation2 + $0x40] sm:$0xff] }
 0x76b   : > { %v1469_v32 = vsel %vm237_vm0, %v1463_v30, 0.0  ;;  %v7389_v41 = vpack.c.bf16 %v1506_v44, %v1505_v5 }
 0x76c   : > { %1470 = vadd.xlane.f32.xlu1 %v1469_v32  ;;  %v1466_v33 = vsel %vm237_vm0, %v1462_v31, 0.0 }
 0x76d   : > { %1467 = vadd.xlane.f32.xlu0 %v1466_v33  ;;  %7390 = vmatprep.subr.bf16.mxu1 %v7389_v41 }
 0x76e   : > { %7392 = vmatpush3.bf16.msra.mxu1 %v7389_v41 }
 0x76f   : > { %7394 = vmatprep.subr.bf16.mxu1 %v7393_v47 }
 0x772   : > { %7396 = vmatpush3.bf16.msra.mxu1 %v7393_v47 }
 0x7f9   : > { %v1471_v34 = vpop.xlane.xlu1 %1470 }
 0x7fa   : > { %v1474_v35 = vmul.f32 0.03125, %v1471_v34  ;;  %v1468_v36 = vpop.xlane.xlu0 %1467 }
 0x7fb   : > { %v1473_v37 = vmul.f32 0.03125, %v1468_v36 }
 0x7fc   : > { %v1476_v38 = vsub.f32 %v1463_v30, %v1474_v35 }
 0x7fd   : > { %v1475_v39 = vsub.f32 %v1462_v31, %v1473_v37 }
 0x7fe   : > { %v1478_v42 = vmul.f32 %v1476_v38, %v1476_v38 }
 0x7ff   : > { %v1477_v40 = vmul.f32 %v1475_v39, %v1475_v39 }
 0x800   : > { %v1482_v7 = vsel %vm237_vm0, %v1478_v42, 0.0 }
 0x801   : > { %v1479_v43 = vsel %vm237_vm0, %v1477_v40, 0.0 }
 0x802   : > { %1480 = vadd.xlane.f32.xlu0 %v1479_v43 }
 0x806   : > { %1483 = vadd.xlane.f32.xlu0 %v1482_v7 }
 0x88f   : > { %v1481_v48 = vpop.xlane.xlu0 %1480 }
 0x890   : > { %v1485_v49 = vmul.f32 0.03125, %v1481_v48 }
 0x892   : > { %v1487_v50 = vadd.f32 1e-05, %v1485_v49 }
 0x893   : > { %v1484_v51 = vpop.xlane.xlu0 %1483 }
 0x894   : > { %7855 = vrsqrt.f32 %v1487_v50  ;;  %v1486_v52 = vmul.f32 0.03125, %v1484_v51 }
 0x896   : > { %v1488_v53 = vadd.f32 1e-05, %v1486_v52 }
 0x898   : > { %7857 = vrsqrt.f32 %v1488_v53 }
 0x89e   : > { %v7856_v54 = vpop.eup %7855 }
 0x89f   : > { %v1491_v56 = vmul.f32 %v7856_v54, %v1475_v39 }
 0x8a1   : > { %v1497_v58 = vmul.f32 %v6474_v55, %v1491_v56 }
 0x8a2   : > { %v7858_v59 = vpop.eup %7857 }
 0x8a3   : > { %v1492_v60 = vmul.f32 %v7858_v59, %v1476_v38  ;;  %v8300_v61 = vadd.f32 %v6475_v57, %v1497_v58 }
 0x8a5   : > { %v1498_v62 = vmul.f32 %v6474_v55, %v1492_v60  ;;  %6973 = vmatprep.mubr.msk.f32.mxu1 %vm237_vm0, %v8300_v61 }
 0x8a7   : > { %v8304_v63 = vadd.f32 %v6475_v57, %v1498_v62  ;;  %v8081_v57 = vmov -1.0  }
 0x8a9   : > { %6974 = vmatmul.mubr.msk.f32.vlgmr.msra.gmra.mrb[8].mxu1 %vm237_vm0, %v8304_v63 }
 0x97c   : > { %v6975_v16 = vpop.f32.mrb[8].mxu1 }
 0x97d   : > { %v1592_v13 = vadd.f32 %v6975_v16, %v6476_v15  ;;  %v1586_v17 = vpop.f32.mrb[9].mxu1 }
 0x97e   : > { %v1587_v18 = vadd.f32 %v6476_v15, %v1586_v17 }
 0x97f   : > { %v1598_v20 = vmul.f32 0.70710677, %v1592_v13  ;;  %v1596_v4 = vmul.f32 0.5, %v1592_v13 }
 0x980   : > { %v1597_v21 = vmul.f32 0.70710677, %v1587_v18  ;;  %v1595_v2 = vmul.f32 0.5, %v1587_v18 }
 0x981   : > { %v1604_v22 = vand.u32 2147483647, %v1598_v20  ;;  %vm1600_vm4 = vcmp.ge.f32.partialorder %v1598_v20, 0.0 }
 0x982   : > { %v1603_v23 = vand.u32 2147483647, %v1597_v21  ;;  %vm1599_vm5 = vcmp.ge.f32.partialorder %v1597_v21, 0.0  ;;  %v1602_v58 = vsel %vm1600_vm4, 1.0, %v8081_v57 }
 0x983   : > { %v1606_v24 = vmul.f32 0.3275911, %v1604_v22  ;;  %v1630_v28 = vsub.f32 0.0, %v1604_v22  ;;  %v1601_v62 = vsel %vm1599_vm5, 1.0, %v8081_v57 }
 0x984   : > { %v1605_v25 = vmul.f32 0.3275911, %v1603_v23  ;;  %v1629_v29 = vsub.f32 0.0, %v1603_v23 }
 0x985   : > { %v1608_v26 = vadd.f32 1.0, %v1606_v24  ;;  %v1632_v31 = vmul.f32 %v1630_v28, %v1604_v22  ;;  %v1784_v28 = vld [vmem:[#allocation2 + $0xa0] sm:$0xff] }
 0x986   : > { %v1607_v27 = vadd.f32 1.0, %v1605_v25  ;;  %v1631_v34 = vmul.f32 %v1629_v29, %v1603_v23 }
 0x987   : > { %7859 = vrcp.f32 %v1608_v26  ;;  %v1635_v37 = vmul.f32 1.442695, %v1632_v31  ;;  %v1787_v31 = vld [vmem:[#allocation2 + $0xb8] sm:$0xff] }
 0x988   : > { %7861 = vrcp.f32 %v1607_v27  ;;  %v1633_v40 = vmul.f32 1.442695, %v1631_v34 }
 0x989   : > { %7863 = vpow2.f32 %v1635_v37 }
 0x98a   : > { %7865 = vpow2.f32 %v1633_v40  ;;  %v6482_v40 = vld [vmem:[%s8779_s2 + $0x6] ss:$0 sm:$0xff] }
 0x991   : > { %v7860_v30 = vpop.eup %7859 }
 0x992   : > { %v7862_v32 = vpop.eup %7861  ;;  %v1612_v33 = vmul.f32 1.0614054, %v7860_v30 }
 0x993   : > { %v1611_v35 = vmul.f32 1.0614054, %v7862_v32  ;;  %v7864_v51 = vpop.eup %7863 }
 0x994   : > { %v1614_v36 = vadd.f32 -1.4531521, %v1612_v33  ;;  %v7866_v53 = vpop.eup %7865 }
 0x995   : > { %v1613_v38 = vadd.f32 -1.4531521, %v1611_v35 }
 0x996   : > { %v1616_v39 = vmul.f32 %v7860_v30, %v1614_v36 }
 0x997   : > { %v1615_v43 = vmul.f32 %v7862_v32, %v1613_v38 }
 0x998   : > { %v1618_v42 = vadd.f32 1.4214138, %v1616_v39 }
 0x999   : > { %v1617_v7 = vadd.f32 1.4214138, %v1615_v43 }
 0x99a   : > { %v1620_v5 = vmul.f32 %v7860_v30, %v1618_v42  ;;  %v6483_v42 = vld [vmem:[%s8779_s2 + $0x7] ss:$0 sm:$0xff] }
 0x99b   : > { %v1619_v44 = vmul.f32 %v7862_v32, %v1617_v7 }
 0x99c   : > { %v1622_v45 = vadd.f32 -0.28449672, %v1620_v5 }
 0x99d   : > { %v1621_v41 = vadd.f32 -0.28449672, %v1619_v44 }
 0x99e   : > { %v1624_v46 = vmul.f32 %v7860_v30, %v1622_v45 }
 0x99f   : > { %v1623_v47 = vmul.f32 %v7862_v32, %v1621_v41 }
 0x9a0   : > { %v1626_v48 = vadd.f32 0.2548296, %v1624_v46 }
 0x9a1   : > { %v1625_v49 = vadd.f32 0.2548296, %v1623_v47  ;;  %v1926_v47 = vld [vmem:[#allocation2 + $0xc0] sm:$0xff] }
 0x9a2   : > { %v1628_v50 = vmul.f32 %v7860_v30, %v1626_v48  ;;  %v1786_v30 = vld [vmem:[#allocation2 + $0xb0] sm:$0xff]  ;;  %v1927_v48 = vld [vmem:[#allocation2 + $0xc8] sm:$0xff] }
 0x9a3   : > { %v1627_v52 = vmul.f32 %v7862_v32, %v1625_v49  ;;  %v7417_v32 = vpack.c.bf16 %v1787_v31, %v1786_v30  ;;  %v7421_v49 = vpack.c.bf16 %v1927_v48, %v1926_v47  ;;  %v6487_v48 = vld [vmem:[%s8779_s2 + $0x9] ss:$0 sm:$0xff] }
 0x9a4   : > { %v1638_v54 = vmul.f32 %v7864_v51, %v1628_v50  ;;  %v1928_v50 = vld [vmem:[#allocation2 + $0xd0] sm:$0xff]  ;;  %v1929_v51 = vld [vmem:[#allocation2 + $0xd8] sm:$0xff] }
 0x9a5   : > { %v1637_v55 = vmul.f32 %v7866_v53, %v1627_v52  ;;  %v7425_v52 = vpack.c.bf16 %v1929_v51, %v1928_v50  ;;  %v6484_v53 = vld [vmem:[%s8779_s2 + $0x8] ss:$0 sm:$0xff] }
 0x9a6   : > { %v1640_v56 = vsub.f32 1.0, %v1638_v54 }
 0x9a7   : > { %v1639_v59 = vsub.f32 1.0, %v1637_v55 }
 0x9a8   : > { %v1642_v60 = vmul.f32 %v1640_v56, %v1602_v58 }
 0x9a9   : > { %v1641_v0 = vmul.f32 %v1639_v59, %v1601_v62 }
 0x9aa   : > { %v1644_v1 = vadd.f32 1.0, %v1642_v60 }
 0x9ab   : > { %v1643_v3 = vadd.f32 1.0, %v1641_v0 }
 0x9ac   : > { %v1646_v8 = vmul.f32 %v1644_v1, %v1596_v4 }
 0x9ad   : > { %v1645_v6 = vmul.f32 %v1643_v3, %v1595_v2 }
 0x9af   : > { %6992 = vmatprep.mubr.msk.f32.mxu0 %vm1660_vm6, %v1645_v6 }
 0x9b0   : > { %6993 = vmatmul.mubr.msk.f32.vlgmr.msra.gmra.mrb[12].mxu0 %vm1660_vm6, %v1646_v8 }
 0xa83   : > { %v6994_v10 = vpop.f32.mrb[12].mxu0 }
 0xa84   : > { %v1733_v11 = vpop.f32.mrb[13].mxu0  ;;  %v1739_v12 = vadd.f32 %v6994_v10, %v6479_v9 }
 0xa85   : > { %v1734_v14 = vadd.f32 %v6479_v9, %v1733_v11 }
 0xa86   : > { %v1743_v13 = vadd.f32 %v1739_v12, %v8304_v63  ;;  %v1785_v63 = vld [vmem:[#allocation2 + $0xa8] sm:$0xff] }
 0xa87   : > { %v1742_v15 = vadd.f32 %v1734_v14, %v8300_v61  ;;  %v7413_v29 = vpack.c.bf16 %v1785_v63, %v1784_v28 }
 0xa88   : > { %v1749_v17 = vsel %vm237_vm0, %v1743_v13, 0.0 }
 0xa89   : > { %v1746_v16 = vsel %vm237_vm0, %v1742_v15, 0.0  ;;  %7414 = vmatprep.subr.bf16.mxu1 %v7413_v29 }
 0xa8a   : > { %1747 = vadd.xlane.f32.xlu0 %v1746_v16  ;;  %7416 = vmatpush3.bf16.msra.mxu1 %v7413_v29 }
 0xa8b   : > { %7418 = vmatprep.subr.bf16.mxu1 %v7417_v32 }
 0xa8e   : > { %1750 = vadd.xlane.f32.xlu0 %v1749_v17  ;;  %7420 = vmatpush3.bf16.msra.mxu1 %v7417_v32 }
 0xa8f   : > { %7422 = vmatprep.subr.bf16.mxu1 %v7421_v49 }
 0xb17   : > { %v1748_v18 = vpop.xlane.xlu0 %1747 }
 0xb18   : > { %v1752_v20 = vmul.f32 0.03125, %v1748_v18 }
 0xb1a   : > { %v1754_v21 = vsub.f32 %v1742_v15, %v1752_v20 }
 0xb1b   : > { %v1751_v22 = vpop.xlane.xlu0 %1750 }
 0xb1c   : > { %v1753_v23 = vmul.f32 0.03125, %v1751_v22  ;;  %v1756_v24 = vmul.f32 %v1754_v21, %v1754_v21 }
 0xb1e   : > { %v1755_v25 = vsub.f32 %v1743_v13, %v1753_v23  ;;  %v1758_v26 = vsel %vm237_vm0, %v1756_v24, 0.0 }
 0xb1f   : > { %1759 = vadd.xlane.f32.xlu0 %v1758_v26 }
 0xb20   : > { %v1757_v27 = vmul.f32 %v1755_v25, %v1755_v25 }
 0xb22   : > { %v1761_v61 = vsel %vm237_vm0, %v1757_v27, 0.0 }
 0xb23   : > { %1762 = vadd.xlane.f32.xlu0 %v1761_v61 }
 0xbac   : > { %v1760_v33 = vpop.xlane.xlu0 %1759 }
 0xbad   : > { %v1764_v34 = vmul.f32 0.03125, %v1760_v33 }
 0xbaf   : > { %v1766_v35 = vadd.f32 1e-05, %v1764_v34 }
 0xbb0   : > { %v1763_v36 = vpop.xlane.xlu0 %1762 }
 0xbb1   : > { %7867 = vrsqrt.f32 %v1766_v35  ;;  %v1765_v37 = vmul.f32 0.03125, %v1763_v36 }
 0xbb3   : > { %v1767_v38 = vadd.f32 1e-05, %v1765_v37 }
 0xbb5   : > { %7869 = vrsqrt.f32 %v1767_v38 }
 0xbbb   : > { %v7868_v39 = vpop.eup %7867 }
 0xbbc   : > { %v1770_v43 = vmul.f32 %v7868_v39, %v1754_v21 }
 0xbbe   : > { %v1776_v7 = vmul.f32 %v6482_v40, %v1770_v43 }
 0xbbf   : > { %v7870_v5 = vpop.eup %7869 }
 0xbc0   : > { %v1771_v44 = vmul.f32 %v7870_v5, %v1755_v25  ;;  %v8330_v45 = vadd.f32 %v6483_v42, %v1776_v7 }
 0xbc2   : > { %v1777_v41 = vmul.f32 %v6482_v40, %v1771_v44  ;;  %7003 = vmatprep.mubr.msk.f32.mxu1 %vm237_vm0, %v8330_v45 }
 0xbc4   : > { %v8334_v46 = vadd.f32 %v6483_v42, %v1777_v41 }
 0xbc6   : > { %7004 = vmatmul.mubr.msk.f32.vlgmr.msra.gmra.mrb[10].mxu1 %vm237_vm0, %v8334_v46 }
 0xbc7   : > { %7424 = vmatpush3.bf16.msra.mxu1 %v7421_v49 }
 0xbc8   : > { %7426 = vmatprep.subr.bf16.mxu1 %v7425_v52 }
 0xbcb   : > { %7428 = vmatpush3.bf16.msra.mxu1 %v7425_v52 }
 0xc99   : > { %v7005_v54 = vpop.f32.mrb[10].mxu1 }
 0xc9a   : > { %v1871_v55 = vadd.f32 %v7005_v54, %v6484_v53  ;;  %v1865_v56 = vpop.f32.mrb[11].mxu1 }
 0xc9b   : > { %v1866_v58 = vadd.f32 %v6484_v53, %v1865_v56 }
 0xc9c   : > { %v1877_v59 = vmul.f32 0.70710677, %v1871_v55  ;;  %v1875_v44 = vmul.f32 0.5, %v1871_v55 }
 0xc9d   : > { %v1876_v60 = vmul.f32 0.70710677, %v1866_v58  ;;  %v1874_v7 = vmul.f32 0.5, %v1866_v58 }
 0xc9e   : > { %v1883_v62 = vand.u32 2147483647, %v1877_v59  ;;  %vm1879_vm7 = vcmp.ge.f32.partialorder %v1877_v59, 0.0 }
 0xc9f   : > { %v1882_v0 = vand.u32 2147483647, %v1876_v60  ;;  %vm1878_vm8 = vcmp.ge.f32.partialorder %v1876_v60, 0.0  ;;  %v1881_v37 = vsel %vm1879_vm7, 1.0, %v8081_v57 }
 0xca0   : > { %v1885_v1 = vmul.f32 0.3275911, %v1883_v62  ;;  %v1909_v6 = vsub.f32 0.0, %v1883_v62  ;;  %v1880_v40 = vsel %vm1878_vm8, 1.0, %v8081_v57 }
 0xca1   : > { %v1884_v2 = vmul.f32 0.3275911, %v1882_v0  ;;  %v1908_v8 = vsub.f32 0.0, %v1882_v0 }
 0xca2   : > { %v1887_v3 = vadd.f32 1.0, %v1885_v1  ;;  %v1911_v10 = vmul.f32 %v1909_v6, %v1883_v62 }
 0xca3   : > { %v1886_v4 = vadd.f32 1.0, %v1884_v2  ;;  %v1910_v14 = vmul.f32 %v1908_v8, %v1882_v0 }
 0xca4   : > { %7871 = vrcp.f32 %v1887_v3  ;;  %v1914_v13 = vmul.f32 1.442695, %v1911_v10 }
 0xca5   : > { %7873 = vrcp.f32 %v1886_v4  ;;  %v1912_v20 = vmul.f32 1.442695, %v1910_v14 }
 0xca6   : > { %7875 = vpow2.f32 %v1914_v13 }
 0xca7   : > { %7877 = vpow2.f32 %v1912_v20 }
 0xcae   : > { %v7872_v9 = vpop.eup %7871 }
 0xcaf   : > { %v7874_v11 = vpop.eup %7873  ;;  %v1891_v12 = vmul.f32 1.0614054, %v7872_v9 }
 0xcb0   : > { %v1890_v15 = vmul.f32 1.0614054, %v7874_v11  ;;  %v7876_v31 = vpop.eup %7875 }
 0xcb1   : > { %v1893_v16 = vadd.f32 -1.4531521, %v1891_v12  ;;  %v7878_v33 = vpop.eup %7877 }
 0xcb2   : > { %v1892_v17 = vadd.f32 -1.4531521, %v1890_v15 }
 0xcb3   : > { %v1895_v18 = vmul.f32 %v7872_v9, %v1893_v16 }
 0xcb4   : > { %v1894_v21 = vmul.f32 %v7874_v11, %v1892_v17 }
 0xcb5   : > { %v1897_v22 = vadd.f32 1.4214138, %v1895_v18 }
 0xcb6   : > { %v1896_v23 = vadd.f32 1.4214138, %v1894_v21 }
 0xcb7   : > { %v1899_v24 = vmul.f32 %v7872_v9, %v1897_v22 }
 0xcb8   : > { %v1898_v25 = vmul.f32 %v7874_v11, %v1896_v23 }
 0xcb9   : > { %v1901_v26 = vadd.f32 -0.28449672, %v1899_v24 }
 0xcba   : > { %v1900_v27 = vadd.f32 -0.28449672, %v1898_v25 }
 0xcbb   : > { %v1903_v61 = vmul.f32 %v7872_v9, %v1901_v26 }
 0xcbc   : > { %v1902_v28 = vmul.f32 %v7874_v11, %v1900_v27 }
 0xcbd   : > { %v1905_v63 = vadd.f32 0.2548296, %v1903_v61 }
 0xcbe   : > { %v1904_v29 = vadd.f32 0.2548296, %v1902_v28 }
 0xcbf   : > { %v1907_v30 = vmul.f32 %v7872_v9, %v1905_v63 }
 0xcc0   : > { %v1906_v32 = vmul.f32 %v7874_v11, %v1904_v29 }
 0xcc1   : > { %v1917_v34 = vmul.f32 %v7876_v31, %v1907_v30 }
 0xcc2   : > { %v1916_v35 = vmul.f32 %v7878_v33, %v1906_v32 }
 0xcc3   : > { %v1919_v36 = vsub.f32 1.0, %v1917_v34 }
 0xcc4   : > { %v1918_v38 = vsub.f32 1.0, %v1916_v35 }
 0xcc5   : > { %v1921_v39 = vmul.f32 %v1919_v36, %v1881_v37 }
 0xcc6   : > { %v1920_v43 = vmul.f32 %v1918_v38, %v1880_v40 }
 0xcc7   : > { %v1923_v42 = vadd.f32 1.0, %v1921_v39 }
 0xcc8   : > { %v1922_v5 = vadd.f32 1.0, %v1920_v43 }
 0xcc9   : > { %v8345_v47 = vmul.f32 %v1923_v42, %v1875_v44 }
 0xcca   : > { %v8343_v41 = vmul.f32 %v1922_v5, %v1874_v7 }
 0xccc   : > { %7014 = vmatprep.mubr.msk.f32.mxu1 %vm237_vm0, %v8343_v41 }
 0xccd   : > { %7015 = vmatmul.mubr.msk.f32.vlgmr.msra.gmra.mrb[12].mxu1 %vm237_vm0, %v8345_v47 }
 0xda0   : > { %v7016_v49 = vpop.f32.mrb[12].mxu1 }
 0xda1   : > { %v2013_v50 = vadd.f32 %v7016_v49, %v6487_v48  ;;  %v2007_v51 = vpop.f32.mrb[13].mxu1 }
 0xda2   : > { %v2008_v52 = vadd.f32 %v6487_v48, %v2007_v51 }
 0xda3   : > { %v8366_v60 = vmul.f32 0.35355338, %v2013_v50 }
 0xda4   : > { %v8354_v53 = vpack.i.bf16 %v2013_v50, %v2008_v52  ;;  %v8356_v54 = vmul.f32 0.35355338, %v2008_v52 }
 0xda6   : > { %7739 = vrot.lane.b32.xlu0 %v8354_v53, %s8070_s13  ;;  %7021 = vmatprep.mubr.msk.f32.mxu0 %vm327_vm1, %v8356_v54 }
 0xe18   : > { %v7740_v55 = vpop.permute.xlu0 %7739 }
 0xe19   : > { %v7742_v56 = vunpack.i.h.bf16 %v7740_v55  ;;  %v7741_v58 = vunpack.i.l.bf16 %v7740_v55 }
 0xe1b   : > { %v7429_v59 = vpack.c.bf16 %v7742_v56, %v7741_v58 }
 0xe1d   : > { %7431 = vmatprep.subr.msk.bf16.mxu0 %vm8203_vm2, %v7429_v59 }
 0xe1e   : > { %7434 = vmatpush3.bf16.xpose.msk.msra.mxu0 %vm8203_vm2, %v7429_v59 }
 0xe25   : > { %7022 = vmatmul.mubr.msk.f32.vlgmr.msra.gmra.mrb[14].mxu0 %vm327_vm1, %v8366_v60 }
 0xef8   : > { %v7023_v62 = vpop.f32.mrb[14].mxu0 }
 0xef9   : > { %v2100_v0 = vpop.f32.mrb[15].mxu0  ;;  %v2112_v2 = vsel %vm413_vm3, %v7023_v62, -inf }
 0xefa   : > { %v2109_v1 = vsel %vm413_vm3, %v2100_v0, -inf }
 0xefb   : > { %2110 = vmax.xlane.f32.xlu1 %v2109_v1 }
 0xeff   : > { %2113 = vmax.xlane.f32.xlu1 %v2112_v2 }
 0xf10   : > { %7744 = vrot.lane.b32.xlu1 %v8354_v53, %s8077_s22 }
 0xf14   : > { %7749 = vrot.lane.b32.xlu1 %v8354_v53, %s8072_s17 }
 0xf18   : > { %2219 = vrot.lane.b32.xlu1 %v8356_v54, %s8071_s14 }
 0xf88   : > { %v2111_v3 = vpop.xlane.xlu1 %2110 }
 0xf89   : > { %v2115_v4 = vsub.f32 %v2100_v0, %v2111_v3 }
 0xf8b   : > { %v2117_v6 = vmul.f32 1.442695, %v2115_v4 }
 0xf8c   : > { %v2114_v8 = vpop.xlane.xlu1 %2113 }
 0xf8d   : > { %7879 = vpow2.f32 %v2117_v6  ;;  %v2116_v9 = vsub.f32 %v7023_v62, %v2114_v8 }
 0xf8f   : > { %v2119_v10 = vmul.f32 1.442695, %v2116_v9 }
 0xf90   : > { %v7745_v11 = vpop.permute.xlu1 %7744 }
 0xf91   : > { %7881 = vpow2.f32 %v2119_v10  ;;  %v7747_v12 = vunpack.i.h.bf16 %v7745_v11  ;;  %v7746_v14 = vunpack.i.l.bf16 %v7745_v11 }
 0xf93   : > { %v7435_v15 = vpack.c.bf16 %v7747_v12, %v7746_v14 }
 0xf94   : > { %v7750_v16 = vpop.permute.xlu1 %7749 }
 0xf95   : > { %v7752_v13 = vunpack.i.h.bf16 %v7750_v16  ;;  %v7751_v17 = vunpack.i.l.bf16 %v7750_v16  ;;  %7436 = vmatprep.subr.bf16.mxu1 %v7435_v15 }
 0xf96   : > { %7438 = vmatpush3.bf16.msra.mxu1 %v7435_v15 }
 0xf97   : > { %v7880_v18 = vpop.eup %7879  ;;  %v7439_v20 = vpack.c.bf16 %v7752_v13, %v7751_v17 }
 0xf98   : > { %v2121_v21 = vsel %vm413_vm3, %v7880_v18, 0.0  ;;  %v2220_v24 = vpop.permute.xlu1 %2219 }
 0xf99   : > { %2122 = vadd.xlane.f32.xlu1 %v2121_v21  ;;  %7441 = vmatprep.subr.msk.bf16.mxu1 %vm8203_vm2, %v7439_v20 }
 0xf9b   : > { %v7882_v22 = vpop.eup %7881 }
 0xf9c   : > { %v2124_v23 = vsel %vm413_vm3, %v7882_v22, 0.0 }
 0xf9d   : > { %2125 = vadd.xlane.f32.xlu0 %v2124_v23 }
 0xfaa   : > { %2221 = vrot.lane.b32.xlu1 %v8366_v60, %s8071_s14 }
 0xfae   : > { %7754 = vrot.lane.b32.xlu1 %v8354_v53, %s8073_s18 }
 0xfb2   : > { %2584 = vrot.lane.b32.xlu1 %v8366_v60, %s8074_s19 }
 0xfb3   : > { %2582 = vrot.lane.b32.xlu0 %v8356_v54, %s8074_s19 }
0x1026   : > { %v2123_v25 = vpop.xlane.xlu1 %2122 }
0x1027   : > { %7883 = vrcp.f32 %v2123_v25 }
0x102a   : > { %v2126_v26 = vpop.xlane.xlu0 %2125  ;;  %v2222_v27 = vpop.permute.xlu1 %2221 }
0x102b   : > { %7885 = vrcp.f32 %v2126_v26  ;;  %v2419_v26 = vld [vmem:[#allocation2 + $0xe8] sm:$0xff] }
0x102e   : > { %v7755_v28 = vpop.permute.xlu1 %7754  ;;  %v2583_v34 = vpop.permute.xlu0 %2582 }
0x102f   : > { %v7757_v29 = vunpack.i.h.bf16 %v7755_v28  ;;  %v7756_v30 = vunpack.i.l.bf16 %v7755_v28 }
0x1031   : > { %v7884_v61 = vpop.eup %7883  ;;  %v7449_v33 = vpack.c.bf16 %v7757_v29, %v7756_v30 }
0x1032   : > { %v2129_v63 = vmul.f32 %v7884_v61, %v7880_v18  ;;  %v2585_v35 = vpop.permute.xlu1 %2584 }
0x1034   : > { %7028 = vmatprep.mubr.msk.f32.mxu1 %vm413_vm3, %v2129_v63 }
0x1035   : > { %v7886_v31 = vpop.eup %7885 }
0x1036   : > { %v2130_v32 = vmul.f32 %v7886_v31, %v7882_v22 }
0x1038   : > { %7029 = vmatmul.mubr.msk.f32.vlgmr.msra.gmra.mrb[14].mxu1 %vm413_vm3, %v2130_v32 }
0x1039   : > { %7444 = vmatpush3.bf16.xpose.msk.msra.mxu1 %vm8203_vm2, %v7439_v20  ;;  %7035 = vmatprep.mubr.msk.f32.mxu1 %vm327_vm1, %v2220_v24 }
0x103a   : > { %7451 = vmatprep.subr.msk.bf16.mxu1 %vm8203_vm2, %v7449_v33 }
0x1040   : > { %7036 = vmatmul.mubr.msk.f32.vlgmr.msra.gmra.mrb[16].mxu1 %vm327_vm1, %v2222_v27  ;;  %v2218_v27 = vld [vmem:[#allocation2 + $0xe0] sm:$0xff] }
0x1041   : > { %7454 = vmatpush3.bf16.xpose.msk.msra.mxu1 %vm8203_vm2, %v7449_v33  ;;  %7059 = vmatprep.mubr.msk.f32.mxu1 %vm327_vm1, %v2583_v34 }
0x1048   : > { %7060 = vmatmul.mubr.msk.f32.vlgmr.msra.gmra.mrb[18].mxu1 %vm327_vm1, %v2585_v35 }
0x110b   : > { %v8402_v36 = vpop.f32.mrb[14].mxu1 }
0x110c   : > { %v8404_v37 = vpop.f32.mrb[15].mxu1 }
0x1113   : > { %v7037_v38 = vpop.f32.mrb[16].mxu1 }
0x1114   : > { %v2301_v39 = vpop.f32.mrb[17].mxu1  ;;  %v2313_v40 = vsel %vm413_vm3, %v7037_v38, -inf }
0x1115   : > { %2314 = vmax.xlane.f32.xlu0 %v2313_v40  ;;  %v2310_v43 = vsel %vm413_vm3, %v2301_v39, -inf }
0x1116   : > { %2311 = vmax.xlane.f32.xlu1 %v2310_v43 }
0x111b   : > { %v7061_v42 = vpop.f32.mrb[18].mxu1 }
0x111c   : > { %v2664_v7 = vpop.f32.mrb[19].mxu1  ;;  %v2676_v10 = vsel %vm413_vm3, %v7061_v42, -inf }
0x111d   : > { %v2673_v5 = vsel %vm413_vm3, %v2664_v7, -inf }
0x112b   : > { %7764 = vrot.lane.b32.xlu0 %v8354_v53, %s8076_s21 }
0x114a   : > { %2674 = vmax.xlane.f32.xlu0 %v2673_v5  ;;  %v2782_v5 = vld [vmem:[#allocation2 + $0xf0] sm:$0xff] }
0x11a2   : > { %v2315_v44 = vpop.xlane.xlu0 %2314 }
0x11a3   : > { %v2317_v48 = vsub.f32 %v7037_v38, %v2315_v44  ;;  %v2312_v49 = vpop.xlane.xlu1 %2311 }
0x11a4   : > { %v2316_v50 = vsub.f32 %v2301_v39, %v2312_v49 }
0x11a5   : > { %v2320_v51 = vmul.f32 1.442695, %v2317_v48 }
0x11a6   : > { %v2318_v52 = vmul.f32 1.442695, %v2316_v50  ;;  %v7765_v55 = vpop.permute.xlu0 %7764 }
0x11a7   : > { %7887 = vpow2.f32 %v2320_v51  ;;  %v7767_v56 = vunpack.i.h.bf16 %v7765_v55  ;;  %v7766_v58 = vunpack.i.l.bf16 %v7765_v55 }
0x11a8   : > { %7889 = vpow2.f32 %v2318_v52 }
0x11a9   : > { %v7459_v59 = vpack.c.bf16 %v7767_v56, %v7766_v58 }
0x11ab   : > { %7461 = vmatprep.subr.msk.bf16.mxu1 %vm8203_vm2, %v7459_v59 }
0x11ac   : > { %7464 = vmatpush3.bf16.xpose.msk.msra.mxu1 %vm8203_vm2, %v7459_v59 }
0x11b1   : > { %v7888_v62 = vpop.eup %7887 }
0x11b2   : > { %v2325_v0 = vsel %vm413_vm3, %v7888_v62, 0.0  ;;  %v7890_v1 = vpop.eup %7889 }
0x11b3   : > { %2326 = vadd.xlane.f32.xlu1 %v2325_v0  ;;  %v2322_v2 = vsel %vm413_vm3, %v7890_v1, 0.0 }
0x11b7   : > { %2323 = vadd.xlane.f32.xlu1 %v2322_v2 }
0x11c8   : > { %7759 = vrot.lane.b32.xlu1 %v8354_v53, %s8075_s20 }
0x11cc   : > { %2866 = vrot.lane.b32.xlu1 %v8356_v54, %s8078_s23 }
0x11d0   : > { %2868 = vrot.lane.b32.xlu1 %v8366_v60, %s8078_s23 }
0x11d7   : > { %v2675_v3 = vpop.xlane.xlu0 %2674 }
0x11d8   : > { %v2679_v4 = vsub.f32 %v2664_v7, %v2675_v3  ;;  %v3066_v3 = vld [vmem:[#allocation2 + $0xf8] sm:$0xff] }
0x11da   : > { %v2681_v6 = vmul.f32 1.442695, %v2679_v4 }
0x11dc   : > { %7891 = vpow2.f32 %v2681_v6 }
0x11e6   : > { %v8423_v8 = vpop.eup %7891 }
0x11e7   : > { %v2685_v9 = vsel %vm413_vm3, %v8423_v8, 0.0 }
0x11e8   : > { %2686 = vadd.xlane.f32.xlu0 %v2685_v9 }
0x11f4   : > { %2677 = vmax.xlane.f32.xlu1 %v2676_v10 }
0x1205   : > { %7769 = vrot.lane.b32.xlu1 %v8354_v53, %s8079_s24 }
0x1209   : > { %7774 = vrot.lane.b32.xlu1 %v8354_v53, %s8080_s25 }
0x1240   : > { %v2327_v54 = vpop.xlane.xlu1 %2326 }
0x1241   : > { %7893 = vrcp.f32 %v2327_v54 }
0x1244   : > { %v2324_v60 = vpop.xlane.xlu1 %2323 }
0x1245   : > { %7895 = vrcp.f32 %v2324_v60 }
0x1248   : > { %v7760_v11 = vpop.permute.xlu1 %7759 }
0x1249   : > { %v7762_v12 = vunpack.i.h.bf16 %v7760_v11  ;;  %v7761_v14 = vunpack.i.l.bf16 %v7760_v11 }
0x124b   : > { %v7445_v15 = vpack.c.bf16 %v7762_v12, %v7761_v14  ;;  %v7894_v13 = vpop.eup %7893  ;;  %v6522_v12 = vld [vmem:[%s8779_s2 + $0xa] ss:$0 sm:$0xff] }
0x124c   : > { %v2867_v16 = vpop.permute.xlu1 %2866  ;;  %v2331_v21 = vmul.f32 %v7894_v13, %v7888_v62 }
0x124d   : > { %7446 = vmatprep.subr.bf16.mxu0 %v7445_v15  ;;  %7078 = vmatprep.mubr.msk.f32.mxu1 %vm327_vm1, %v2867_v16 }
0x124e   : > { %7448 = vmatpush3.bf16.msra.mxu0 %v7445_v15 }
0x124f   : > { %v7896_v17 = vpop.eup %7895  ;;  %7045 = vmatprep.subr.mxu0 %v2419_v26 }
0x1250   : > { %v2869_v18 = vpop.permute.xlu1 %2868  ;;  %v2330_v20 = vmul.f32 %v7896_v17, %v7890_v1 }
0x1251   : > { %7079 = vmatmul.mubr.msk.f32.vlgmr.msra.gmra.mrb[20].mxu1 %vm327_vm1, %v2869_v18 }
0x1252   : > { %7042 = vmatprep.mubr.msk.f32.mxu0 %vm413_vm3, %v2330_v20 }
0x1253   : > { %7043 = vmatmul.mubr.msk.f32.vlgmr.msra.gmra.mrb[16].mxu0 %vm413_vm3, %v2331_v21 }
0x1254   : > { %7046 = vmatpush3.msra.mxu0 %v2419_v26 }
0x1255   : > { %7050 = vmatprep.subr.mxu0 %v2218_v27 }
0x1275   : > { %v2687_v61 = vpop.xlane.xlu0 %2686 }
0x1281   : > { %v2678_v53 = vpop.xlane.xlu1 %2677 }
0x1282   : > { %v2680_v22 = vsub.f32 %v7061_v42, %v2678_v53 }
0x1284   : > { %v2683_v23 = vmul.f32 1.442695, %v2680_v22 }
0x1285   : > { %v7770_v28 = vpop.permute.xlu1 %7769 }
0x1286   : > { %7897 = vpow2.f32 %v2683_v23  ;;  %v7772_v30 = vunpack.i.h.bf16 %v7770_v28  ;;  %v7771_v31 = vunpack.i.l.bf16 %v7770_v28 }
0x1287   : > { %7899 = vrcp.f32 %v2687_v61 }
0x1288   : > { %v7455_v38 = vpack.c.bf16 %v7772_v30, %v7771_v31  ;;  %v3201_v30 = vld [vmem:[#allocation2 + $0x110] sm:$0xff]  ;;  %v3202_v31 = vld [vmem:[#allocation2 + $0x118] sm:$0xff] }
0x1289   : > { %v7775_v43 = vpop.permute.xlu1 %7774 }
0x128a   : > { %v7777_v44 = vunpack.i.h.bf16 %v7775_v43  ;;  %v7776_v48 = vunpack.i.l.bf16 %v7775_v43 }
0x1290   : > { %v7898_v24 = vpop.eup %7897 }
0x1291   : > { %v2688_v25 = vsel %vm413_vm3, %v7898_v24, 0.0  ;;  %v7900_v40 = vpop.eup %7899 }
0x1292   : > { %2689 = vadd.xlane.f32.xlu0 %v2688_v25  ;;  %v2693_v7 = vmul.f32 %v7900_v40, %v8423_v8 }
0x131f   : > { %v2690_v63 = vpop.xlane.xlu0 %2689 }
0x1320   : > { %7901 = vrcp.f32 %v2690_v63  ;;  %v3200_v63 = vld [vmem:[#allocation2 + $0x108] sm:$0xff] }
0x1324   : > { %v7080_v29 = vpop.f32.mrb[20].mxu1 }
0x1325   : > { %v2948_v32 = vpop.f32.mrb[21].mxu1  ;;  %v2960_v39 = vsel %vm413_vm3, %v7080_v29, -inf }
0x1326   : > { %v7044_v33 = vpop.f32.mrb[16].mxu0  ;;  %v2957_v34 = vsel %vm413_vm3, %v2948_v32, -inf }
0x1327   : > { %2958 = vmax.xlane.f32.xlu0 %v2957_v34  ;;  %v2410_v35 = vpop.f32.mrb[17].mxu0 }
0x1328   : > { %7047 = vmatprep.mubr.msk.f32.mxu0 %vm327_vm1, %v2410_v35 }
0x1329   : > { %7048 = vmatmul.mubr.msk.f32.vlgmr.msra.gmra.mrb[18].mxu0 %vm327_vm1, %v7044_v33 }
0x132a   : > { %7051 = vmatpush3.msra.mxu0 %v2218_v27  ;;  %7052 = vmatprep.mubr.msk.f32.mxu0 %vm327_vm1, %v8404_v37  ;;  %v7902_v42 = vpop.eup %7901  ;;  %v7465_v37 = vpack.c.bf16 %v7777_v44, %v7776_v48 }
0x132b   : > { %7456 = vmatprep.subr.bf16.mxu0 %v7455_v38  ;;  %2961 = vmax.xlane.f32.xlu0 %v2960_v39  ;;  %v2694_v49 = vmul.f32 %v7902_v42, %v7898_v24  ;;  %v6523_v42 = vld [vmem:[%s8779_s2 + $0xd] ss:$0 sm:$0xff] }
0x1331   : > { %7053 = vmatmul.mubr.msk.f32.vlgmr.msra.gmra.mrb[18].mxu0 %vm327_vm1, %v8402_v36 }
0x1332   : > { %7458 = vmatpush3.bf16.msra.mxu0 %v7455_v38  ;;  %7066 = vmatprep.mubr.msk.f32.mxu0 %vm413_vm3, %v2693_v7 }
0x1333   : > { %7069 = vmatprep.subr.mxu0 %v2782_v5 }
0x1335   : > { %7067 = vmatmul.mubr.msk.f32.vlgmr.msra.gmra.mrb[20].mxu0 %vm413_vm3, %v2694_v49 }
0x1336   : > { %7070 = vmatpush3.msra.mxu0 %v2782_v5  ;;  %v6524_v5 = vld [vmem:[%s8779_s2 + $0xe] ss:$0 sm:$0xff] }
0x1337   : > { %7466 = vmatprep.subr.bf16.mxu0 %v7465_v37 }
0x13b4   : > { %v2959_v50 = vpop.xlane.xlu0 %2958 }
0x13b5   : > { %v2963_v51 = vsub.f32 %v2948_v32, %v2959_v50  ;;  %v7473_v32 = vpack.c.bf16 %v3202_v31, %v3201_v30 }
0x13b7   : > { %v2965_v52 = vmul.f32 1.442695, %v2963_v51 }
0x13b8   : > { %v2962_v55 = vpop.xlane.xlu0 %2961 }
0x13b9   : > { %7903 = vpow2.f32 %v2965_v52  ;;  %v2964_v56 = vsub.f32 %v7080_v29, %v2962_v55  ;;  %v3341_v52 = vld [vmem:[#allocation2 + $0x120] sm:$0xff]  ;;  %v3342_v55 = vld [vmem:[#allocation2 + $0x128] sm:$0xff] }
0x13bb   : > { %v2967_v58 = vmul.f32 1.442695, %v2964_v56  ;;  %v7477_v56 = vpack.c.bf16 %v3342_v55, %v3341_v52 }
0x13bd   : > { %7905 = vpow2.f32 %v2967_v58  ;;  %v3343_v58 = vld [vmem:[#allocation2 + $0x130] sm:$0xff] }
0x13c3   : > { %v7904_v59 = vpop.eup %7903 }
0x13c4   : > { %v2969_v36 = vsel %vm413_vm3, %v7904_v59, 0.0 }
0x13c5   : > { %2970 = vadd.xlane.f32.xlu0 %v2969_v36 }
0x13c7   : > { %v7906_v62 = vpop.eup %7905 }
0x13c8   : > { %v2972_v0 = vsel %vm413_vm3, %v7906_v62, 0.0 }
0x13c9   : > { %2973 = vadd.xlane.f32.xlu0 %v2972_v0  ;;  %v3346_v0 = vld [vmem:[#allocation2 + $0x148] sm:$0xff] }
0x1408   : > { %v7068_v1 = vpop.f32.mrb[20].mxu0 }
0x1409   : > { %v2773_v2 = vpop.f32.mrb[21].mxu0 }
0x140a   : > { %7071 = vmatprep.mubr.msk.f32.mxu0 %vm327_vm1, %v2773_v2  ;;  %v3347_v2 = vld [vmem:[#allocation2 + $0x150] sm:$0xff] }
0x140b   : > { %7072 = vmatmul.mubr.msk.f32.vlgmr.msra.gmra.mrb[18].mxu0 %vm327_vm1, %v7068_v1 }
0x140c   : > { %7468 = vmatpush3.bf16.msra.mxu0 %v7465_v37 }
0x140d   : > { %7088 = vmatprep.subr.mxu0 %v3066_v3 }
0x1452   : > { %v2971_v4 = vpop.xlane.xlu0 %2970 }
0x1453   : > { %7907 = vrcp.f32 %v2971_v4 }
0x1456   : > { %v2974_v6 = vpop.xlane.xlu0 %2973 }
0x1457   : > { %7909 = vrcp.f32 %v2974_v6  ;;  %v6525_v6 = vld [vmem:[%s8779_s2 + $0xb] ss:$0 sm:$0xff] }
0x145d   : > { %v7908_v8 = vpop.eup %7907 }
0x145e   : > { %v2977_v9 = vmul.f32 %v7908_v8, %v7904_v59  ;;  %v3344_v59 = vld [vmem:[#allocation2 + $0x138] sm:$0xff] }
0x145f   : > { %v7481_v36 = vpack.c.bf16 %v3344_v59, %v3343_v58 }
0x1460   : > { %7085 = vmatprep.mubr.msk.f32.mxu0 %vm413_vm3, %v2977_v9 }
0x1461   : > { %v7910_v10 = vpop.eup %7909 }
0x1462   : > { %v2978_v54 = vmul.f32 %v7910_v10, %v7906_v62  ;;  %v3345_v62 = vld [vmem:[#allocation2 + $0x140] sm:$0xff] }
0x1463   : > { %v7485_v1 = vpack.c.bf16 %v3346_v0, %v3345_v62 }
0x1464   : > { %7086 = vmatmul.mubr.msk.f32.vlgmr.msra.gmra.mrb[22].mxu0 %vm413_vm3, %v2978_v54 }
0x1465   : > { %7089 = vmatpush3.msra.mxu0 %v3066_v3  ;;  %v3348_v3 = vld [vmem:[#allocation2 + $0x158] sm:$0xff] }
0x1466   : > { %7478 = vmatprep.subr.bf16.mxu0 %v7477_v56  ;;  %v7489_v4 = vpack.c.bf16 %v3348_v3, %v3347_v2  ;;  %v6528_v2 = vld [vmem:[%s8779_s2 + $0xc] ss:$0 sm:$0xff] }
0x1537   : > { %v7087_v60 = vpop.f32.mrb[22].mxu0 }
0x1538   : > { %v3057_v11 = vpop.f32.mrb[23].mxu0 }
0x1539   : > { %7090 = vmatprep.mubr.msk.f32.mxu0 %vm327_vm1, %v3057_v11 }
0x153a   : > { %7091 = vmatmul.mubr.msk.f32.vlgmr.msra.gmra.mrb[18].mxu0 %vm327_vm1, %v7087_v60 }
0x153b   : > { %7480 = vmatpush3.bf16.msra.mxu0 %v7477_v56 }
0x153c   : > { %7482 = vmatprep.subr.bf16.mxu0 %v7481_v36 }
0x153f   : > { %7484 = vmatpush3.bf16.msra.mxu0 %v7481_v36 }
0x1540   : > { %7486 = vmatprep.subr.bf16.mxu0 %v7485_v1 }
0x1543   : > { %7488 = vmatpush3.bf16.msra.mxu0 %v7485_v1 }
0x1544   : > { %7490 = vmatprep.subr.bf16.mxu0 %v7489_v4 }
0x1547   : > { %7492 = vmatpush3.bf16.msra.mxu0 %v7489_v4 }
0x160d   : > { %v7092_v14 = vpop.f32.mrb[18].mxu0 }
0x160e   : > { %v3156_v15 = vadd.f32 %v7092_v14, %v6522_v12  ;;  %v3139_v16 = vpop.f32.mrb[19].mxu0 }
0x160f   : > { %v3155_v13 = vadd.f32 %v6522_v12, %v3139_v16 }
0x1610   : > { %v3158_v17 = vadd.f32 %v3156_v15, %v8345_v47 }
0x1611   : > { %v3157_v18 = vadd.f32 %v3155_v13, %v8343_v41  ;;  %v3199_v41 = vld [vmem:[#allocation2 + $0x100] sm:$0xff] }
0x1612   : > { %v3164_v20 = vsel %vm237_vm0, %v3158_v17, 0.0  ;;  %v7469_v29 = vpack.c.bf16 %v3200_v63, %v3199_v41 }
0x1613   : > { %3165 = vadd.xlane.f32.xlu1 %v3164_v20  ;;  %v3161_v21 = vsel %vm237_vm0, %v3157_v18, 0.0 }
0x1614   : > { %3162 = vadd.xlane.f32.xlu0 %v3161_v21  ;;  %7470 = vmatprep.subr.bf16.mxu1 %v7469_v29 }
0x1615   : > { %7472 = vmatpush3.bf16.msra.mxu1 %v7469_v29 }
0x1616   : > { %7474 = vmatprep.subr.bf16.mxu1 %v7473_v32 }
0x1619   : > { %7476 = vmatpush3.bf16.msra.mxu1 %v7473_v32 }
0x16a0   : > { %v3166_v53 = vpop.xlane.xlu1 %3165 }
0x16a1   : > { %v3168_v22 = vmul.f32 0.03125, %v3166_v53  ;;  %v3163_v23 = vpop.xlane.xlu0 %3162 }
0x16a2   : > { %v3167_v24 = vmul.f32 0.03125, %v3163_v23 }
0x16a3   : > { %v3170_v25 = vsub.f32 %v3158_v17, %v3168_v22 }
0x16a4   : > { %v3169_v26 = vsub.f32 %v3157_v18, %v3167_v24 }
0x16a5   : > { %v3172_v28 = vmul.f32 %v3170_v25, %v3170_v25 }
0x16a6   : > { %v3171_v27 = vmul.f32 %v3169_v26, %v3169_v26 }
0x16a7   : > { %v3176_v47 = vsel %vm237_vm0, %v3172_v28, 0.0 }
0x16a8   : > { %v3173_v61 = vsel %vm237_vm0, %v3171_v27, 0.0 }
0x16a9   : > { %3174 = vadd.xlane.f32.xlu0 %v3173_v61 }
0x16ad   : > { %3177 = vadd.xlane.f32.xlu0 %v3176_v47 }
0x1736   : > { %v3175_v33 = vpop.xlane.xlu0 %3174 }
0x1737   : > { %v3179_v34 = vmul.f32 0.03125, %v3175_v33 }
0x1739   : > { %v3181_v35 = vadd.f32 1e-05, %v3179_v34 }
0x173a   : > { %v3178_v38 = vpop.xlane.xlu0 %3177 }
0x173b   : > { %7911 = vrsqrt.f32 %v3181_v35  ;;  %v3180_v39 = vmul.f32 0.03125, %v3178_v38 }
0x173d   : > { %v3182_v40 = vadd.f32 1e-05, %v3180_v39 }
0x173f   : > { %7913 = vrsqrt.f32 %v3182_v40 }
0x1745   : > { %v7912_v43 = vpop.eup %7911 }
0x1746   : > { %v3185_v7 = vmul.f32 %v7912_v43, %v3169_v26 }
0x1748   : > { %v3191_v44 = vmul.f32 %v6523_v42, %v3185_v7 }
0x1749   : > { %v7914_v48 = vpop.eup %7913 }
0x174a   : > { %v3186_v49 = vmul.f32 %v7914_v48, %v3170_v25  ;;  %v8471_v37 = vadd.f32 %v6524_v5, %v3191_v44 }
0x174c   : > { %v3192_v50 = vmul.f32 %v6523_v42, %v3186_v49  ;;  %7101 = vmatprep.mubr.msk.f32.mxu1 %vm237_vm0, %v8471_v37 }
0x174e   : > { %v8475_v51 = vadd.f32 %v6524_v5, %v3192_v50 }
0x1750   : > { %7102 = vmatmul.mubr.msk.f32.vlgmr.msra.gmra.mrb[22].mxu1 %vm237_vm0, %v8475_v51 }
0x1823   : > { %v7103_v8 = vpop.f32.mrb[22].mxu1 }
0x1824   : > { %v3286_v9 = vadd.f32 %v7103_v8, %v6525_v6  ;;  %v3280_v10 = vpop.f32.mrb[23].mxu1 }
0x1825   : > { %v3281_v54 = vadd.f32 %v6525_v6, %v3280_v10 }
0x1826   : > { %v3292_v60 = vmul.f32 0.70710677, %v3286_v9  ;;  %v3290_v62 = vmul.f32 0.5, %v3286_v9 }
0x1827   : > { %v3291_v11 = vmul.f32 0.70710677, %v3281_v54  ;;  %v3289_v59 = vmul.f32 0.5, %v3281_v54 }
0x1828   : > { %v3298_v12 = vand.u32 2147483647, %v3292_v60  ;;  %vm3294_vm9 = vcmp.ge.f32.partialorder %v3292_v60, 0.0 }
0x1829   : > { %v3297_v14 = vand.u32 2147483647, %v3291_v11  ;;  %vm3293_vm10 = vcmp.ge.f32.partialorder %v3291_v11, 0.0  ;;  %v3296_v49 = vsel %vm3294_vm9, 1.0, %v8081_v57 }
0x182a   : > { %v3300_v15 = vmul.f32 0.3275911, %v3298_v12  ;;  %v3324_v18 = vsub.f32 0.0, %v3298_v12  ;;  %v3295_v55 = vsel %vm3293_vm10, 1.0, %v8081_v57 }
0x182b   : > { %v3299_v16 = vmul.f32 0.3275911, %v3297_v14  ;;  %v3323_v20 = vsub.f32 0.0, %v3297_v14 }
0x182c   : > { %v3302_v13 = vadd.f32 1.0, %v3300_v15  ;;  %v3326_v53 = vmul.f32 %v3324_v18, %v3298_v12 }
0x182d   : > { %v3301_v17 = vadd.f32 1.0, %v3299_v16  ;;  %v3325_v24 = vmul.f32 %v3323_v20, %v3297_v14 }
0x182e   : > { %7915 = vrcp.f32 %v3302_v13  ;;  %v3329_v27 = vmul.f32 1.442695, %v3326_v53  ;;  %v3531_v53 = vld [vmem:[#allocation2 + $0x170] sm:$0xff] }
0x182f   : > { %7917 = vrcp.f32 %v3301_v17  ;;  %v3327_v47 = vmul.f32 1.442695, %v3325_v24 }
0x1830   : > { %7919 = vpow2.f32 %v3329_v27 }
0x1831   : > { %7921 = vpow2.f32 %v3327_v47 }
0x1838   : > { %v7916_v21 = vpop.eup %7915 }
0x1839   : > { %v7918_v22 = vpop.eup %7917  ;;  %v3306_v23 = vmul.f32 1.0614054, %v7916_v21 }
0x183a   : > { %v3305_v25 = vmul.f32 1.0614054, %v7918_v22  ;;  %v7920_v43 = vpop.eup %7919 }
0x183b   : > { %v3308_v26 = vadd.f32 -1.4531521, %v3306_v23  ;;  %v7922_v7 = vpop.eup %7921  ;;  %v3532_v23 = vld [vmem:[#allocation2 + $0x178] sm:$0xff] }
0x183c   : > { %v3307_v61 = vadd.f32 -1.4531521, %v3305_v25  ;;  %v7497_v24 = vpack.c.bf16 %v3532_v23, %v3531_v53 }
0x183d   : > { %v3310_v28 = vmul.f32 %v7916_v21, %v3308_v26 }
0x183e   : > { %v3309_v41 = vmul.f32 %v7918_v22, %v3307_v61 }
0x183f   : > { %v3312_v63 = vadd.f32 1.4214138, %v3310_v28 }
0x1840   : > { %v3311_v29 = vadd.f32 1.4214138, %v3309_v41 }
0x1841   : > { %v3314_v30 = vmul.f32 %v7916_v21, %v3312_v63  ;;  %v6531_v63 = vld [vmem:[%s8779_s2 + $0xf] ss:$0 sm:$0xff] }
0x1842   : > { %v3313_v31 = vmul.f32 %v7918_v22, %v3311_v29 }
0x1843   : > { %v3316_v32 = vadd.f32 -0.28449672, %v3314_v30  ;;  %v6532_v30 = vld [vmem:[%s8779_s2 + $0x10] ss:$0 sm:$0xff] }
0x1844   : > { %v3315_v33 = vadd.f32 -0.28449672, %v3313_v31 }
0x1845   : > { %v3318_v34 = vmul.f32 %v7916_v21, %v3316_v32 }
0x1846   : > { %v3317_v35 = vmul.f32 %v7918_v22, %v3315_v33 }
0x1847   : > { %v3320_v38 = vadd.f32 0.2548296, %v3318_v34 }
0x1848   : > { %v3319_v39 = vadd.f32 0.2548296, %v3317_v35 }
0x1849   : > { %v3322_v40 = vmul.f32 %v7916_v21, %v3320_v38  ;;  %v3529_v21 = vld [vmem:[#allocation2 + $0x160] sm:$0xff] }
0x184a   : > { %v3321_v42 = vmul.f32 %v7918_v22, %v3319_v39 }
0x184b   : > { %v3332_v5 = vmul.f32 %v7920_v43, %v3322_v40 }
0x184c   : > { %v3331_v44 = vmul.f32 %v7922_v7, %v3321_v42 }
0x184d   : > { %v3334_v48 = vsub.f32 1.0, %v3332_v5 }
0x184e   : > { %v3333_v50 = vsub.f32 1.0, %v3331_v44 }
0x184f   : > { %v3336_v52 = vmul.f32 %v3334_v48, %v3296_v49 }
0x1850   : > { %v3335_v56 = vmul.f32 %v3333_v50, %v3295_v55 }
0x1851   : > { %v3338_v58 = vadd.f32 1.0, %v3336_v52 }
0x1852   : > { %v3337_v36 = vadd.f32 1.0, %v3335_v56 }
0x1853   : > { %v3340_v1 = vmul.f32 %v3338_v58, %v3290_v62 }
0x1854   : > { %v3339_v0 = vmul.f32 %v3337_v36, %v3289_v59 }
0x1856   : > { %7120 = vmatprep.mubr.msk.f32.mxu0 %vm1660_vm6, %v3339_v0 }
0x1857   : > { %7121 = vmatmul.mubr.msk.f32.vlgmr.msra.gmra.mrb[24].mxu0 %vm1660_vm6, %v3340_v1 }
0x192a   : > { %v7122_v3 = vpop.f32.mrb[24].mxu0 }
0x192b   : > { %v3426_v4 = vpop.f32.mrb[25].mxu0  ;;  %v3432_v6 = vadd.f32 %v7122_v3, %v6528_v2 }
0x192c   : > { %v3427_v8 = vadd.f32 %v6528_v2, %v3426_v4 }
0x192d   : > { %v3436_v9 = vadd.f32 %v3432_v6, %v8475_v51  ;;  %v3530_v51 = vld [vmem:[#allocation2 + $0x168] sm:$0xff] }
0x192e   : > { %v3435_v10 = vadd.f32 %v3427_v8, %v8471_v37  ;;  %v7493_v22 = vpack.c.bf16 %v3530_v51, %v3529_v21 }
0x192f   : > { %v3442_v60 = vsel %vm237_vm0, %v3436_v9, 0.0 }
0x1930   : > { %v3439_v54 = vsel %vm237_vm0, %v3435_v10, 0.0  ;;  %7494 = vmatprep.subr.bf16.mxu1 %v7493_v22 }
0x1931   : > { %3440 = vadd.xlane.f32.xlu0 %v3439_v54  ;;  %7496 = vmatpush3.bf16.msra.mxu1 %v7493_v22 }
0x1932   : > { %7498 = vmatprep.subr.bf16.mxu1 %v7497_v24 }
0x1935   : > { %3443 = vadd.xlane.f32.xlu0 %v3442_v60  ;;  %7500 = vmatpush3.bf16.msra.mxu1 %v7497_v24 }
0x19be   : > { %v3441_v11 = vpop.xlane.xlu0 %3440 }
0x19bf   : > { %v3445_v12 = vmul.f32 0.03125, %v3441_v11 }
0x19c1   : > { %v3447_v14 = vsub.f32 %v3435_v10, %v3445_v12 }
0x19c2   : > { %v3444_v15 = vpop.xlane.xlu0 %3443 }
0x19c3   : > { %v3446_v16 = vmul.f32 0.03125, %v3444_v15  ;;  %v3449_v13 = vmul.f32 %v3447_v14, %v3447_v14 }
0x19c5   : > { %v3448_v17 = vsub.f32 %v3436_v9, %v3446_v16  ;;  %v3451_v18 = vsel %vm237_vm0, %v3449_v13, 0.0 }
0x19c6   : > { %3452 = vadd.xlane.f32.xlu0 %v3451_v18 }
0x19c7   : > { %v3450_v20 = vmul.f32 %v3448_v17, %v3448_v17 }
0x19c9   : > { %v3454_v37 = vsel %vm237_vm0, %v3450_v20, 0.0 }
0x19ca   : > { %3455 = vadd.xlane.f32.xlu0 %v3454_v37 }
0x1a53   : > { %v3453_v25 = vpop.xlane.xlu0 %3452 }
0x1a54   : > { %v3457_v26 = vmul.f32 0.03125, %v3453_v25 }
0x1a56   : > { %v3459_v27 = vadd.f32 1e-05, %v3457_v26 }
0x1a57   : > { %v3456_v61 = vpop.xlane.xlu0 %3455 }
0x1a58   : > { %7923 = vrsqrt.f32 %v3459_v27  ;;  %v3458_v28 = vmul.f32 0.03125, %v3456_v61 }
0x1a5a   : > { %v3460_v47 = vadd.f32 1e-05, %v3458_v28 }
0x1a5c   : > { %7925 = vrsqrt.f32 %v3460_v47 }
0x1a62   : > { %v7924_v41 = vpop.eup %7923 }
0x1a63   : > { %v3463_v29 = vmul.f32 %v7924_v41, %v3447_v14  ;;  %v6533_v41 = vld [vmem:[%s8779_s2 + $0x11] ss:$0 sm:$0xff] }
0x1a65   : > { %v3469_v31 = vmul.f32 %v6531_v63, %v3463_v29 }
0x1a66   : > { %v7926_v32 = vpop.eup %7925 }
0x1a67   : > { %v3464_v33 = vmul.f32 %v7926_v32, %v3448_v17  ;;  %v3475_v34 = vadd.f32 %v6532_v30, %v3469_v31 }
0x1a69   : > { %v3470_v35 = vmul.f32 %v6531_v63, %v3464_v33  ;;  %v3479_v38 = vmul.f32 0.70710677, %v3475_v34  ;;  %v3477_v22 = vmul.f32 0.5, %v3475_v34  ;;  %v3627_v34 = vlaneseq }
0x1a6b   : > { %v3476_v39 = vadd.f32 %v6532_v30, %v3470_v35  ;;  %v3485_v40 = vand.u32 2147483647, %v3479_v38  ;;  %vm3481_vm11 = vcmp.ge.f32.partialorder %v3479_v38, 0.0  ;;  %v3628_v35 = vand.u32 127, %v3627_v34 }
0x1a6c   : > { %v3483_v21 = vsel %vm3481_vm11, 1.0, %v8081_v57  ;;  %vm8084_vm11 = vmmov 0  }
0x1a6d   : > { %v3480_v43 = vmul.f32 0.70710677, %v3476_v39  ;;  %v3487_v42 = vmul.f32 0.3275911, %v3485_v40  ;;  %v3511_v49 = vsub.f32 0.0, %v3485_v40  ;;  %v3478_v61 = vmul.f32 0.5, %v3476_v39 }
0x1a6f   : > { %v3486_v7 = vand.u32 2147483647, %v3480_v43  ;;  %v3489_v5 = vadd.f32 1.0, %v3487_v42  ;;  %v3513_v55 = vmul.f32 %v3511_v49, %v3485_v40  ;;  %vm3482_vm12 = vcmp.ge.f32.partialorder %v3480_v43, 0.0 }
0x1a70   : > { %v3484_v25 = vsel %vm3482_vm12, 1.0, %v8081_v57 }
0x1a71   : > { %v3488_v44 = vmul.f32 0.3275911, %v3486_v7  ;;  %7927 = vrcp.f32 %v3489_v5  ;;  %v3512_v52 = vsub.f32 0.0, %v3486_v7  ;;  %v3515_v62 = vmul.f32 1.442695, %v3513_v55 }
0x1a73   : > { %v3490_v48 = vadd.f32 1.0, %v3488_v44  ;;  %v3514_v36 = vmul.f32 %v3512_v52, %v3486_v7 }
0x1a75   : > { %7929 = vrcp.f32 %v3490_v48  ;;  %v3517_v4 = vmul.f32 1.442695, %v3514_v36 }
0x1a76   : > { %7931 = vpow2.f32 %v3515_v62 }
0x1a77   : > { %7933 = vpow2.f32 %v3517_v4  ;;  %v3757_v4 = vld [vmem:[#allocation2 + $0x1b8] sm:$0xff] }
0x1a7b   : > { %v7928_v50 = vpop.eup %7927 }
0x1a7c   : > { %v3493_v56 = vmul.f32 1.0614054, %v7928_v50 }
0x1a7e   : > { %v3495_v58 = vadd.f32 -1.4531521, %v3493_v56 }
0x1a7f   : > { %v7930_v59 = vpop.eup %7929 }
0x1a80   : > { %v3497_v0 = vmul.f32 %v7928_v50, %v3495_v58  ;;  %v3494_v1 = vmul.f32 1.0614054, %v7930_v59  ;;  %v7932_v16 = vpop.eup %7931 }
0x1a81   : > { %v7934_v37 = vpop.eup %7933 }
0x1a82   : > { %v3499_v2 = vadd.f32 1.4214138, %v3497_v0  ;;  %v3496_v3 = vadd.f32 -1.4531521, %v3494_v1  ;;  %v3669_v0 = vld [vmem:[#allocation2 + $0x180] sm:$0xff]  ;;  %v3670_v1 = vld [vmem:[#allocation2 + $0x188] sm:$0xff] }
0x1a84   : > { %v3501_v6 = vmul.f32 %v7928_v50, %v3499_v2  ;;  %v3498_v8 = vmul.f32 %v7930_v59, %v3496_v3  ;;  %v7501_v2 = vpack.c.bf16 %v3670_v1, %v3669_v0  ;;  %v3756_v3 = vld [vmem:[#allocation2 + $0x1b0] sm:$0xff] }
0x1a86   : > { %v3503_v10 = vadd.f32 -0.28449672, %v3501_v6  ;;  %v3500_v54 = vadd.f32 1.4214138, %v3498_v8  ;;  %7502 = vmatprep.subr.bf16.mxu1 %v7501_v2  ;;  %v7505_v6 = vpack.c.bf16 %v3757_v4, %v3756_v3 }
0x1a88   : > { %v3505_v9 = vmul.f32 %v7928_v50, %v3503_v10  ;;  %v3502_v60 = vmul.f32 %v7930_v59, %v3500_v54 }
0x1a8a   : > { %v3507_v11 = vadd.f32 0.2548296, %v3505_v9  ;;  %v3504_v12 = vadd.f32 -0.28449672, %v3502_v60 }
0x1a8c   : > { %v3509_v14 = vmul.f32 %v7928_v50, %v3507_v11  ;;  %v3506_v15 = vmul.f32 %v7930_v59, %v3504_v12 }
0x1a8e   : > { %v3519_v13 = vmul.f32 %v7932_v16, %v3509_v14  ;;  %v3508_v17 = vadd.f32 0.2548296, %v3506_v15  ;;  %v8082_v16 = vmov 0.0  }
0x1a90   : > { %v3521_v18 = vsub.f32 1.0, %v3519_v13  ;;  %v3510_v20 = vmul.f32 %v7930_v59, %v3508_v17  ;;  %v3758_v17 = vld [vmem:[#allocation2 + $0x1c0] sm:$0xff] }
0x1a92   : > { %v3523_v51 = vmul.f32 %v3521_v18, %v3483_v21  ;;  %v3520_v53 = vmul.f32 %v7934_v37, %v3510_v20  ;;  %v3759_v18 = vld [vmem:[#allocation2 + $0x1c8] sm:$0xff] }
0x1a93   : > { %v7509_v37 = vpack.c.bf16 %v3759_v18, %v3758_v17 }
0x1a94   : > { %v3525_v23 = vadd.f32 1.0, %v3523_v51  ;;  %v3522_v24 = vsub.f32 1.0, %v3520_v53  ;;  %v3752_v51 = vld [vmem:[#allocation2 + $0x190] sm:$0xff]  ;;  %v3753_v53 = vld [vmem:[#allocation2 + $0x198] sm:$0xff] }
0x1a96   : > { %v8503_v26 = vmul.f32 %v3525_v23, %v3477_v22  ;;  %v3524_v27 = vmul.f32 %v3522_v24, %v3484_v25  ;;  %v7513_v22 = vpack.c.bf16 %v3753_v53, %v3752_v51  ;;  %v3754_v23 = vld [vmem:[#allocation2 + $0x1a0] sm:$0xff]  ;;  %v3755_v24 = vld [vmem:[#allocation2 + $0x1a8] sm:$0xff] }
0x1a97   : > { %v7517_v25 = vpack.c.bf16 %v3755_v24, %v3754_v23 }
0x1a98   : > { %7131 = vmatprep.mubr.msk.f32.mxu1 %vm237_vm0, %v8503_v26  ;;  %v3526_v28 = vadd.f32 1.0, %v3524_v27  ;;  %v3910_v27 = vld [vmem:[#allocation2 + $0x1d0] sm:$0xff] }
0x1a9a   : > { %v8507_v47 = vmul.f32 %v3526_v28, %v3478_v61  ;;  %v3911_v61 = vld [vmem:[#allocation2 + $0x1d8] sm:$0xff] }
0x1a9b   : > { %v7521_v28 = vpack.c.bf16 %v3911_v61, %v3910_v27 }
0x1a9c   : > { %7132 = vmatmul.mubr.msk.f32.vlgmr.msra.gmra.mrb[24].mxu1 %vm237_vm0, %v8507_v47 }
0x1a9d   : > { %7504 = vmatpush3.bf16.msra.mxu1 %v7501_v2 }
0x1a9e   : > { %7506 = vmatprep.subr.bf16.mxu1 %v7505_v6 }
0x1b6f   : > { %v7133_v63 = vpop.f32.mrb[24].mxu1 }
0x1b70   : > { %v3616_v29 = vadd.f32 %v7133_v63, %v6533_v41  ;;  %v3610_v30 = vpop.f32.mrb[25].mxu1  ;;  %v4054_v63 = vld [vmem:[#allocation2 + $0x1e0] sm:$0xff] }
0x1b71   : > { %v3611_v31 = vadd.f32 %v6533_v41, %v3610_v30  ;;  %v4057_v30 = vld [vmem:[#allocation2 + $0x1f8] sm:$0xff] }
0x1b72   : > { %3620 = vst.msk [vmem:[%s225_s26 + $0x8] sm:$0xff] %vm413_vm3, %v3616_v29  ;;  %v3624_v33 = vsel %vm413_vm3, %v3616_v29, -inf }
0x1b73   : > { %3619 = vst.msk [vmem:[%s225_s26] sm:$0xff] %vm413_vm3, %v3611_v31  ;;  %v3621_v32 = vsel %vm413_vm3, %v3611_v31, -inf }
0x1b74   : > { %3622 = vmax.xlane.f32.xlu0 %v3621_v32 }
0x1b78   : > { %3625 = vmax.xlane.f32.xlu0 %v3624_v33 }
0x1c01   : > { %v3623_v38 = vpop.xlane.xlu0 %3622 }
0x1c02   : > { %vm3629_vm13 = vcmp.ge.f32.partialorder %v3611_v31, %v3623_v38 }
0x1c03   : > { %v3631_v39 = vsel %vm3629_vm13, %v3628_v35, 16 }
0x1c04   : > { %v3633_v40 = vsel %vm413_vm3, %v3631_v39, 2147483647 }
0x1c05   : > { %v3626_v43 = vpop.xlane.xlu0 %3625  ;;  %v3635_v42 = vshra.s32 %v3633_v40, 16  ;;  %v3634_v50 = vand.u32 65535, %v3633_v40 }
0x1c06   : > { %vm3630_vm14 = vcmp.ge.f32.partialorder %v3616_v29, %v3626_v43 }
0x1c07   : > { %v3632_v7 = vsel %vm3630_vm14, %v3628_v35, 16  ;;  %v3637_v5 = vcvt.s32.f32 %v3635_v42  ;;  %v3636_v55 = vcvt.s32.f32 %v3634_v50 }
0x1c08   : > { %v3648_v44 = vsel %vm413_vm3, %v3632_v7, 2147483647 }
0x1c09   : > { %3638 = vmin.xlane.f32.xlu0 %v3637_v5  ;;  %v3650_v48 = vshra.s32 %v3648_v44, 16  ;;  %v3649_v56 = vand.u32 65535, %v3648_v44 }
0x1c0b   : > { %v3652_v49 = vcvt.s32.f32 %v3650_v48  ;;  %v3651_v36 = vcvt.s32.f32 %v3649_v56 }
0x1c0d   : > { %3653 = vmin.xlane.f32.xlu1 %v3652_v49 }
0x1c96   : > { %v3639_v52 = vpop.xlane.xlu0 %3638 }
0x1c97   : > { %vm3640_vm15 = vcmp.eq.f32.partialorder %v3637_v5, %v3639_v52  ;;  %v3645_v8 = vcvt.f32.s32 %v3639_v52 }
0x1c98   : > { %v3641_v58 = vsel %vm3640_vm15, %v3636_v55, inf }
0x1c99   : > { %3642 = vmin.xlane.f32.xlu0 %v3641_v58  ;;  %v3646_v54 = vshll.u32 %v3645_v8, 16 }
0x1c9a   : > { %v3654_v59 = vpop.xlane.xlu1 %3653 }
0x1c9b   : > { %vm3655_vm4 = vcmp.eq.f32.partialorder %v3652_v49, %v3654_v59  ;;  %v3660_v9 = vcvt.f32.s32 %v3654_v59 }
0x1c9c   : > { %v3656_v62 = vsel %vm3655_vm4, %v3651_v36, inf  ;;  %vm7623_vm4 = vmpackc.low %vm237_vm0, %vm237_vm0 }
0x1c9d   : > { %3657 = vmin.xlane.f32.xlu1 %v3656_v62  ;;  %v3661_v14 = vshll.u32 %v3660_v9, 16 }
0x1d26   : > { %v3643_v10 = vpop.xlane.xlu0 %3642 }
0x1d27   : > { %v3644_v60 = vcvt.f32.s32 %v3643_v10 }
0x1d29   : > { %v3647_v11 = vadd.s32 %v3646_v54, %v3644_v60 }
0x1d2a   : > { %v3658_v12 = vpop.xlane.xlu1 %3657 }
0x1d2b   : > { %v3659_v15 = vcvt.f32.s32 %v3658_v12  ;;  %vm3663_vm5 = vcmp.eq.s32.totalorder %v3628_v35, %v3647_v11 }
0x1d2c   : > { %v6536_v13 = vsel %vm3663_vm5, 1.0, %v8082_v16 }
0x1d2d   : > { %v3662_v20 = vadd.s32 %v3661_v14, %v3659_v15  ;;  %7138 = vmatprep.mubr.msk.f32.mxu1 %vm413_vm3, %v6536_v13 }
0x1d2f   : > { %vm3664_vm7 = vcmp.eq.s32.totalorder %v3628_v35, %v3662_v20 }
0x1d30   : > { %v6537_v21 = vsel %vm3664_vm7, 1.0, %v8082_v16 }
0x1d31   : > { %7139 = vmatmul.mubr.msk.f32.vlgmr.msra.gmra.mrb[26].mxu1 %vm413_vm3, %v6537_v21 }
0x1d32   : > { %7508 = vmatpush3.bf16.msra.mxu1 %v7505_v6  ;;  %7149 = vmatprep.mubr.msk.f32.mxu1 %vm237_vm0, %v8503_v26 }
0x1d33   : > { %7510 = vmatprep.subr.bf16.mxu1 %v7509_v37 }
0x1d36   : > { %7512 = vmatpush3.bf16.msra.mxu1 %v7509_v37 }
0x1d37   : > { %7514 = vmatprep.subr.bf16.mxu1 %v7513_v22 }
0x1d39   : > { %7150 = vmatmul.mubr.msk.f32.vlgmr.msra.gmra.mrb[28].mxu1 %vm237_vm0, %v8507_v47  ;;  %v4055_v47 = vld [vmem:[#allocation2 + $0x1e8] sm:$0xff] }
0x1d3a   : > { %7516 = vmatpush3.bf16.msra.mxu1 %v7513_v22  ;;  %7160 = vmatprep.mubr.msk.f32.mxu1 %vm237_vm0, %v8330_v45  ;;  %v7525_v29 = vpack.c.bf16 %v4055_v47, %v4054_v63  ;;  %v4056_v45 = vld [vmem:[#allocation2 + $0x1f0] sm:$0xff] }
0x1d3b   : > { %7518 = vmatprep.subr.bf16.mxu1 %v7517_v25  ;;  %v7529_v31 = vpack.c.bf16 %v4057_v30, %v4056_v45  ;;  %v6547_v47 = vld [vmem:[%s8779_s2 + $0x13] ss:$0 sm:$0xff] }
0x1d3c   : > { %7526 = vmatprep.subr.bf16.mxu0 %v7525_v29 }
0x1d3d   : > { %7528 = vmatpush3.bf16.msra.mxu0 %v7525_v29 }
0x1d3e   : > { %7520 = vmatpush3.bf16.msra.mxu1 %v7517_v25  ;;  %7530 = vmatprep.subr.bf16.mxu0 %v7529_v31 }
0x1d3f   : > { %7522 = vmatprep.subr.bf16.mxu1 %v7521_v28 }
0x1d41   : > { %7161 = vmatmul.mubr.msk.f32.vlgmr.msra.gmra.mrb[28].mxu1 %vm237_vm0, %v8334_v46  ;;  %7532 = vmatpush3.bf16.msra.mxu0 %v7529_v31  ;;  %v6546_v46 = vld [vmem:[%s8779_s2 + $0x12] ss:$0 sm:$0xff] }
0x1d42   : > { %7524 = vmatpush3.bf16.msra.mxu1 %v7521_v28 }
0x1e04   : > { %v7140_v26 = vpop.f32.mrb[26].mxu1 }
0x1e05   : > { %v3743_v41 = vpop.f32.mrb[27].mxu1 }
0x1e06   : > { %7167 = vmatprep.mubr.msk.f32.mxu1 %vm413_vm3, %v3743_v41 }
0x1e07   : > { %7168 = vmatmul.mubr.msk.f32.vlgmr.msra.gmra.mrb[28].mxu1 %vm413_vm3, %v7140_v26 }
0x1eda   : > { %v7169_v32 = vpop.f32.mrb[28].mxu1 }
0x1edb   : > { %v4001_v33 = vadd.f32 %v7169_v32, %v6546_v46  ;;  %v3984_v35 = vpop.f32.mrb[29].mxu1 }
0x1edc   : > { %v4000_v38 = vadd.f32 %v6546_v46, %v3984_v35 }
0x1edd   : > { %v4005_v39 = vmul.f32 0.70710677, %v4001_v33  ;;  %v4003_v26 = vmul.f32 0.5, %v4001_v33 }
0x1ede   : > { %v4004_v40 = vmul.f32 0.70710677, %v4000_v38  ;;  %v4002_v61 = vmul.f32 0.5, %v4000_v38 }
0x1edf   : > { %v4011_v43 = vand.u32 2147483647, %v4005_v39  ;;  %vm4007_vm8 = vcmp.ge.f32.partialorder %v4005_v39, 0.0 }
0x1ee0   : > { %v4010_v42 = vand.u32 2147483647, %v4004_v40  ;;  %vm4006_vm9 = vcmp.ge.f32.partialorder %v4004_v40, 0.0  ;;  %v4009_v53 = vsel %vm4007_vm8, 1.0, %v8081_v57 }
0x1ee1   : > { %v4013_v7 = vmul.f32 0.3275911, %v4011_v43  ;;  %v4037_v49 = vsub.f32 0.0, %v4011_v43  ;;  %v4008_v24 = vsel %vm4006_vm9, 1.0, %v8081_v57 }
0x1ee2   : > { %v4012_v5 = vmul.f32 0.3275911, %v4010_v42  ;;  %v4036_v50 = vsub.f32 0.0, %v4010_v42 }
0x1ee3   : > { %v4015_v44 = vadd.f32 1.0, %v4013_v7  ;;  %v4039_v55 = vmul.f32 %v4037_v49, %v4011_v43 }
0x1ee4   : > { %v4014_v48 = vadd.f32 1.0, %v4012_v5  ;;  %v4038_v59 = vmul.f32 %v4036_v50, %v4010_v42 }
0x1ee5   : > { %7935 = vrcp.f32 %v4015_v44  ;;  %v4042_v0 = vmul.f32 1.442695, %v4039_v55 }
0x1ee6   : > { %7937 = vrcp.f32 %v4014_v48  ;;  %v4040_v3 = vmul.f32 1.442695, %v4038_v59 }
0x1ee7   : > { %7939 = vpow2.f32 %v4042_v0 }
0x1ee8   : > { %7941 = vpow2.f32 %v4040_v3 }
0x1eef   : > { %v7936_v52 = vpop.eup %7935 }
0x1ef0   : > { %v7938_v56 = vpop.eup %7937  ;;  %v4019_v58 = vmul.f32 1.0614054, %v7936_v52 }
0x1ef1   : > { %v4018_v36 = vmul.f32 1.0614054, %v7938_v56  ;;  %v7940_v17 = vpop.eup %7939 }
0x1ef2   : > { %v4021_v62 = vadd.f32 -1.4531521, %v4019_v58  ;;  %v7942_v20 = vpop.eup %7941 }
0x1ef3   : > { %v4020_v1 = vadd.f32 -1.4531521, %v4018_v36 }
0x1ef4   : > { %v4023_v2 = vmul.f32 %v7936_v52, %v4021_v62 }
0x1ef5   : > { %v4022_v4 = vmul.f32 %v7938_v56, %v4020_v1 }
0x1ef6   : > { %v4025_v6 = vadd.f32 1.4214138, %v4023_v2 }
0x1ef7   : > { %v4024_v8 = vadd.f32 1.4214138, %v4022_v4 }
0x1ef8   : > { %v4027_v10 = vmul.f32 %v7936_v52, %v4025_v6 }
0x1ef9   : > { %v4026_v54 = vmul.f32 %v7938_v56, %v4024_v8 }
0x1efa   : > { %v4029_v9 = vadd.f32 -0.28449672, %v4027_v10 }
0x1efb   : > { %v4028_v60 = vadd.f32 -0.28449672, %v4026_v54 }
0x1efc   : > { %v4031_v11 = vmul.f32 %v7936_v52, %v4029_v9 }
0x1efd   : > { %v4030_v12 = vmul.f32 %v7938_v56, %v4028_v60 }
0x1efe   : > { %v4033_v14 = vadd.f32 0.2548296, %v4031_v11 }
0x1eff   : > { %v4032_v15 = vadd.f32 0.2548296, %v4030_v12 }
0x1f00   : > { %v4035_v13 = vmul.f32 %v7936_v52, %v4033_v14 }
0x1f01   : > { %v4034_v18 = vmul.f32 %v7938_v56, %v4032_v15 }
0x1f02   : > { %v4045_v37 = vmul.f32 %v7940_v17, %v4035_v13 }
0x1f03   : > { %v4044_v21 = vmul.f32 %v7942_v20, %v4034_v18 }
0x1f04   : > { %v4047_v51 = vsub.f32 1.0, %v4045_v37 }
0x1f05   : > { %v4046_v22 = vsub.f32 1.0, %v4044_v21 }
0x1f06   : > { %v4049_v23 = vmul.f32 %v4047_v51, %v4009_v53 }
0x1f07   : > { %v4048_v25 = vmul.f32 %v4046_v22, %v4008_v24 }
0x1f08   : > { %v4051_v27 = vadd.f32 1.0, %v4049_v23 }
0x1f09   : > { %v4050_v28 = vadd.f32 1.0, %v4048_v25 }
0x1f0a   : > { %v8547_v63 = vmul.f32 %v4051_v27, %v4003_v26 }
0x1f0b   : > { %v8545_v41 = vmul.f32 %v4050_v28, %v4002_v61 }
0x1f0d   : > { %7178 = vmatprep.mubr.msk.f32.mxu0 %vm237_vm0, %v8545_v41 }
0x1f0e   : > { %7179 = vmatmul.mubr.msk.f32.vlgmr.msra.gmra.mrb[26].mxu0 %vm237_vm0, %v8547_v63 }
0x1fe1   : > { %v7180_v29 = vpop.f32.mrb[26].mxu0 }
0x1fe2   : > { %v4141_v45 = vadd.f32 %v7180_v29, %v6547_v47  ;;  %v4135_v30 = vpop.f32.mrb[27].mxu0 }
0x1fe3   : > { %v4136_v31 = vadd.f32 %v6547_v47, %v4135_v30 }
0x1fe4   : > { %v8566_v33 = vmul.f32 0.35355338, %v4141_v45 }
0x1fe5   : > { %v8556_v46 = vpack.i.bf16 %v4141_v45, %v4136_v31  ;;  %v8558_v32 = vmul.f32 0.35355338, %v4136_v31 }
0x1fe7   : > { %7784 = vrot.lane.b32.xlu1 %v8556_v46, %s8072_s17  ;;  %7779 = vrot.lane.b32.xlu0 %v8556_v46, %s8070_s13 }
0x1fe8   : > { %7185 = vmatprep.mubr.msk.f32.mxu0 %vm327_vm1, %v8558_v32 }
0x1feb   : > { %4349 = vrot.lane.b32.xlu0 %v8566_v33, %s8071_s14  ;;  %4347 = vrot.lane.b32.xlu1 %v8558_v32, %s8071_s14 }
0x1fef   : > { %4710 = vrot.lane.b32.xlu0 %v8558_v32, %s8074_s19  ;;  %7789 = vrot.lane.b32.xlu1 %v8556_v46, %s8073_s18 }
0x1ff3   : > { %4712 = vrot.lane.b32.xlu1 %v8566_v33, %s8074_s19 }
0x2059   : > { %v7785_v35 = vpop.permute.xlu1 %7784  ;;  %v7780_v38 = vpop.permute.xlu0 %7779 }
0x205a   : > { %v7787_v39 = vunpack.i.h.bf16 %v7785_v35  ;;  %v7786_v40 = vunpack.i.l.bf16 %v7785_v35  ;;  %v7782_v43 = vunpack.i.h.bf16 %v7780_v38  ;;  %v7781_v42 = vunpack.i.l.bf16 %v7780_v38 }
0x205c   : > { %v7543_v7 = vpack.c.bf16 %v7787_v39, %v7786_v40  ;;  %v7533_v5 = vpack.c.bf16 %v7782_v43, %v7781_v42 }
0x205d   : > { %v4348_v44 = vpop.permute.xlu1 %4347  ;;  %v4350_v48 = vpop.permute.xlu0 %4349 }
0x205e   : > { %7535 = vmatprep.subr.msk.bf16.mxu0 %vm8203_vm2, %v7533_v5  ;;  %7545 = vmatprep.subr.msk.bf16.mxu1 %vm8203_vm2, %v7543_v7 }
0x205f   : > { %7199 = vmatprep.mubr.msk.f32.mxu1 %vm327_vm1, %v4348_v44  ;;  %7538 = vmatpush3.bf16.xpose.msk.msra.mxu0 %vm8203_vm2, %v7533_v5 }
0x2060   : > { %7548 = vmatpush3.bf16.xpose.msk.msra.mxu1 %vm8203_vm2, %v7543_v7 }
0x2061   : > { %v7790_v49 = vpop.permute.xlu1 %7789  ;;  %v4711_v56 = vpop.permute.xlu0 %4710 }
0x2062   : > { %v7792_v50 = vunpack.i.h.bf16 %v7790_v49  ;;  %v7791_v52 = vunpack.i.l.bf16 %v7790_v49 }
0x2064   : > { %v7553_v55 = vpack.c.bf16 %v7792_v50, %v7791_v52 }
0x2065   : > { %v4713_v58 = vpop.permute.xlu1 %4712 }
0x2066   : > { %7186 = vmatmul.mubr.msk.f32.vlgmr.msra.gmra.mrb[28].mxu0 %vm327_vm1, %v8566_v33  ;;  %7555 = vmatprep.subr.msk.bf16.mxu1 %vm8203_vm2, %v7553_v55 }
0x2067   : > { %7200 = vmatmul.mubr.msk.f32.vlgmr.msra.gmra.mrb[30].mxu1 %vm327_vm1, %v4350_v48 }
0x2068   : > { %7558 = vmatpush3.bf16.xpose.msk.msra.mxu1 %vm8203_vm2, %v7553_v55  ;;  %7223 = vmatprep.mubr.msk.f32.mxu1 %vm327_vm1, %v4711_v56 }
0x206f   : > { %7224 = vmatmul.mubr.msk.f32.vlgmr.msra.gmra.mrb[32].mxu1 %vm327_vm1, %v4713_v58 }
0x2139   : > { %v7187_v59 = vpop.f32.mrb[28].mxu0 }
0x213a   : > { %v7201_v36 = vpop.f32.mrb[30].mxu1  ;;  %v4228_v62 = vpop.f32.mrb[29].mxu0  ;;  %v4240_v0 = vsel %vm413_vm3, %v7187_v59, -inf }
0x213b   : > { %v4429_v1 = vpop.f32.mrb[31].mxu1  ;;  %4241 = vmax.xlane.f32.xlu1 %v4240_v0  ;;  %v4237_v2 = vsel %vm413_vm3, %v4228_v62, -inf  ;;  %v4441_v8 = vsel %vm413_vm3, %v7201_v36, -inf }
0x213c   : > { %4238 = vmax.xlane.f32.xlu0 %v4237_v2  ;;  %v4438_v3 = vsel %vm413_vm3, %v4429_v1, -inf }
0x2140   : > { %4439 = vmax.xlane.f32.xlu0 %v4438_v3 }
0x2142   : > { %v8599_v4 = vpop.f32.mrb[32].mxu1 }
0x2143   : > { %v8601_v6 = vpop.f32.mrb[33].mxu1  ;;  %v4804_v61 = vsel %vm413_vm3, %v8599_v4, -inf }
0x2144   : > { %4442 = vmax.xlane.f32.xlu0 %v4441_v8  ;;  %v4801_v27 = vsel %vm413_vm3, %v8601_v6, -inf }
0x21c8   : > { %v4242_v10 = vpop.xlane.xlu1 %4241 }
0x21c9   : > { %v4244_v54 = vsub.f32 %v7187_v59, %v4242_v10  ;;  %v4239_v9 = vpop.xlane.xlu0 %4238 }
0x21ca   : > { %v4243_v60 = vsub.f32 %v4228_v62, %v4239_v9  ;;  %v4547_v9 = vld [vmem:[#allocation2 + $0x208] sm:$0xff] }
0x21cb   : > { %v4247_v11 = vmul.f32 1.442695, %v4244_v54 }
0x21cc   : > { %v4245_v12 = vmul.f32 1.442695, %v4243_v60 }
0x21cd   : > { %7943 = vpow2.f32 %v4247_v11  ;;  %v4440_v14 = vpop.xlane.xlu0 %4439 }
0x21ce   : > { %7945 = vpow2.f32 %v4245_v12  ;;  %v4444_v15 = vsub.f32 %v4429_v1, %v4440_v14 }
0x21d0   : > { %v4446_v13 = vmul.f32 1.442695, %v4444_v15 }
0x21d1   : > { %v4443_v17 = vpop.xlane.xlu0 %4442 }
0x21d2   : > { %7947 = vpow2.f32 %v4446_v13  ;;  %v4445_v18 = vsub.f32 %v7201_v36, %v4443_v17 }
0x21d4   : > { %v4448_v20 = vmul.f32 1.442695, %v4445_v18 }
0x21d6   : > { %7949 = vpow2.f32 %v4448_v20 }
0x21d7   : > { %v7944_v37 = vpop.eup %7943 }
0x21d8   : > { %v7946_v21 = vpop.eup %7945  ;;  %v4252_v51 = vsel %vm413_vm3, %v7944_v37, 0.0 }
0x21d9   : > { %4253 = vadd.xlane.f32.xlu0 %v4252_v51  ;;  %v4249_v53 = vsel %vm413_vm3, %v7946_v21, 0.0 }
0x21da   : > { %4250 = vadd.xlane.f32.xlu1 %v4249_v53 }
0x21dc   : > { %v7948_v22 = vpop.eup %7947 }
0x21dd   : > { %v4450_v23 = vsel %vm413_vm3, %v7948_v22, 0.0 }
0x21de   : > { %4451 = vadd.xlane.f32.xlu1 %v4450_v23 }
0x21e0   : > { %v7950_v24 = vpop.eup %7949 }
0x21e1   : > { %v4453_v25 = vsel %vm413_vm3, %v7950_v24, 0.0 }
0x21e2   : > { %4454 = vadd.xlane.f32.xlu0 %v4453_v25 }
0x21ef   : > { %7794 = vrot.lane.b32.xlu1 %v8556_v46, %s8077_s22 }
0x21f3   : > { %7804 = vrot.lane.b32.xlu1 %v8556_v46, %s8076_s21 }
0x21f7   : > { %4994 = vrot.lane.b32.xlu1 %v8558_v32, %s8078_s23 }
0x21f8   : > { %7799 = vrot.lane.b32.xlu0 %v8556_v46, %s8075_s20 }
0x21fc   : > { %4996 = vrot.lane.b32.xlu0 %v8566_v33, %s8078_s23 }
0x221b   : > { %4802 = vmax.xlane.f32.xlu1 %v4801_v27  ;;  %4805 = vmax.xlane.f32.xlu0 %v4804_v61  ;;  %v4910_v27 = vld [vmem:[#allocation2 + $0x210] sm:$0xff] }
0x2266   : > { %v4254_v28 = vpop.xlane.xlu0 %4253 }
0x2267   : > { %v4251_v26 = vpop.xlane.xlu1 %4250 }
0x2268   : > { %7951 = vrcp.f32 %v4251_v26 }
0x2269   : > { %7953 = vrcp.f32 %v4254_v28 }
0x226b   : > { %v4452_v47 = vpop.xlane.xlu1 %4451 }
0x226c   : > { %7955 = vrcp.f32 %v4452_v47 }
0x226f   : > { %v7795_v29 = vpop.permute.xlu1 %7794  ;;  %v4455_v45 = vpop.xlane.xlu0 %4454 }
0x2270   : > { %v7797_v30 = vunpack.i.h.bf16 %v7795_v29  ;;  %v7796_v31 = vunpack.i.l.bf16 %v7795_v29  ;;  %7957 = vrcp.f32 %v4455_v45 }
0x2272   : > { %v7952_v32 = vpop.eup %7951  ;;  %v7539_v33 = vpack.c.bf16 %v7797_v30, %v7796_v31 }
0x2273   : > { %v7954_v35 = vpop.eup %7953  ;;  %v7805_v38 = vpop.permute.xlu1 %7804  ;;  %v4257_v40 = vmul.f32 %v7952_v32, %v7946_v21 }
0x2274   : > { %v7800_v39 = vpop.permute.xlu0 %7799  ;;  %v7807_v43 = vunpack.i.h.bf16 %v7805_v38  ;;  %v7806_v42 = vunpack.i.l.bf16 %v7805_v38  ;;  %7540 = vmatprep.subr.bf16.mxu0 %v7539_v33  ;;  %v4258_v48 = vmul.f32 %v7954_v35, %v7944_v37 }
0x2275   : > { %v7802_v7 = vunpack.i.h.bf16 %v7800_v39  ;;  %v7801_v5 = vunpack.i.l.bf16 %v7800_v39  ;;  %7542 = vmatpush3.bf16.msra.mxu0 %v7539_v33  ;;  %7192 = vmatprep.mubr.msk.f32.mxu0 %vm413_vm3, %v4257_v40 }
0x2276   : > { %v7956_v44 = vpop.eup %7955  ;;  %v7563_v49 = vpack.c.bf16 %v7807_v43, %v7806_v42 }
0x2277   : > { %v7549_v50 = vpack.c.bf16 %v7802_v7, %v7801_v5  ;;  %v4995_v52 = vpop.permute.xlu1 %4994  ;;  %v4458_v55 = vmul.f32 %v7956_v44, %v7948_v22  ;;  %v5194_v44 = vld [vmem:[#allocation2 + $0x218] sm:$0xff] }
0x2278   : > { %7193 = vmatmul.mubr.msk.f32.vlgmr.msra.gmra.mrb[30].mxu0 %vm413_vm3, %v4258_v48  ;;  %7565 = vmatprep.subr.msk.bf16.mxu1 %vm8203_vm2, %v7563_v49  ;;  %v4997_v59 = vpop.permute.xlu0 %4996 }
0x2279   : > { %7550 = vmatprep.subr.bf16.mxu0 %v7549_v50  ;;  %7242 = vmatprep.mubr.msk.f32.mxu1 %vm327_vm1, %v4995_v52 }
0x227a   : > { %v7958_v56 = vpop.eup %7957  ;;  %7552 = vmatpush3.bf16.msra.mxu0 %v7549_v50  ;;  %7206 = vmatprep.mubr.msk.f32.mxu0 %vm413_vm3, %v4458_v55 }
0x227b   : > { %v4459_v58 = vmul.f32 %v7958_v56, %v7950_v24  ;;  %7568 = vmatpush3.bf16.xpose.msk.msra.mxu1 %vm8203_vm2, %v7563_v49  ;;  %7209 = vmatprep.subr.mxu0 %v4547_v9  ;;  %v6582_v56 = vld [vmem:[%s8779_s2 + $0x14] ss:$0 sm:$0xff] }
0x227d   : > { %7207 = vmatmul.mubr.msk.f32.vlgmr.msra.gmra.mrb[32].mxu0 %vm413_vm3, %v4459_v58 }
0x227e   : > { %7210 = vmatpush3.msra.mxu0 %v4547_v9 }
0x2282   : > { %7243 = vmatmul.mubr.msk.f32.vlgmr.msra.gmra.mrb[34].mxu1 %vm327_vm1, %v4997_v59 }
0x22a8   : > { %v4803_v36 = vpop.xlane.xlu1 %4802  ;;  %v4806_v62 = vpop.xlane.xlu0 %4805 }
0x22a9   : > { %v4807_v0 = vsub.f32 %v8601_v6, %v4803_v36  ;;  %v4808_v1 = vsub.f32 %v8599_v4, %v4806_v62  ;;  %v4346_v6 = vld [vmem:[#allocation2 + $0x200] sm:$0xff] }
0x22aa   : > { %7214 = vmatprep.subr.mxu0 %v4346_v6 }
0x22ab   : > { %v4809_v2 = vmul.f32 1.442695, %v4807_v0  ;;  %v4811_v3 = vmul.f32 1.442695, %v4808_v1 }
0x22ad   : > { %7959 = vpow2.f32 %v4809_v2 }
0x22ae   : > { %7961 = vpow2.f32 %v4811_v3 }
0x22b7   : > { %v7960_v8 = vpop.eup %7959 }
0x22b8   : > { %v7962_v10 = vpop.eup %7961  ;;  %v4813_v19 = vsel %vm413_vm3, %v7960_v8, 0.0 }
0x22b9   : > { %4814 = vadd.xlane.f32.xlu0 %v4813_v19  ;;  %v4816_v54 = vsel %vm413_vm3, %v7962_v10, 0.0 }
0x22ba   : > { %4817 = vadd.xlane.f32.xlu1 %v4816_v54 }
0x22cf   : > { %7809 = vrot.lane.b32.xlu0 %v8556_v46, %s8079_s24 }
0x2346   : > { %v4815_v4 = vpop.xlane.xlu0 %4814 }
0x2347   : > { %v4818_v14 = vpop.xlane.xlu1 %4817  ;;  %7963 = vrcp.f32 %v4815_v4 }
0x2348   : > { %7965 = vrcp.f32 %v4818_v14 }
0x234a   : > { %v7810_v11 = vpop.permute.xlu0 %7809 }
0x234b   : > { %v7194_v60 = vpop.f32.mrb[30].mxu0  ;;  %v7812_v15 = vunpack.i.h.bf16 %v7810_v11  ;;  %v7811_v13 = vunpack.i.l.bf16 %v7810_v11 }
0x234c   : > { %v4337_v12 = vpop.f32.mrb[31].mxu0 }
0x234d   : > { %v7559_v20 = vpack.c.bf16 %v7812_v15, %v7811_v13  ;;  %v5329_v15 = vld [vmem:[#allocation2 + $0x230] sm:$0xff]  ;;  %v5330_v13 = vld [vmem:[#allocation2 + $0x238] sm:$0xff] }
0x2350   : > { %v7208_v17 = vpop.f32.mrb[32].mxu0 }
0x2351   : > { %v4538_v18 = vpop.f32.mrb[33].mxu0  ;;  %v7964_v53 = vpop.eup %7963 }
0x2352   : > { %7211 = vmatprep.mubr.msk.f32.mxu0 %vm327_vm1, %v4538_v18  ;;  %v7966_v22 = vpop.eup %7965  ;;  %v4821_v24 = vmul.f32 %v7964_v53, %v7960_v8 }
0x2353   : > { %7212 = vmatmul.mubr.msk.f32.vlgmr.msra.gmra.mrb[34].mxu0 %vm327_vm1, %v7208_v17  ;;  %v4822_v25 = vmul.f32 %v7966_v22, %v7962_v10  ;;  %v7577_v17 = vpack.c.bf16 %v5330_v13, %v5329_v15 }
0x2354   : > { %7215 = vmatpush3.msra.mxu0 %v4346_v6  ;;  %7216 = vmatprep.mubr.msk.f32.mxu0 %vm327_vm1, %v4337_v12  ;;  %v5328_v12 = vld [vmem:[#allocation2 + $0x228] sm:$0xff] }
0x2355   : > { %v7244_v37 = vpop.f32.mrb[34].mxu1  ;;  %7560 = vmatprep.subr.bf16.mxu0 %v7559_v20 }
0x2356   : > { %v5076_v21 = vpop.f32.mrb[35].mxu1  ;;  %v5088_v23 = vsel %vm413_vm3, %v7244_v37, -inf }
0x2357   : > { %v5085_v51 = vsel %vm413_vm3, %v5076_v21, -inf }
0x2358   : > { %5086 = vmax.xlane.f32.xlu1 %v5085_v51 }
0x235b   : > { %7217 = vmatmul.mubr.msk.f32.vlgmr.msra.gmra.mrb[34].mxu0 %vm327_vm1, %v7194_v60 }
0x235c   : > { %5089 = vmax.xlane.f32.xlu1 %v5088_v23  ;;  %7562 = vmatpush3.bf16.msra.mxu0 %v7559_v20  ;;  %v6583_v23 = vld [vmem:[%s8779_s2 + $0x17] ss:$0 sm:$0xff] }
0x235d   : > { %7230 = vmatprep.mubr.msk.f32.mxu0 %vm413_vm3, %v4821_v24  ;;  %7233 = vmatprep.subr.mxu0 %v4910_v27 }
0x235f   : > { %7231 = vmatmul.mubr.msk.f32.vlgmr.msra.gmra.mrb[36].mxu0 %vm413_vm3, %v4822_v25  ;;  %v6584_v25 = vld [vmem:[%s8779_s2 + $0x18] ss:$0 sm:$0xff] }
0x2360   : > { %7234 = vmatpush3.msra.mxu0 %v4910_v27 }
0x23e5   : > { %v5087_v61 = vpop.xlane.xlu1 %5086 }
0x23e6   : > { %v5091_v28 = vsub.f32 %v5076_v21, %v5087_v61 }
0x23e8   : > { %v5093_v29 = vmul.f32 1.442695, %v5091_v28 }
0x23e9   : > { %v5090_v26 = vpop.xlane.xlu1 %5089 }
0x23ea   : > { %v5092_v47 = vsub.f32 %v7244_v37, %v5090_v26 }
0x23ec   : > { %v5095_v45 = vmul.f32 1.442695, %v5092_v47 }
0x23ee   : > { %7967 = vpow2.f32 %v5095_v45  ;;  %v5469_v45 = vld [vmem:[#allocation2 + $0x240] sm:$0xff] }
0x23ef   : > { %7969 = vpow2.f32 %v5093_v29 }
0x23f8   : > { %v7968_v30 = vpop.eup %7967 }
0x23f9   : > { %v5100_v31 = vsel %vm413_vm3, %v7968_v30, 0.0  ;;  %v7970_v32 = vpop.eup %7969 }
0x23fa   : > { %5101 = vadd.xlane.f32.xlu1 %v5100_v31  ;;  %v5097_v33 = vsel %vm413_vm3, %v7970_v32, 0.0 }
0x23fe   : > { %5098 = vadd.xlane.f32.xlu1 %v5097_v33  ;;  %v5472_v33 = vld [vmem:[#allocation2 + $0x258] sm:$0xff] }
0x240f   : > { %7814 = vrot.lane.b32.xlu1 %v8556_v46, %s8080_s25 }
0x2432   : > { %v7232_v35 = vpop.f32.mrb[36].mxu0 }
0x2433   : > { %v4901_v38 = vpop.f32.mrb[37].mxu0 }
0x2434   : > { %7235 = vmatprep.mubr.msk.f32.mxu0 %vm327_vm1, %v4901_v38  ;;  %v5473_v38 = vld [vmem:[#allocation2 + $0x260] sm:$0xff] }
0x2435   : > { %7236 = vmatmul.mubr.msk.f32.vlgmr.msra.gmra.mrb[34].mxu0 %vm327_vm1, %v7232_v35 }
0x2487   : > { %v5102_v39 = vpop.xlane.xlu1 %5101 }
0x2488   : > { %7971 = vrcp.f32 %v5102_v39  ;;  %v5474_v39 = vld [vmem:[#allocation2 + $0x268] sm:$0xff] }
0x248b   : > { %v5099_v40 = vpop.xlane.xlu1 %5098 }
0x248c   : > { %7973 = vrcp.f32 %v5099_v40  ;;  %v7589_v40 = vpack.c.bf16 %v5474_v39, %v5473_v38 }
0x248f   : > { %v7815_v43 = vpop.permute.xlu1 %7814 }
0x2490   : > { %v7817_v42 = vunpack.i.h.bf16 %v7815_v43  ;;  %v7816_v7 = vunpack.i.l.bf16 %v7815_v43  ;;  %v5475_v43 = vld [vmem:[#allocation2 + $0x270] sm:$0xff] }
0x2492   : > { %v7569_v5 = vpack.c.bf16 %v7817_v42, %v7816_v7  ;;  %v7972_v48 = vpop.eup %7971  ;;  %v5476_v42 = vld [vmem:[#allocation2 + $0x278] sm:$0xff] }
0x2493   : > { %v5106_v50 = vmul.f32 %v7972_v48, %v7968_v30  ;;  %v5470_v30 = vld [vmem:[#allocation2 + $0x248] sm:$0xff]  ;;  %v7593_v7 = vpack.c.bf16 %v5476_v42, %v5475_v43 }
0x2494   : > { %7570 = vmatprep.subr.bf16.mxu0 %v7569_v5  ;;  %v7581_v31 = vpack.c.bf16 %v5470_v30, %v5469_v45 }
0x2495   : > { %7572 = vmatpush3.bf16.msra.mxu0 %v7569_v5  ;;  %v6585_v5 = vld [vmem:[%s8779_s2 + $0x15] ss:$0 sm:$0xff] }
0x2496   : > { %v7974_v49 = vpop.eup %7973  ;;  %7252 = vmatprep.subr.mxu0 %v5194_v44 }
0x2497   : > { %v5105_v46 = vmul.f32 %v7974_v49, %v7970_v32  ;;  %v5471_v32 = vld [vmem:[#allocation2 + $0x250] sm:$0xff] }
0x2498   : > { %v7585_v35 = vpack.c.bf16 %v5472_v33, %v5471_v32 }
0x2499   : > { %7249 = vmatprep.mubr.msk.f32.mxu0 %vm413_vm3, %v5105_v46 }
0x249a   : > { %7250 = vmatmul.mubr.msk.f32.vlgmr.msra.gmra.mrb[38].mxu0 %vm413_vm3, %v5106_v50 }
0x249b   : > { %7253 = vmatpush3.msra.mxu0 %v5194_v44 }
0x249c   : > { %7582 = vmatprep.subr.bf16.mxu0 %v7581_v31 }
0x256d   : > { %v7251_v52 = vpop.f32.mrb[38].mxu0 }
0x256e   : > { %v5185_v55 = vpop.f32.mrb[39].mxu0 }
0x256f   : > { %7254 = vmatprep.mubr.msk.f32.mxu0 %vm327_vm1, %v5185_v55 }
0x2570   : > { %7255 = vmatmul.mubr.msk.f32.vlgmr.msra.gmra.mrb[34].mxu0 %vm327_vm1, %v7251_v52 }
0x2571   : > { %7584 = vmatpush3.bf16.msra.mxu0 %v7581_v31 }
0x2572   : > { %7586 = vmatprep.subr.bf16.mxu0 %v7585_v35 }
0x2575   : > { %7588 = vmatpush3.bf16.msra.mxu0 %v7585_v35 }
0x2576   : > { %7590 = vmatprep.subr.bf16.mxu0 %v7589_v40 }
0x2579   : > { %7592 = vmatpush3.bf16.msra.mxu0 %v7589_v40  ;;  %v6588_v40 = vld [vmem:[%s8779_s2 + $0x16] ss:$0 sm:$0xff] }
0x257a   : > { %7594 = vmatprep.subr.bf16.mxu0 %v7593_v7 }
0x257d   : > { %7596 = vmatpush3.bf16.msra.mxu0 %v7593_v7 }
0x2643   : > { %v7256_v58 = vpop.f32.mrb[34].mxu0 }
0x2644   : > { %v5284_v59 = vadd.f32 %v7256_v58, %v6582_v56  ;;  %v5267_v36 = vpop.f32.mrb[35].mxu0 }
0x2645   : > { %v5283_v62 = vadd.f32 %v6582_v56, %v5267_v36 }
0x2646   : > { %v5286_v0 = vadd.f32 %v5284_v59, %v8547_v63 }
0x2647   : > { %v5285_v1 = vadd.f32 %v5283_v62, %v8545_v41  ;;  %v5327_v41 = vld [vmem:[#allocation2 + $0x220] sm:$0xff] }
0x2648   : > { %v5292_v2 = vsel %vm237_vm0, %v5286_v0, 0.0  ;;  %v7573_v14 = vpack.c.bf16 %v5328_v12, %v5327_v41 }
0x2649   : > { %5293 = vadd.xlane.f32.xlu1 %v5292_v2  ;;  %v5289_v3 = vsel %vm237_vm0, %v5285_v1, 0.0 }
0x264a   : > { %5290 = vadd.xlane.f32.xlu0 %v5289_v3  ;;  %7574 = vmatprep.subr.bf16.mxu1 %v7573_v14 }
0x264b   : > { %7576 = vmatpush3.bf16.msra.mxu1 %v7573_v14 }
0x264c   : > { %7578 = vmatprep.subr.bf16.mxu1 %v7577_v17 }
0x264f   : > { %7580 = vmatpush3.bf16.msra.mxu1 %v7577_v17 }
0x26d6   : > { %v5294_v8 = vpop.xlane.xlu1 %5293 }
0x26d7   : > { %v5296_v10 = vmul.f32 0.03125, %v5294_v8  ;;  %v5291_v19 = vpop.xlane.xlu0 %5290 }
0x26d8   : > { %v5295_v54 = vmul.f32 0.03125, %v5291_v19 }
0x26d9   : > { %v5298_v9 = vsub.f32 %v5286_v0, %v5296_v10 }
0x26da   : > { %v5297_v6 = vsub.f32 %v5285_v1, %v5295_v54 }
0x26db   : > { %v5300_v11 = vmul.f32 %v5298_v9, %v5298_v9 }
0x26dc   : > { %v5299_v4 = vmul.f32 %v5297_v6, %v5297_v6 }
0x26dd   : > { %v5304_v63 = vsel %vm237_vm0, %v5300_v11, 0.0 }
0x26de   : > { %v5301_v60 = vsel %vm237_vm0, %v5299_v4, 0.0 }
0x26df   : > { %5302 = vadd.xlane.f32.xlu0 %v5301_v60 }
0x26e3   : > { %5305 = vadd.xlane.f32.xlu0 %v5304_v63 }
0x276c   : > { %v5303_v18 = vpop.xlane.xlu0 %5302 }
0x276d   : > { %v5307_v20 = vmul.f32 0.03125, %v5303_v18 }
0x276f   : > { %v5309_v37 = vadd.f32 1e-05, %v5307_v20 }
0x2770   : > { %v5306_v21 = vpop.xlane.xlu0 %5305 }
0x2771   : > { %7975 = vrsqrt.f32 %v5309_v37  ;;  %v5308_v51 = vmul.f32 0.03125, %v5306_v21 }
0x2773   : > { %v5310_v53 = vadd.f32 1e-05, %v5308_v51 }
0x2775   : > { %7977 = vrsqrt.f32 %v5310_v53 }
0x277b   : > { %v7976_v22 = vpop.eup %7975 }
0x277c   : > { %v5313_v24 = vmul.f32 %v7976_v22, %v5297_v6 }
0x277e   : > { %v5319_v27 = vmul.f32 %v6583_v23, %v5313_v24 }
0x277f   : > { %v7978_v61 = vpop.eup %7977 }
0x2780   : > { %v5314_v28 = vmul.f32 %v7978_v61, %v5298_v9  ;;  %v8671_v26 = vadd.f32 %v6584_v25, %v5319_v27 }
0x2782   : > { %v5320_v47 = vmul.f32 %v6583_v23, %v5314_v28  ;;  %7265 = vmatprep.mubr.msk.f32.mxu1 %vm237_vm0, %v8671_v26 }
0x2784   : > { %v8675_v29 = vadd.f32 %v6584_v25, %v5320_v47 }
0x2786   : > { %7266 = vmatmul.mubr.msk.f32.vlgmr.msra.gmra.mrb[36].mxu1 %vm237_vm0, %v8675_v29 }
0x2859   : > { %v7267_v44 = vpop.f32.mrb[36].mxu1 }
0x285a   : > { %v5414_v48 = vadd.f32 %v7267_v44, %v6585_v5  ;;  %v5408_v49 = vpop.f32.mrb[37].mxu1 }
0x285b   : > { %v5409_v46 = vadd.f32 %v6585_v5, %v5408_v49 }
0x285c   : > { %v5420_v50 = vmul.f32 0.70710677, %v5414_v48  ;;  %v5418_v35 = vmul.f32 0.5, %v5414_v48 }
0x285d   : > { %v5419_v52 = vmul.f32 0.70710677, %v5409_v46  ;;  %v5417_v32 = vmul.f32 0.5, %v5409_v46 }
0x285e   : > { %v5426_v55 = vand.u32 2147483647, %v5420_v50  ;;  %vm5422_vm1 = vcmp.ge.f32.partialorder %v5420_v50, 0.0 }
0x285f   : > { %v5425_v56 = vand.u32 2147483647, %v5419_v52  ;;  %vm5421_vm2 = vcmp.ge.f32.partialorder %v5419_v52, 0.0  ;;  %v5424_v61 = vsel %vm5422_vm1, 1.0, %v8081_v57 }
0x2860   : > { %v5428_v58 = vmul.f32 0.3275911, %v5426_v55  ;;  %v5452_v0 = vsub.f32 0.0, %v5426_v55  ;;  %v5423_v45 = vsel %vm5421_vm2, 1.0, %v8081_v57 }
0x2861   : > { %v5427_v59 = vmul.f32 0.3275911, %v5425_v56  ;;  %v5451_v1 = vsub.f32 0.0, %v5425_v56 }
0x2862   : > { %v5430_v36 = vadd.f32 1.0, %v5428_v58  ;;  %v5454_v3 = vmul.f32 %v5452_v0, %v5426_v55 }
0x2863   : > { %v5429_v62 = vadd.f32 1.0, %v5427_v59  ;;  %v5453_v19 = vmul.f32 %v5451_v1, %v5425_v56  ;;  %v5658_v1 = vld [vmem:[#allocation2 + $0x288] sm:$0xff] }
0x2864   : > { %7979 = vrcp.f32 %v5430_v36  ;;  %v5457_v6 = vmul.f32 1.442695, %v5454_v3 }
0x2865   : > { %7981 = vrcp.f32 %v5429_v62  ;;  %v5455_v11 = vmul.f32 1.442695, %v5453_v19  ;;  %v5799_v19 = vld [vmem:[#allocation2 + $0x2a0] sm:$0xff] }
0x2866   : > { %7983 = vpow2.f32 %v5457_v6 }
0x2867   : > { %7985 = vpow2.f32 %v5455_v11 }
0x286e   : > { %v7980_v2 = vpop.eup %7979 }
0x286f   : > { %v7982_v8 = vpop.eup %7981  ;;  %v5434_v10 = vmul.f32 1.0614054, %v7980_v2 }
0x2870   : > { %v5433_v54 = vmul.f32 1.0614054, %v7982_v8  ;;  %v7984_v53 = vpop.eup %7983 }
0x2871   : > { %v5436_v9 = vadd.f32 -1.4531521, %v5434_v10  ;;  %v7986_v23 = vpop.eup %7985 }
0x2872   : > { %v5435_v4 = vadd.f32 -1.4531521, %v5433_v54  ;;  %v5800_v54 = vld [vmem:[#allocation2 + $0x2a8] sm:$0xff] }
0x2873   : > { %v5438_v60 = vmul.f32 %v7980_v2, %v5436_v9  ;;  %v8695_v9 = vpack.c.bf16 %v5800_v54, %v5799_v19 }
0x2874   : > { %v5437_v63 = vmul.f32 %v7982_v8, %v5435_v4 }
0x2875   : > { %v5440_v41 = vadd.f32 1.4214138, %v5438_v60 }
0x2876   : > { %v5439_v12 = vadd.f32 1.4214138, %v5437_v63 }
0x2877   : > { %v5442_v14 = vmul.f32 %v7980_v2, %v5440_v41 }
0x2878   : > { %v5441_v15 = vmul.f32 %v7982_v8, %v5439_v12 }
0x2879   : > { %v5444_v13 = vadd.f32 -0.28449672, %v5442_v14  ;;  %v6591_v14 = vld [vmem:[%s8779_s2 + $0x19] ss:$0 sm:$0xff] }
0x287a   : > { %v5443_v17 = vadd.f32 -0.28449672, %v5441_v15 }
0x287b   : > { %v5446_v18 = vmul.f32 %v7980_v2, %v5444_v13  ;;  %v6592_v13 = vld [vmem:[%s8779_s2 + $0x1a] ss:$0 sm:$0xff] }
0x287c   : > { %v5445_v20 = vmul.f32 %v7982_v8, %v5443_v17 }
0x287d   : > { %v5448_v37 = vadd.f32 0.2548296, %v5446_v18 }
0x287e   : > { %v5447_v21 = vadd.f32 0.2548296, %v5445_v20 }
0x287f   : > { %v5450_v51 = vmul.f32 %v7980_v2, %v5448_v37  ;;  %v5659_v2 = vld [vmem:[#allocation2 + $0x290] sm:$0xff] }
0x2880   : > { %v5449_v22 = vmul.f32 %v7982_v8, %v5447_v21  ;;  %v5660_v8 = vld [vmem:[#allocation2 + $0x298] sm:$0xff] }
0x2881   : > { %v5460_v24 = vmul.f32 %v7984_v53, %v5450_v51  ;;  %v7601_v10 = vpack.c.bf16 %v5660_v8, %v5659_v2 }
0x2882   : > { %v5459_v25 = vmul.f32 %v7986_v23, %v5449_v22 }
0x2883   : > { %v5462_v27 = vsub.f32 1.0, %v5460_v24 }
0x2884   : > { %v5461_v28 = vsub.f32 1.0, %v5459_v25 }
0x2885   : > { %v5464_v47 = vmul.f32 %v5462_v27, %v5424_v61 }
0x2886   : > { %v5463_v30 = vmul.f32 %v5461_v28, %v5423_v45 }
0x2887   : > { %v5466_v31 = vadd.f32 1.0, %v5464_v47 }
0x2888   : > { %v5465_v33 = vadd.f32 1.0, %v5463_v30 }
0x2889   : > { %v5468_v39 = vmul.f32 %v5466_v31, %v5418_v35 }
0x288a   : > { %v5467_v38 = vmul.f32 %v5465_v33, %v5417_v32 }
0x288c   : > { %7284 = vmatprep.mubr.msk.f32.mxu0 %vm1660_vm6, %v5467_v38 }
0x288d   : > { %7285 = vmatmul.mubr.msk.f32.vlgmr.msra.gmra.mrb[40].mxu0 %vm1660_vm6, %v5468_v39 }
0x2960   : > { %v7286_v43 = vpop.f32.mrb[40].mxu0 }
0x2961   : > { %v5554_v42 = vpop.f32.mrb[41].mxu0  ;;  %v5560_v7 = vadd.f32 %v7286_v43, %v6588_v40 }
0x2962   : > { %v5555_v5 = vadd.f32 %v6588_v40, %v5554_v42 }
0x2963   : > { %v5564_v49 = vadd.f32 %v5560_v7, %v8675_v29  ;;  %v5657_v29 = vld [vmem:[#allocation2 + $0x280] sm:$0xff] }
0x2964   : > { %v5563_v44 = vadd.f32 %v5555_v5, %v8671_v26  ;;  %v7597_v3 = vpack.c.bf16 %v5658_v1, %v5657_v29 }
0x2965   : > { %v5570_v46 = vsel %vm237_vm0, %v5564_v49, 0.0 }
0x2966   : > { %v5567_v48 = vsel %vm237_vm0, %v5563_v44, 0.0  ;;  %7598 = vmatprep.subr.bf16.mxu1 %v7597_v3 }
0x2967   : > { %5568 = vadd.xlane.f32.xlu0 %v5567_v48  ;;  %7600 = vmatpush3.bf16.msra.mxu1 %v7597_v3 }
0x2968   : > { %7602 = vmatprep.subr.bf16.mxu1 %v7601_v10 }
0x296b   : > { %5571 = vadd.xlane.f32.xlu0 %v5570_v46  ;;  %7604 = vmatpush3.bf16.msra.mxu1 %v7601_v10 }
0x296c   : > { %7606 = vmatprep.subr.bf16.mxu1 %v8695_v9 }
0x29f4   : > { %v5569_v50 = vpop.xlane.xlu0 %5568 }
0x29f5   : > { %v5573_v52 = vmul.f32 0.03125, %v5569_v50 }
0x29f7   : > { %v5575_v55 = vsub.f32 %v5563_v44, %v5573_v52 }
0x29f8   : > { %v5572_v56 = vpop.xlane.xlu0 %5571 }
0x29f9   : > { %v5574_v58 = vmul.f32 0.03125, %v5572_v56  ;;  %v5577_v59 = vmul.f32 %v5575_v55, %v5575_v55 }
0x29fb   : > { %v5576_v36 = vsub.f32 %v5564_v49, %v5574_v58  ;;  %v5579_v62 = vsel %vm237_vm0, %v5577_v59, 0.0 }
0x29fc   : > { %5580 = vadd.xlane.f32.xlu0 %v5579_v62 }
0x29fd   : > { %v5578_v0 = vmul.f32 %v5576_v36, %v5576_v36 }
0x29ff   : > { %v5582_v26 = vsel %vm237_vm0, %v5578_v0, 0.0 }
0x2a00   : > { %5583 = vadd.xlane.f32.xlu1 %v5582_v26 }
0x2a89   : > { %v5581_v6 = vpop.xlane.xlu0 %5580 }
0x2a8a   : > { %v5585_v4 = vmul.f32 0.03125, %v5581_v6 }
0x2a8c   : > { %v5587_v60 = vadd.f32 1e-05, %v5585_v4 }
0x2a8d   : > { %v5584_v11 = vpop.xlane.xlu1 %5583 }
0x2a8e   : > { %7987 = vrsqrt.f32 %v5587_v60  ;;  %v5586_v63 = vmul.f32 0.03125, %v5584_v11  ;;  %v5801_v11 = vld [vmem:[#allocation2 + $0x2b0] sm:$0xff] }
0x2a90   : > { %v5588_v41 = vadd.f32 1e-05, %v5586_v63  ;;  %v5802_v63 = vld [vmem:[#allocation2 + $0x2b8] sm:$0xff] }
0x2a92   : > { %7989 = vrsqrt.f32 %v5588_v41 }
0x2a98   : > { %v7988_v12 = vpop.eup %7987 }
0x2a99   : > { %v5591_v15 = vmul.f32 %v7988_v12, %v5575_v55 }
0x2a9b   : > { %v5597_v17 = vmul.f32 %v6591_v14, %v5591_v15  ;;  %v7609_v15 = vpack.c.bf16 %v5802_v63, %v5801_v11 }
0x2a9c   : > { %v7990_v18 = vpop.eup %7989 }
0x2a9d   : > { %v5592_v20 = vmul.f32 %v7990_v18, %v5576_v36  ;;  %v5603_v37 = vadd.f32 %v6592_v13, %v5597_v17  ;;  %v5936_v17 = vld [vmem:[#allocation2 + $0x2c8] sm:$0xff] }
0x2a9f   : > { %v5598_v21 = vmul.f32 %v6591_v14, %v5592_v20  ;;  %v5607_v51 = vmul.f32 0.70710677, %v5603_v37  ;;  %v5605_v10 = vmul.f32 0.5, %v5603_v37  ;;  %v5937_v20 = vld [vmem:[#allocation2 + $0x2d0] sm:$0xff]  ;;  %v5938_v37 = vld [vmem:[#allocation2 + $0x2d8] sm:$0xff] }
0x2aa1   : > { %v5604_v53 = vadd.f32 %v6592_v13, %v5598_v21  ;;  %v5613_v22 = vand.u32 2147483647, %v5607_v51  ;;  %vm5609_vm6 = vcmp.ge.f32.partialorder %v5607_v51, 0.0  ;;  %v5935_v13 = vld [vmem:[#allocation2 + $0x2c0] sm:$0xff]  ;;  %v7617_v21 = vpack.c.bf16 %v5938_v37, %v5937_v20 }
0x2aa2   : > { %v5611_v2 = vsel %vm5609_vm6, 1.0, %v8081_v57  ;;  %v7613_v18 = vpack.c.bf16 %v5936_v17, %v5935_v13  ;;  %v8083_v51 = vmov 0.0|0.0  }
0x2aa3   : > { %v5608_v23 = vmul.f32 0.70710677, %v5604_v53  ;;  %v5615_v24 = vmul.f32 0.3275911, %v5613_v22  ;;  %v5639_v47 = vsub.f32 0.0, %v5613_v22  ;;  %v5606_v41 = vmul.f32 0.5, %v5604_v53 }
0x2aa4   : > { %7614 = vmatprep.subr.bf16.mxu0 %v7613_v18 }
0x2aa5   : > { %v5614_v25 = vand.u32 2147483647, %v5608_v23  ;;  %v5617_v27 = vadd.f32 1.0, %v5615_v24  ;;  %v5641_v31 = vmul.f32 %v5639_v47, %v5613_v22  ;;  %vm5610_vm10 = vcmp.ge.f32.partialorder %v5608_v23, 0.0  ;;  %7616 = vmatpush3.bf16.msra.mxu0 %v7613_v18 }
0x2aa6   : > { %v5612_v6 = vsel %vm5610_vm10, 1.0, %v8081_v57  ;;  %7618 = vmatprep.subr.bf16.mxu0 %v7617_v21 }
0x2aa7   : > { %v5616_v61 = vmul.f32 0.3275911, %v5614_v25  ;;  %7991 = vrcp.f32 %v5617_v27  ;;  %v5640_v30 = vsub.f32 0.0, %v5614_v25  ;;  %v5643_v39 = vmul.f32 1.442695, %v5641_v31 }
0x2aa9   : > { %v5618_v28 = vadd.f32 1.0, %v5616_v61  ;;  %v5642_v38 = vmul.f32 %v5640_v30, %v5614_v25  ;;  %7620 = vmatpush3.bf16.msra.mxu0 %v7617_v21 }
0x2aab   : > { %7993 = vrcp.f32 %v5618_v28  ;;  %v5645_v5 = vmul.f32 1.442695, %v5642_v38  ;;  %v6596_v28 = vld [vmem:[%s8779_s2 + $0x1c] ss:$0 sm:$0xff] }
0x2aac   : > { %7995 = vpow2.f32 %v5643_v39 }
0x2aad   : > { %7997 = vpow2.f32 %v5645_v5 }
0x2ab1   : > { %v7992_v45 = vpop.eup %7991 }
0x2ab2   : > { %v5621_v32 = vmul.f32 1.0614054, %v7992_v45 }
0x2ab4   : > { %v5623_v33 = vadd.f32 -1.4531521, %v5621_v32 }
0x2ab5   : > { %v7994_v35 = vpop.eup %7993 }
0x2ab6   : > { %v5625_v40 = vmul.f32 %v7992_v45, %v5623_v33  ;;  %v5622_v43 = vmul.f32 1.0614054, %v7994_v35  ;;  %v7996_v36 = vpop.eup %7995 }
0x2ab7   : > { %v7998_v1 = vpop.eup %7997 }
0x2ab8   : > { %v5627_v42 = vadd.f32 1.4214138, %v5625_v40  ;;  %v5624_v7 = vadd.f32 -1.4531521, %v5622_v43 }
0x2aba   : > { %v5629_v44 = vmul.f32 %v7992_v45, %v5627_v42  ;;  %v5626_v49 = vmul.f32 %v7994_v35, %v5624_v7 }
0x2abc   : > { %v5631_v48 = vadd.f32 -0.28449672, %v5629_v44  ;;  %v5628_v46 = vadd.f32 1.4214138, %v5626_v49 }
0x2abe   : > { %v5633_v50 = vmul.f32 %v7992_v45, %v5631_v48  ;;  %v5630_v52 = vmul.f32 %v7994_v35, %v5628_v46 }
0x2ac0   : > { %v5635_v55 = vadd.f32 0.2548296, %v5633_v50  ;;  %v5632_v56 = vadd.f32 -0.28449672, %v5630_v52 }
0x2ac2   : > { %v5637_v58 = vmul.f32 %v7992_v45, %v5635_v55  ;;  %v5634_v59 = vmul.f32 %v7994_v35, %v5632_v56 }
0x2ac4   : > { %v5647_v62 = vmul.f32 %v7996_v36, %v5637_v58  ;;  %v5636_v0 = vadd.f32 0.2548296, %v5634_v59 }
0x2ac6   : > { %v5649_v26 = vsub.f32 1.0, %v5647_v62  ;;  %v5638_v29 = vmul.f32 %v7994_v35, %v5636_v0 }
0x2ac8   : > { %v5651_v3 = vmul.f32 %v5649_v26, %v5611_v2  ;;  %v5648_v8 = vmul.f32 %v7998_v1, %v5638_v29 }
0x2aca   : > { %v5653_v19 = vadd.f32 1.0, %v5651_v3  ;;  %v5650_v54 = vsub.f32 1.0, %v5648_v8 }
0x2acc   : > { %v5655_v4 = vmul.f32 %v5653_v19, %v5605_v10  ;;  %v5652_v60 = vmul.f32 %v5650_v54, %v5612_v6 }
0x2ace   : > { %7295 = vmatprep.mubr.msk.f32.mxu1 %vm237_vm0, %v5655_v4  ;;  %v5654_v12 = vadd.f32 1.0, %v5652_v60 }
0x2ad0   : > { %v5656_v14 = vmul.f32 %v5654_v12, %v5606_v41 }
0x2ad2   : > { %7296 = vmatmul.mubr.msk.f32.vlgmr.msra.gmra.mrb[38].mxu1 %vm237_vm0, %v5656_v14 }
0x2ad3   : > { %7608 = vmatpush3.bf16.msra.mxu1 %v8695_v9  ;;  %7306 = vmatprep.mubr.msk.f32.mxu1 %vm237_vm0, %v5655_v4  ;;  %v6593_v9 = vld [vmem:[%s8779_s2 + $0x1b] ss:$0 sm:$0xff] }
0x2ad4   : > { %7610 = vmatprep.subr.bf16.mxu1 %v7609_v15 }
0x2ad7   : > { %7612 = vmatpush3.bf16.msra.mxu1 %v7609_v15 }
0x2ad8   : > { %7621 = vmatprep.subr.bf16.mxu1 %v8083_v51 }
0x2ada   : > { %7307 = vmatmul.mubr.msk.f32.vlgmr.msra.gmra.mrb[40].mxu1 %vm237_vm0, %v5656_v14 }
0x2adb   : > { %7324 = vmatprep.mubr.msk.f32.mxu1 %vm8084_vm11, %v8082_v16 }
0x2ba5   : > { %v7297_v53 = vpop.f32.mrb[38].mxu1 }
0x2ba6   : > { %v8715_v22 = vadd.f32 %v7297_v53, %v6593_v9  ;;  %v5738_v23 = vpop.f32.mrb[39].mxu1 }
0x2ba7   : > { %v8717_v24 = vadd.f32 %v6593_v9, %v5738_v23 }
0x2ba8   : > { %v8720_v25 = vmul.f32 0.70710677, %v8715_v22 }
0x2ba9   : > { %v8723_v27 = vmul.f32 0.70710677, %v8717_v24 }
0x2baa   : > { %v5756_v61 = vand.u32 2147483647, %v8720_v25  ;;  %vm5752_vm12 = vcmp.ge.f32.partialorder %v8720_v25, 0.0 }
0x2bab   : > { %v5755_v16 = vand.u32 2147483647, %v8723_v27  ;;  %vm5751_vm13 = vcmp.ge.f32.partialorder %v8723_v27, 0.0 }
0x2bac   : > { %v5758_v47 = vmul.f32 0.3275911, %v5756_v61  ;;  %v5782_v44 = vsub.f32 0.0, %v5756_v61 }
0x2bad   : > { %v5757_v45 = vmul.f32 0.3275911, %v5755_v16  ;;  %v7308_v30 = vpop.f32.mrb[40].mxu1  ;;  %v5781_v48 = vsub.f32 0.0, %v5755_v16 }
0x2bae   : > { %v5760_v31 = vadd.f32 1.0, %v5758_v47  ;;  %v8730_v32 = vadd.f32 %v7308_v30, %v6596_v28  ;;  %v5874_v33 = vpop.f32.mrb[41].mxu1  ;;  %v5784_v52 = vmul.f32 %v5782_v44, %v5756_v61  ;;  %v5754_v44 = vsel %vm5752_vm12, 1.0, %v8081_v57 }
0x2baf   : > { %v5759_v35 = vadd.f32 1.0, %v5757_v45  ;;  %v8732_v38 = vadd.f32 %v6596_v28, %v5874_v33  ;;  %v5783_v58 = vmul.f32 %v5781_v48, %v5755_v16 }
0x2bb0   : > { %7999 = vrcp.f32 %v5760_v31  ;;  %v8735_v39 = vmul.f32 0.70710677, %v8730_v32  ;;  %v5787_v62 = vmul.f32 1.442695, %v5784_v52 }
0x2bb1   : > { %8001 = vrcp.f32 %v5759_v35  ;;  %v8738_v40 = vmul.f32 0.70710677, %v8732_v38  ;;  %v5785_v1 = vmul.f32 1.442695, %v5783_v58 }
0x2bb2   : > { %v5892_v43 = vand.u32 2147483647, %v8735_v39  ;;  %vm5888_vm14 = vcmp.ge.f32.partialorder %v8735_v39, 0.0  ;;  %v5884_v39 = vmul.f32 0.5, %v8730_v32  ;;  %v8086_v32 = vmov 64  }
0x2bb3   : > { %v5891_v42 = vand.u32 2147483647, %v8738_v40  ;;  %vm5887_vm15 = vcmp.ge.f32.partialorder %v8738_v40, 0.0  ;;  %7820 = vset.pattern.permute.xlu0 %v8086_v32 }
0x2bb4   : > { %v5894_v7 = vmul.f32 0.3275911, %v5892_v43  ;;  %v5918_v26 = vsub.f32 0.0, %v5892_v43 }
0x2bb5   : > { %v5893_v5 = vmul.f32 0.3275911, %v5891_v42  ;;  %v5917_v2 = vsub.f32 0.0, %v5891_v42 }
0x2bb6   : > { %v5896_v49 = vadd.f32 1.0, %v5894_v7  ;;  %v5920_v54 = vmul.f32 %v5918_v26, %v5892_v43  ;;  %v5748_v26 = vmul.f32 0.5, %v8715_v22 }
0x2bb7   : > { %v5895_v46 = vadd.f32 1.0, %v5893_v5  ;;  %v5919_v11 = vmul.f32 %v5917_v2, %v5891_v42 }
0x2bb8   : > { %8003 = vrcp.f32 %v5896_v49  ;;  %v5923_v13 = vmul.f32 1.442695, %v5920_v54  ;;  %v5889_v54 = vsel %vm5887_vm15, 1.0, %v8081_v57 }
0x2bb9   : > { %8005 = vrcp.f32 %v5895_v46  ;;  %v5921_v37 = vmul.f32 1.442695, %v5919_v11 }
0x2bba   : > { %v8000_v50 = vpop.eup %7999  ;;  %8007 = vpow2.f32 %v5787_v62 }
0x2bbb   : > { %v8002_v55 = vpop.eup %8001  ;;  %v5764_v56 = vmul.f32 1.0614054, %v8000_v50  ;;  %8009 = vpow2.f32 %v5785_v1 }
0x2bbc   : > { %v5763_v59 = vmul.f32 1.0614054, %v8002_v55  ;;  %8011 = vpow2.f32 %v5923_v13 }
0x2bbd   : > { %v5766_v36 = vadd.f32 -1.4531521, %v5764_v56  ;;  %8013 = vpow2.f32 %v5921_v37 }
0x2bbe   : > { %v5765_v0 = vadd.f32 -1.4531521, %v5763_v59 }
0x2bbf   : > { %v5768_v29 = vmul.f32 %v8000_v50, %v5766_v36  ;;  %v5747_v36 = vmul.f32 0.5, %v8717_v24 }
0x2bc0   : > { %v5767_v3 = vmul.f32 %v8002_v55, %v5765_v0 }
0x2bc1   : > { %v5770_v8 = vadd.f32 1.4214138, %v5768_v29 }
0x2bc2   : > { %v8004_v10 = vpop.eup %8003  ;;  %v5769_v19 = vadd.f32 1.4214138, %v5767_v3 }
0x2bc3   : > { %v8006_v6 = vpop.eup %8005  ;;  %v5772_v4 = vmul.f32 %v8000_v50, %v5770_v8  ;;  %v5900_v60 = vmul.f32 1.0614054, %v8004_v10 }
0x2bc4   : > { %v5771_v63 = vmul.f32 %v8002_v55, %v5769_v19  ;;  %v5899_v41 = vmul.f32 1.0614054, %v8006_v6  ;;  %v8008_v47 = vpop.eup %8007  ;;  %v5890_v19 = vsel %vm5888_vm14, 1.0, %v8081_v57 }
0x2bc5   : > { %v5774_v12 = vadd.f32 -0.28449672, %v5772_v4  ;;  %v5902_v14 = vadd.f32 -1.4531521, %v5900_v60  ;;  %v8010_v31 = vpop.eup %8009  ;;  %v5883_v4 = vmul.f32 0.5, %v8732_v38 }
0x2bc6   : > { %v5773_v15 = vadd.f32 -0.28449672, %v5771_v63  ;;  %v5901_v17 = vadd.f32 -1.4531521, %v5899_v41  ;;  %v8012_v59 = vpop.eup %8011  ;;  %v8085_v41 = vmov 32  }
0x2bc7   : > { %v5776_v18 = vmul.f32 %v8000_v50, %v5774_v12  ;;  %v5904_v20 = vmul.f32 %v8004_v10, %v5902_v14  ;;  %v8014_v0 = vpop.eup %8013  ;;  %7818 = vset.pattern.permute.xlu1 %v8085_v41  ;;  %v8087_v14 = vmov 65  }
0x2bc8   : > { %v5775_v21 = vmul.f32 %v8002_v55, %v5773_v15  ;;  %v5903_v51 = vmul.f32 %v8006_v6, %v5901_v17 }
0x2bc9   : > { %v5778_v9 = vadd.f32 0.2548296, %v5776_v18  ;;  %v5906_v53 = vadd.f32 1.4214138, %v5904_v20  ;;  %v6194_v20 = vshrl.u32 %v3627_v34, 7 }
0x2bca   : > { %v5777_v23 = vadd.f32 0.2548296, %v5775_v21  ;;  %v5905_v61 = vadd.f32 1.4214138, %v5903_v51 }
0x2bcb   : > { %v5780_v16 = vmul.f32 %v8000_v50, %v5778_v9  ;;  %v5908_v28 = vmul.f32 %v8004_v10, %v5906_v53  ;;  %v5753_v50 = vsel %vm5751_vm13, 1.0, %v8081_v57  ;;  %v6020_v57 = vld [vmem:[#allocation2 + $0x2e0] sm:$0x3]  ;;  %v6195_v51 = vsub.s32 0, %v6194_v20 }
0x2bcc   : > { %v5779_v45 = vmul.f32 %v8002_v55, %v5777_v23  ;;  %v5907_v30 = vmul.f32 %v8006_v6, %v5905_v61 }
0x2bcd   : > { %v5790_v33 = vmul.f32 %v8008_v47, %v5780_v16  ;;  %v5910_v35 = vadd.f32 -0.28449672, %v5908_v28 }
0x2bce   : > { %v5789_v43 = vmul.f32 %v8010_v31, %v5779_v45  ;;  %v5909_v42 = vadd.f32 -0.28449672, %v5907_v30  ;;  %v6292_v31 = vsub.s32 1, %v6194_v20 }
0x2bcf   : > { %v5792_v7 = vsub.f32 1.0, %v5790_v33  ;;  %v5912_v5 = vmul.f32 %v8004_v10, %v5910_v35 }
0x2bd0   : > { %v5791_v49 = vsub.f32 1.0, %v5789_v43  ;;  %v5911_v48 = vmul.f32 %v8006_v6, %v5909_v42 }
0x2bd1   : > { %v5794_v46 = vmul.f32 %v5792_v7, %v5754_v44  ;;  %v5914_v52 = vadd.f32 0.2548296, %v5912_v5 }
0x2bd2   : > { %v5793_v55 = vmul.f32 %v5791_v49, %v5753_v50  ;;  %v5913_v56 = vadd.f32 0.2548296, %v5911_v48 }
0x2bd3   : > { %v5796_v58 = vadd.f32 1.0, %v5794_v46  ;;  %v5916_v25 = vmul.f32 %v8004_v10, %v5914_v52 }
0x2bd4   : > { %v5795_v27 = vadd.f32 1.0, %v5793_v55  ;;  %v5915_v62 = vmul.f32 %v8006_v6, %v5913_v56 }
0x2bd5   : > { %v5926_v29 = vmul.f32 %v8012_v59, %v5916_v25  ;;  %v5798_v3 = vmul.f32 %v5796_v58, %v5748_v26 }
0x2bd6   : > { %v5797_v1 = vmul.f32 %v5795_v27, %v5747_v36  ;;  %v5925_v2 = vmul.f32 %v8014_v0, %v5915_v62 }
0x2bd7   : > { %v5928_v8 = vsub.f32 1.0, %v5926_v29 }
0x2bd8   : > { %v5927_v10 = vsub.f32 1.0, %v5925_v2  ;;  %7317 = vmatprep.mubr.msk.f32.mxu0 %vm237_vm0, %v5797_v1 }
0x2bd9   : > { %v5930_v24 = vmul.f32 %v5928_v8, %v5890_v19  ;;  %7318 = vmatmul.mubr.msk.f32.vlgmr.msra.gmra.mrb[42].mxu0 %vm237_vm0, %v5798_v3 }
0x2bda   : > { %v5929_v22 = vmul.f32 %v5927_v10, %v5889_v54 }
0x2bdb   : > { %v5932_v6 = vadd.f32 1.0, %v5930_v24 }
0x2bdc   : > { %v5931_v40 = vadd.f32 1.0, %v5929_v22 }
0x2bdd   : > { %v5934_v60 = vmul.f32 %v5932_v6, %v5884_v39 }
0x2bde   : > { %v5933_v11 = vmul.f32 %v5931_v40, %v5883_v4 }
0x2be0   : > { %v7622_v63 = vpack.c.bf16 %v5934_v60, %v5933_v11 }
0x2be2   : > { %7624 = vmatpush3.bf16.xpose.msk.msra.mxu1 %vm7623_vm4, %v7622_v63  ;;  %7627 = vmatprep.subr.msk.bf16.mxu0 %vm7623_vm4, %v7622_v63 }
0x2be3   : > { %7630 = vmatpush3.bf16.xpose.msk.msra.mxu0 %vm7623_vm4, %v7622_v63  ;;  %7633 = vmatprep.subr.msk.bf16.mxu1 %vm7623_vm4, %v7622_v63 }
0x2be9   : > { %7325 = vmatmul.mubr.msk.f32.vlgmr.msra.gmra.mrb[42].mxu1 %vm237_vm0, %v6020_v57 }
0x2bea   : > { %7636 = vmatpush3.bf16.xpose.msk.msra.mxu1 %vm7623_vm4, %v7622_v63 }
0x2cac   : > { %v7319_v38 = vpop.f32.mrb[42].mxu0 }
0x2cad   : > { %6209 = vrot.lane.b32.xlu1 %v7319_v38, %s8070_s13  ;;  %v6011_v12 = vpop.f32.mrb[43].mxu0 }
0x2cae   : > { %6207 = vrot.lane.b32.xlu0 %v6011_v12, %s8070_s13  ;;  %7331 = vmatprep.mubr.msk.f32.mxu0 %vm237_vm0, %v6011_v12  ;;  %s6617_s13 = sshll.u32 %s8792_s16, 5 }
0x2caf   : > { %7332 = vmatmul.mubr.msk.f32.vlgmr.msra.gmra.mrb[44].mxu0 %vm237_vm0, %v7319_v38  ;;  %s220_s27 = scalar_lea.vmem %s8780_s3, %s6617_s13 }
0x2cb1   : > { %6023 = vperm.xlu1 %7818, %v6020_v57  }
0x2cb2   : > { %6106 = vperm.xlu0 %7820, %v6011_v12  }
0x2cb5   : > { %7819 = vset.pattern.permute.xlu1 %v8086_v32 }
0x2cb6   : > { %6111 = vperm.xlu1 %7819, %v7319_v38   ;;  %7822 = vset.pattern.permute.xlu0 %v8087_v14 }
0x2cb7   : > { %6204 = vperm.xlu0 %7822, %v7319_v38  }
0x2cba   : > { %7821 = vset.pattern.permute.xlu1 %v8087_v14 }
0x2cbb   : > { %6200 = vperm.xlu1 %7821, %v6011_v12  }
0x2cbc   : > { %v6100_v15 = vpop.f32.mrb[42].mxu1 }
0x2cbd   : > { %v7326_v13 = vpop.f32.mrb[43].mxu1 }
0x2d1f   : > { %v6210_v18 = vpop.permute.xlu1 %6209 }
0x2d20   : > { %v6208_v17 = vpop.permute.xlu0 %6207 }
0x2d21   : > { %7338 = vmatprep.mubr.msk.f32.mxu1 %vm237_vm0, %v6208_v17 }
0x2d22   : > { %7339 = vmatmul.mubr.msk.f32.vlgmr.msra.gmra.mrb[44].mxu1 %vm237_vm0, %v6210_v18 }
0x2d30   : > { %v6024_v37 = vpop.permute.xlu1 %6023 }
0x2d31   : > { %v6101_v21 = vadd.f32 %v6100_v15, %v6024_v37  ;;  %v6107_v61 = vpop.permute.xlu0 %6106 }
0x2d33   : > { %v6196_v9 = vrot.slane %v6101_v21, %v6195_v51  ;;  %v6293_v42 = vrot.slane %v6101_v21, %v6292_v31 }
0x2d35   : > { %v6112_v53 = vpop.permute.xlu1 %6111 }
0x2d36   : > { %v6205_v33 = vpop.permute.xlu0 %6204 }
0x2d3a   : > { %v6201_v43 = vpop.permute.xlu1 %6200 }
0x2d82   : > { %v7333_v23 = vpop.f32.mrb[44].mxu0 }
0x2d83   : > { %v6190_v16 = vadd.f32 %v7333_v23, %v6112_v53  ;;  %v6184_v28 = vpop.f32.mrb[45].mxu0 }
0x2d84   : > { %v6185_v47 = vadd.f32 %v6184_v28, %v6107_v61 }
0x2d85   : > { %v6198_v45 = vadd.f32 %v6196_v9, %v6190_v16 }
0x2d86   : > { %v6197_v30 = vadd.f32 %v6196_v9, %v6185_v47 }
0x2df5   : > { %v7340_v35 = vpop.f32.mrb[44].mxu1 }
0x2df6   : > { %v6287_v7 = vadd.f32 %v7340_v35, %v6205_v33  ;;  %v6281_v5 = vpop.f32.mrb[45].mxu1 }
0x2df7   : > { %v6282_v34 = vadd.f32 %v6281_v5, %v6201_v43 }
0x2df8   : > { %v6295_v44 = vadd.f32 %v6293_v42, %v6287_v7 }
0x2df9   : > { %v6294_v49 = vadd.f32 %v6293_v42, %v6282_v34 }
0x2dfa   : > { %v6297_v48 = vmax.f32 %v6198_v45, %v6295_v44 }
0x2dfb   : > { %v6296_v46 = vmax.f32 %v6197_v30, %v6294_v49 }
0x2dfc   : > { %v6299_v50 = vsub.f32 %v6198_v45, %v6297_v48  ;;  %v6305_v52 = vsub.f32 %v6295_v44, %v6297_v48 }
0x2dfd   : > { %v6298_v55 = vsub.f32 %v6197_v30, %v6296_v46  ;;  %v6304_v56 = vsub.f32 %v6294_v49, %v6296_v46 }
0x2dfe   : > { %v6302_v58 = vmul.f32 1.442695, %v6299_v50  ;;  %v6308_v25 = vmul.f32 1.442695, %v6305_v52 }
0x2dff   : > { %v6300_v59 = vmul.f32 1.442695, %v6298_v55  ;;  %v6306_v36 = vmul.f32 1.442695, %v6304_v56 }
0x2e00   : > { %8015 = vpow2.f32 %v6302_v58 }
0x2e01   : > { %8017 = vpow2.f32 %v6308_v25 }
0x2e02   : > { %8019 = vpow2.f32 %v6300_v59 }
0x2e03   : > { %8021 = vpow2.f32 %v6306_v36 }
0x2e0a   : > { %v8016_v27 = vpop.eup %8015 }
0x2e0b   : > { %v8018_v62 = vpop.eup %8017 }
0x2e0c   : > { %v8020_v0 = vpop.eup %8019  ;;  %v6311_v26 = vadd.f32 %v8018_v62, %v8016_v27 }
0x2e0d   : > { %v8022_v29 = vpop.eup %8021 }
0x2e0e   : > { %8023 = vrcp.f32 %v6311_v26  ;;  %v6310_v1 = vadd.f32 %v8022_v29, %v8020_v0 }
0x2e10   : > { %8025 = vrcp.f32 %v6310_v1 }
0x2e18   : > { %v8024_v2 = vpop.eup %8023 }
0x2e19   : > { %v6317_v3 = vmul.f32 %v8024_v2, %v8016_v27  ;;  %v6321_v8 = vmul.f32 %v8024_v2, %v8018_v62 }
0x2e1a   : > { %v8026_v19 = vpop.eup %8025 }
0x2e1b   : > { %6319 = vst.msk [vmem:[%s220_s27 + $0x8] sm:$0xff] %vm413_vm3, %v6317_v3  ;;  %6613 = vst.msk [vmem:[%s220_s27 + $0x18] sm:$0xff] %vm413_vm3, %v6321_v8  ;;  %v6316_v10 = vmul.f32 %v8026_v19, %v8020_v0  ;;  %v6320_v24 = vmul.f32 %v8026_v19, %v8022_v29 }
0x2e1d   : > { %6318 = vst.msk [vmem:[%s220_s27] sm:$0xff] %vm413_vm3, %v6316_v10  ;;  %6612 = vst.msk [vmem:[%s220_s27 + $0x10] sm:$0xff] %vm413_vm3, %v6320_v24 }
0x2e1e PF: > { %s16_s15 = sadd.s32 1, %s8065_s15  }
0x2e1f   : > { %p13_p3 = scmp.ge.s32.totalorder %s16_s15, 4  }
0x2e21   :  { %15 = sbr.rel (!%p13_p3) target bundleno = 1 (0x1), region = 80 }
0x2e28   :  { %6362 = vsyncpa [#allocation3], 1 }
0x2e29   :  { %6364 = vsyncpa [#allocation3 + $0x1], 1 }

</bundles_post_ra>
